<compile_context>
chip_gen: v6e
topology: v6e:2x2x1
jax: 0.10.0
libtpu: 0.0.40
codegen_flags: <defaults>
</compile_context>

<pallas_src>
import jax
import jax.numpy as jnp
import numpy as np
from jax import lax
from jax.experimental import pallas as pl
from jax.experimental.pallas import tpu as pltpu


# ----------------------------------------------------------------------------
# parameter prep (plain JAX / numpy glue, run once at module construction)
# ----------------------------------------------------------------------------
def _std_weight(w):
    """StdConv2d weight standardization: per-output-filter, biased var, eps=1e-5."""
    m = jnp.mean(w, axis=(1, 2, 3), keepdims=True)
    v = jnp.var(w, axis=(1, 2, 3), keepdims=True)
    return (w - m) / jnp.sqrt(v + 1e-5)


def _pad_axis(a, axis, target):
    pad = target - a.shape[axis]
    if pad == 0:
        return a
    cfg = [(0, 0)] * a.ndim
    cfg[axis] = (0, pad)
    return jnp.pad(a, cfg)


def _member_matrix(c, cpg):
    """(c, c) f32 0/1 block-diagonal matrix: reduce+broadcast group sums in one pass."""
    g = np.arange(c) // cpg
    return jnp.asarray((g[:, None] == g[None, :]).astype(np.float32))


# ----------------------------------------------------------------------------
# in-kernel GroupNorm epilogue (f32 stats, affine folded into one FMA)
# ----------------------------------------------------------------------------
def _gn_epilogue(xf, gamma, beta, member, *, count, eps, relu):
    """GroupNorm of an (S, C) f32 tile.

    gamma/beta are (1, C) f32 and are zero in any lane padding, so padded channels come
    out exactly 0.  member is None for channels-per-group == 1 (no cross-channel
    reduction needed); otherwise it is a host-precomputed (C, C) f32 0/1 block-diagonal
    matrix that reduces AND broadcasts the group statistics in one pass, keeping the
    statistics in f32 end to end.
    """
    ssum = jnp.sum(xf, axis=0, keepdims=True)            # (1, C) f32
    ssq = jnp.sum(xf * xf, axis=0, keepdims=True)        # (1, C) f32
    if member is not None:
        ssum = jnp.dot(ssum, member, preferred_element_type=jnp.float32)
        ssq = jnp.dot(ssq, member, preferred_element_type=jnp.float32)
    inv_n = 1.0 / count
    mean = ssum * inv_n
    var = ssq * inv_n - mean * mean                      # f32, no bf16 round-trip
    a = lax.rsqrt(var + eps) * gamma                     # fold affine: y = x*a + b
    b = beta - mean * a
    y = xf * a + b
    return jnp.maximum(y, 0.0) if relu else y


# ----------------------------------------------------------------------------
# fused PreActBottleneck kernel (one grid step == one sample)
# ----------------------------------------------------------------------------
def _make_block_kernel(*, h, w, cmid_p, has_down, has_m_mid, has_m_out,
                       cpg_mid, cpg_out, eps_gn, eps_proj):
    s = h * w

    def kernel(*refs):
        it = iter(refs)
        x_ref = next(it)
        w1_ref = next(it)
        w2_ref = next(it)
        w3_ref = next(it)
        wd_ref = next(it) if has_down else None
        g1_ref = next(it)
        b1_ref = next(it)
        g2_ref = next(it)
        b2_ref = next(it)
        g3_ref = next(it)
        b3_ref = next(it)
        gp_ref = next(it) if has_down else None
        bp_ref = next(it) if has_down else None
        m_mid_ref = next(it) if has_m_mid else None
        m_out_ref = next(it) if has_m_out else None
        o_ref = next(it)
        xpad_ref = next(it)

        m_mid = m_mid_ref[...] if has_m_mid else None
        m_out = m_out_ref[...] if has_m_out else None

        # ---- conv1 (1x1) + GN1 + ReLU  (bf16 MXU operands, f32 accumulation) ------
        y = jnp.dot(x_ref[...], w1_ref[...], preferred_element_type=jnp.float32)
        y = _gn_epilogue(y, g1_ref[...], b1_ref[...], m_mid,
                         count=float(s * cpg_mid), eps=eps_gn, relu=True)

        # ---- conv2 (3x3, stride 1, pad 1) + GN2 + ReLU ------------------------------
        # Zero only the halo ring (interior is fully overwritten each step; scratch
        # persists across steps).  Per-step, unconditional: correct on any core split.
        zrow = jnp.zeros((1, w + 2, cmid_p), xpad_ref.dtype)
        zcol = jnp.zeros((h, 1, cmid_p), xpad_ref.dtype)
        xpad_ref[pl.ds(0, 1), :, :] = zrow
        xpad_ref[pl.ds(h + 1, 1), :, :] = zrow
        xpad_ref[pl.ds(1, h), pl.ds(0, 1), :] = zcol
        xpad_ref[pl.ds(1, h), pl.ds(w + 1, 1), :] = zcol
        xpad_ref[pl.ds(1, h), pl.ds(1, w), :] = y.reshape(h, w, cmid_p)

        # 9 accumulating K=Cmid matmuls straight from the padded scratch (no im2col
        # slab / concat copy; the v5e-preferred form, near-neutral on v6e/v7x).
        acc = jnp.zeros((s, cmid_p), jnp.float32)
        for dh in range(3):
            for dw in range(3):
                tap = xpad_ref[pl.ds(dh, h), pl.ds(dw, w), :]
                tap = tap.reshape(s, cmid_p).astype(jnp.bfloat16)
                acc = acc + jnp.dot(tap, w2_ref[dh * 3 + dw],
                                    preferred_element_type=jnp.float32)
        y = _gn_epilogue(acc, g2_ref[...], b2_ref[...], m_mid,
                         count=float(s * cpg_mid), eps=eps_gn, relu=True)

        # ---- conv3 (1x1) + GN3 -------------------------------------------------------
        y = jnp.dot(y.astype(jnp.bfloat16), w3_ref[...],
                    preferred_element_type=jnp.float32)           # (S, Cout) f32
        y = _gn_epilogue(y, g3_ref[...], b3_ref[...], m_out,
                         count=float(s * cpg_out), eps=eps_gn, relu=False)

        # ---- residual path (deferred so it is never live across conv1-3) + ReLU ----
        if has_down:
            r = jnp.dot(x_ref[...], wd_ref[...], preferred_element_type=jnp.float32)
            res = _gn_epilogue(r, gp_ref[...], bp_ref[...], None,
                               count=float(s), eps=eps_proj, relu=False)
        else:
            res = x_ref[...].astype(jnp.float32)                   # cin == cout, stride 1
        o_ref[...] = jnp.maximum(y + res, 0.0).astype(o_ref.dtype)

    return kernel


# ----------------------------------------------------------------------------
# jitted forward builder (one fused pallas_call, per-sample grid)
# ----------------------------------------------------------------------------
def _make_forward(cfg):
    cin, cout, cmid_p = cfg["cin"], cfg["cout"], cfg["cmid_p"]
    cpg_mid, cpg_out = cfg["cpg_mid"], cfg["cpg_out"]
    has_down = cfg["has_down"]
    has_m_mid, has_m_out = cpg_mid > 1, cpg_out > 1

    def fwd(params, x_nhwc):
        n, h, w, cin_in = x_nhwc.shape
        assert cin_in == cin
        s = h * w
        x2d = x_nhwc.reshape(n * s, cin)                 # free reshape, no transpose

        args = [x2d, params["w1"], params["w2"], params["w3"]]
        in_specs = [
            pl.BlockSpec((s, cin), lambda i: (i, 0)),
            pl.BlockSpec((cin, cmid_p), lambda i: (0, 0)),
            pl.BlockSpec((9, cmid_p, cmid_p), lambda i: (0, 0, 0)),
            pl.BlockSpec((cmid_p, cout), lambda i: (0, 0)),
        ]
        if has_down:
            args.append(params["wd"])
            in_specs.append(pl.BlockSpec((cin, cout), lambda i: (0, 0)))
        vec_keys = ["g1", "b1", "g2", "b2", "g3", "b3"]
        if has_down:
            vec_keys += ["gp", "bp"]
        for k in vec_keys:
            v = params[k]
            args.append(v)
            in_specs.append(pl.BlockSpec(v.shape, lambda i: (0, 0)))
        if has_m_mid:
            args.append(params["m_mid"])
            in_specs.append(pl.BlockSpec((cmid_p, cmid_p), lambda i: (0, 0)))
        if has_m_out:
            args.append(params["m_out"])
            in_specs.append(pl.BlockSpec((cout, cout), lambda i: (0, 0)))

        kernel = _make_block_kernel(
            h=h, w=w, cmid_p=cmid_p, has_down=has_down,
            has_m_mid=has_m_mid, has_m_out=has_m_out,
            cpg_mid=cpg_mid, cpg_out=cpg_out,
            eps_gn=1e-6, eps_proj=1e-5)

        # explicit scoped-VMEM budget from the actual per-step buffers (>= default).
        weight_bytes = sum(int(np.prod(a.shape)) * np.dtype(a.dtype).itemsize
                           for a in args[1:])
        io_bytes = 2 * (s * cin + s * cout) * 2          # bf16 in/out, double-buffered
        xpad_bytes = (h + 2) * (w + 2) * cmid_p * 4
        live_bytes = s * (2 * cmid_p + cout + cin) * 4   # rough f32 live intermediates
        vmem_limit = int(min(max(2 * weight_bytes + io_bytes + xpad_bytes
                                 + live_bytes + (4 << 20), 32 << 20), 128 << 20))

        out2d = pl.pallas_call(
            kernel,
            out_shape=jax.ShapeDtypeStruct((n * s, cout), jnp.bfloat16),
            grid=(n,),
            in_specs=in_specs,
            out_specs=pl.BlockSpec((s, cout), lambda i: (i, 0)),
            scratch_shapes=[pltpu.VMEM((h + 2, w + 2, cmid_p), jnp.float32)],
            compiler_params=pltpu.CompilerParams(
                dimension_semantics=("parallel",),
                vmem_limit_bytes=vmem_limit),
        )(*args)
        return out2d.reshape(n, h, w, cout)

    return jax.jit(fwd)


# ----------------------------------------------------------------------------
# PreActBottleneck module (forward via the fused Pallas kernel)
# ----------------------------------------------------------------------------
class PreActBottleneckPallas:
    GROUPS = 32

    def __init__(self, key, cin, cout=None, cmid=None, stride=1):
        cout = cout or cin
        cmid = cmid or cout // 4
        assert stride == 1  # TODO(synk): strided 3x3 / strided downsample not implemented
        assert cmid % self.GROUPS == 0 and cout % self.GROUPS == 0

        self.cin, self.cout, self.cmid, self.stride = cin, cout, cmid, stride
        cmid_p = -(-cmid // 128) * 128                   # lane-dense intermediate width
        self.cmid_p = cmid_p
        cpg_mid = cmid // self.GROUPS
        cpg_out = cout // self.GROUPS

        ks = jax.random.split(key, 12)
        # conv weights in PyTorch OIHW convention (raw, for the reference path)
        self.w1 = 0.1 * jax.random.normal(ks[0], (cmid, cin, 1, 1), jnp.float32)
        self.w2 = 0.1 * jax.random.normal(ks[1], (cmid, cmid, 3, 3), jnp.float32)
        self.w3 = 0.1 * jax.random.normal(ks[2], (cout, cmid, 1, 1), jnp.float32)
        self.gn1_g = 1.0 + 0.1 * jax.random.normal(ks[3], (cmid,), jnp.float32)
        self.gn1_b = 0.1 * jax.random.normal(ks[4], (cmid,), jnp.float32)
        self.gn2_g = 1.0 + 0.1 * jax.random.normal(ks[5], (cmid,), jnp.float32)
        self.gn2_b = 0.1 * jax.random.normal(ks[6], (cmid,), jnp.float32)
        self.gn3_g = 1.0 + 0.1 * jax.random.normal(ks[7], (cout,), jnp.float32)
        self.gn3_b = 0.1 * jax.random.normal(ks[8], (cout,), jnp.float32)
        self.has_downsample = (stride != 1) or (cin != cout)
        if self.has_downsample:
            self.wd = 0.1 * jax.random.normal(ks[9], (cout, cin, 1, 1), jnp.float32)
            self.gnp_g = 1.0 + 0.1 * jax.random.normal(ks[10], (cout,), jnp.float32)
            self.gnp_b = 0.1 * jax.random.normal(ks[11], (cout,), jnp.float32)

        # ---- one-time weight prep: standardize -> transpose -> pad -> bf16 ----------
        p = {}
        p["w1"] = _pad_axis(_std_weight(self.w1)[:, :, 0, 0].T, 1, cmid_p).astype(jnp.bfloat16)
        w2t = jnp.transpose(_std_weight(self.w2), (2, 3, 1, 0))        # (kh, kw, ci, co)
        w2t = _pad_axis(_pad_axis(w2t, 3, cmid_p), 2, cmid_p)
        p["w2"] = w2t.reshape(9, cmid_p, cmid_p).astype(jnp.bfloat16)  # [dh*3+dw] -> (ci, co)
        p["w3"] = _pad_axis(_std_weight(self.w3)[:, :, 0, 0].T, 0, cmid_p).astype(jnp.bfloat16)
        p["g1"] = _pad_axis(self.gn1_g.reshape(1, cmid), 1, cmid_p)
        p["b1"] = _pad_axis(self.gn1_b.reshape(1, cmid), 1, cmid_p)
        p["g2"] = _pad_axis(self.gn2_g.reshape(1, cmid), 1, cmid_p)
        p["b2"] = _pad_axis(self.gn2_b.reshape(1, cmid), 1, cmid_p)
        p["g3"] = self.gn3_g.reshape(1, cout)
        p["b3"] = self.gn3_b.reshape(1, cout)
        if self.has_downsample:
            p["wd"] = _std_weight(self.wd)[:, :, 0, 0].T.astype(jnp.bfloat16)   # (cin, cout)
            p["gp"] = self.gnp_g.reshape(1, cout)
            p["bp"] = self.gnp_b.reshape(1, cout)
        if cpg_mid > 1:
            p["m_mid"] = _member_matrix(cmid_p, cpg_mid)
        if cpg_out > 1:
            p["m_out"] = _member_matrix(cout, cpg_out)

        # Padded output lanes of w1/w2/w3 MUST be exact zeros (they feed conv2's K dim
        # and the padded-channel GN stats) -- guaranteed because padding is applied
        # after standardization; assert once at init.
        if cmid_p != cmid:
            assert bool(jnp.all(p["w1"][:, cmid:] == 0))
            assert bool(jnp.all(p["w2"][:, cmid:, :] == 0))
            assert bool(jnp.all(p["w2"][:, :, cmid:] == 0))
            assert bool(jnp.all(p["w3"][cmid:, :] == 0))

        self._params = p
        self._fwd = _make_forward(dict(cin=cin, cout=cout, cmid_p=cmid_p,
                                       cpg_mid=cpg_mid, cpg_out=cpg_out,
                                       has_down=self.has_downsample))

    # ---- forward (channels-last, bf16 activation I/O, one fused Pallas call) --------
    def __call__(self, x_nhwc):
        """(N, H, W, Cin) -> (N, H, W, Cout).  bf16 in / bf16 out is the intended
        inter-block HBM carry format; other input dtypes are cast once."""
        if x_nhwc.dtype != jnp.bfloat16:
            x_nhwc = x_nhwc.astype(jnp.bfloat16)
        return self._fwd(self._params, x_nhwc)

    def forward_nchw(self, x_nchw):
        """NCHW interop wrapper (layout conversion is NOT on the fused-kernel hot path)."""
        y = self(jnp.transpose(x_nchw, (0, 2, 3, 1)))
        return jnp.transpose(y, (0, 3, 1, 2))

    # ---- pure-JAX reference (validation only; matched MXU numerics policy) ----------
    def reference(self, x_nhwc_f32):
        x = jnp.transpose(x_nhwc_f32.astype(jnp.float32), (0, 3, 1, 2))

        def conv(xx, wt, pad):
            return lax.conv_general_dilated(
                xx.astype(jnp.bfloat16), _std_weight(wt).astype(jnp.bfloat16),
                window_strides=(1, 1), padding=((pad, pad), (pad, pad)),
                dimension_numbers=("NCHW", "OIHW", "NCHW"),
                preferred_element_type=jnp.float32)

        def gn(xx, gamma, beta, groups, eps):
            nn_, c, hh, ww = xx.shape
            xg = xx.reshape(nn_, groups, c // groups, hh * ww)
            mean = jnp.mean(xg, axis=(2, 3), keepdims=True)
            var = jnp.var(xg, axis=(2, 3), keepdims=True)
            xn = ((xg - mean) / jnp.sqrt(var + eps)).reshape(nn_, c, hh, ww)
            return xn * gamma.reshape(1, c, 1, 1) + beta.reshape(1, c, 1, 1)

        residual = x
        if self.has_downsample:
            residual = gn(conv(x, self.wd, 0), self.gnp_g, self.gnp_b, self.cout, 1e-5)
        y = jax.nn.relu(gn(conv(x, self.w1, 0), self.gn1_g, self.gn1_b, 32, 1e-6))
        y = jax.nn.relu(gn(conv(y, self.w2, 1), self.gn2_g, self.gn2_b, 32, 1e-6))
        y = gn(conv(y, self.w3, 0), self.gn3_g, self.gn3_b, 32, 1e-6)
        out = jax.nn.relu(residual + y)
        return jnp.transpose(out, (0, 2, 3, 1))


if __name__ == "__main__":
    key = jax.random.PRNGKey(0)
    kx, kp = jax.random.split(key)

    # Smallest shapes consistent with the module: GroupNorm(32, cmid) requires
    # cmid % 32 == 0 and cmid = cout // 4  =>  cout = 128, cmid = 32, cin = 64.
    N, CIN, COUT, H, W = 2, 64, 128, 16, 16
    x = jax.random.normal(kx, (N, H, W, CIN), jnp.float32).astype(jnp.bfloat16)

    block = PreActBottleneckPallas(kp, cin=CIN, cout=COUT, stride=1)

    out = jax.block_until_ready(block(x))                              # NHWC, bf16
    ref = jax.block_until_ready(block.reference(x.astype(jnp.float32)))
    np.testing.assert_allclose(np.asarray(out.astype(jnp.float32)),
                               np.asarray(ref), rtol=2e-2, atol=2e-2)

    print("KERNEL_OK")
</pallas_src>

<mosaic_0001>
module attributes {stable_mosaic.version = 11 : i64} {
  func.func @kernel(%arg0: i32, %arg1: memref<256x64xbf16, #tpu.memory_space<vmem>>, %arg2: memref<64x128xbf16, #tpu.memory_space<vmem>>, %arg3: memref<9x128x128xbf16, #tpu.memory_space<vmem>>, %arg4: memref<128x128xbf16, #tpu.memory_space<vmem>>, %arg5: memref<64x128xbf16, #tpu.memory_space<vmem>>, %arg6: memref<1x128xf32, #tpu.memory_space<vmem>>, %arg7: memref<1x128xf32, #tpu.memory_space<vmem>>, %arg8: memref<1x128xf32, #tpu.memory_space<vmem>>, %arg9: memref<1x128xf32, #tpu.memory_space<vmem>>, %arg10: memref<1x128xf32, #tpu.memory_space<vmem>>, %arg11: memref<1x128xf32, #tpu.memory_space<vmem>>, %arg12: memref<1x128xf32, #tpu.memory_space<vmem>>, %arg13: memref<1x128xf32, #tpu.memory_space<vmem>>, %arg14: memref<128x128xf32, #tpu.memory_space<vmem>>, %arg15: memref<256x128xbf16, #tpu.memory_space<vmem>>, %arg16: memref<18x18x128xf32, #tpu.memory_space<vmem>>) attributes {dimension_semantics = [#tpu.dimension_semantics<parallel>], iteration_bounds = array<i64: 2>, scalar_prefetch = 0 : i64, scratch_operands = 1 : i64, tpu.core_type = #tpu.core_type<tc>, window_params = [{transform_indices = @transform_0, window_bounds = array<i64: 256, 64>}, {pipeline_mode = #tpu.pipeline_mode<synchronous>, transform_indices = @transform_1, window_bounds = array<i64: 64, 128>}, {pipeline_mode = #tpu.pipeline_mode<synchronous>, transform_indices = @transform_2, window_bounds = array<i64: 9, 128, 128>}, {pipeline_mode = #tpu.pipeline_mode<synchronous>, transform_indices = @transform_3, window_bounds = array<i64: 128, 128>}, {pipeline_mode = #tpu.pipeline_mode<synchronous>, transform_indices = @transform_4, window_bounds = array<i64: 64, 128>}, {pipeline_mode = #tpu.pipeline_mode<synchronous>, transform_indices = @transform_5, window_bounds = array<i64: 1, 128>}, {pipeline_mode = #tpu.pipeline_mode<synchronous>, transform_indices = @transform_6, window_bounds = array<i64: 1, 128>}, {pipeline_mode = #tpu.pipeline_mode<synchronous>, transform_indices = @transform_7, window_bounds = array<i64: 1, 128>}, {pipeline_mode = #tpu.pipeline_mode<synchronous>, transform_indices = @transform_8, window_bounds = array<i64: 1, 128>}, {pipeline_mode = #tpu.pipeline_mode<synchronous>, transform_indices = @transform_9, window_bounds = array<i64: 1, 128>}, {pipeline_mode = #tpu.pipeline_mode<synchronous>, transform_indices = @transform_10, window_bounds = array<i64: 1, 128>}, {pipeline_mode = #tpu.pipeline_mode<synchronous>, transform_indices = @transform_11, window_bounds = array<i64: 1, 128>}, {pipeline_mode = #tpu.pipeline_mode<synchronous>, transform_indices = @transform_12, window_bounds = array<i64: 1, 128>}, {pipeline_mode = #tpu.pipeline_mode<synchronous>, transform_indices = @transform_13, window_bounds = array<i64: 128, 128>}, {transform_indices = @transform_14, window_bounds = array<i64: 256, 128>}]} {
    %c0 = arith.constant 0 : index
    %c0_0 = arith.constant 0 : index
    %0 = vector.load %arg14[%c0, %c0_0] : memref<128x128xf32, #tpu.memory_space<vmem>>, vector<128x128xf32>
    %c0_1 = arith.constant 0 : index
    %c0_2 = arith.constant 0 : index
    %1 = vector.load %arg1[%c0_1, %c0_2] : memref<256x64xbf16, #tpu.memory_space<vmem>>, vector<256x64xbf16>
    %c0_3 = arith.constant 0 : index
    %c0_4 = arith.constant 0 : index
    %2 = vector.load %arg2[%c0_3, %c0_4] : memref<64x128xbf16, #tpu.memory_space<vmem>>, vector<64x128xbf16>
    %cst = arith.constant dense<0.000000e+00> : vector<256x128xf32>
    %3 = tpu.matmul %1, %2, %cst {dimension_numbers = #tpu.dot_dimension_numbers<[1], [0], [0], [1], [0, 0, 1, 1], [], []>} : vector<256x64xbf16>, vector<64x128xbf16>, vector<256x128xf32> -> vector<256x128xf32>
    %c0_5 = arith.constant 0 : index
    %c0_6 = arith.constant 0 : index
    %4 = vector.load %arg6[%c0_5, %c0_6] : memref<1x128xf32, #tpu.memory_space<vmem>>, vector<1x128xf32>
    %c0_7 = arith.constant 0 : index
    %c0_8 = arith.constant 0 : index
    %5 = vector.load %arg7[%c0_7, %c0_8] : memref<1x128xf32, #tpu.memory_space<vmem>>, vector<1x128xf32>
    %cst_9 = arith.constant dense<0.000000e+00> : vector<128xf32>
    %6 = vector.multi_reduction <add>, %3, %cst_9 [0] : vector<256x128xf32> to vector<128xf32>
    %7 = vector.shape_cast %6 : vector<128xf32> to vector<1x128xf32>
    %8 = arith.mulf %3, %3 : vector<256x128xf32>
    %cst_10 = arith.constant dense<0.000000e+00> : vector<128xf32>
    %9 = vector.multi_reduction <add>, %8, %cst_10 [0] : vector<256x128xf32> to vector<128xf32>
    %10 = vector.shape_cast %9 : vector<128xf32> to vector<1x128xf32>
    %cst_11 = arith.constant 3.906250e-03 : f32
    %11 = vector.broadcast %cst_11 : f32 to vector<1x128xf32>
    %12 = arith.mulf %7, %11 : vector<1x128xf32>
    %cst_12 = arith.constant 3.906250e-03 : f32
    %13 = vector.broadcast %cst_12 : f32 to vector<1x128xf32>
    %14 = arith.mulf %10, %13 : vector<1x128xf32>
    %15 = arith.mulf %12, %12 : vector<1x128xf32>
    %16 = arith.subf %14, %15 : vector<1x128xf32>
    %cst_13 = arith.constant 9.99999997E-7 : f32
    %17 = vector.broadcast %cst_13 : f32 to vector<1x128xf32>
    %18 = arith.addf %16, %17 : vector<1x128xf32>
    %19 = math.rsqrt %18 : vector<1x128xf32>
    %20 = arith.mulf %19, %4 : vector<1x128xf32>
    %21 = arith.mulf %12, %20 : vector<1x128xf32>
    %22 = arith.subf %5, %21 : vector<1x128xf32>
    %23 = vector.broadcast %20 : vector<1x128xf32> to vector<256x128xf32>
    %24 = arith.mulf %3, %23 : vector<256x128xf32>
    %25 = vector.broadcast %22 : vector<1x128xf32> to vector<256x128xf32>
    %26 = arith.addf %24, %25 : vector<256x128xf32>
    %cst_14 = arith.constant 0.000000e+00 : f32
    %27 = vector.broadcast %cst_14 : f32 to vector<256x128xf32>
    %28 = arith.maximumf %26, %27 : vector<256x128xf32>
    %cst_15 = arith.constant 0.000000e+00 : f32
    %29 = vector.broadcast %cst_15 : f32 to vector<1x18x128xf32>
    %cst_16 = arith.constant 0.000000e+00 : f32
    %30 = vector.broadcast %cst_16 : f32 to vector<16x1x128xf32>
    %c0_17 = arith.constant 0 : index
    %c0_18 = arith.constant 0 : index
    %c0_19 = arith.constant 0 : index
    %31 = vector.load %arg16[%c0_17, %c0_18, %c0_19] : memref<18x18x128xf32, #tpu.memory_space<vmem>>, vector<1x18x128xf32>
    tpu.vector_store %arg16[%c0_17, %c0_18, %c0_19], %29 {strides = array<i32>} : memref<18x18x128xf32, #tpu.memory_space<vmem>>, vector<1x18x128xf32>,
    %c17 = arith.constant 17 : index
    %c0_20 = arith.constant 0 : index
    %c0_21 = arith.constant 0 : index
    %32 = vector.load %arg16[%c17, %c0_20, %c0_21] : memref<18x18x128xf32, #tpu.memory_space<vmem>>, vector<1x18x128xf32>
    tpu.vector_store %arg16[%c17, %c0_20, %c0_21], %29 {strides = array<i32>} : memref<18x18x128xf32, #tpu.memory_space<vmem>>, vector<1x18x128xf32>,
    %c1 = arith.constant 1 : index
    %c0_22 = arith.constant 0 : index
    %c0_23 = arith.constant 0 : index
    %33 = vector.load %arg16[%c1, %c0_22, %c0_23] : memref<18x18x128xf32, #tpu.memory_space<vmem>>, vector<16x1x128xf32>
    tpu.vector_store %arg16[%c1, %c0_22, %c0_23], %30 {strides = array<i32>} : memref<18x18x128xf32, #tpu.memory_space<vmem>>, vector<16x1x128xf32>,
    %c1_24 = arith.constant 1 : index
    %c17_25 = arith.constant 17 : index
    %c0_26 = arith.constant 0 : index
    %34 = vector.load %arg16[%c1_24, %c17_25, %c0_26] : memref<18x18x128xf32, #tpu.memory_space<vmem>>, vector<16x1x128xf32>
    tpu.vector_store %arg16[%c1_24, %c17_25, %c0_26], %30 {strides = array<i32>} : memref<18x18x128xf32, #tpu.memory_space<vmem>>, vector<16x1x128xf32>,
    %35 = vector.shape_cast %28 : vector<256x128xf32> to vector<16x16x128xf32>
    %c1_27 = arith.constant 1 : index
    %c1_28 = arith.constant 1 : index
    %c0_29 = arith.constant 0 : index
    %36 = vector.load %arg16[%c1_27, %c1_28, %c0_29] : memref<18x18x128xf32, #tpu.memory_space<vmem>>, vector<16x16x128xf32>
    tpu.vector_store %arg16[%c1_27, %c1_28, %c0_29], %35 {strides = array<i32>} : memref<18x18x128xf32, #tpu.memory_space<vmem>>, vector<16x16x128xf32>,
    %cst_30 = arith.constant 0.000000e+00 : f32
    %37 = vector.broadcast %cst_30 : f32 to vector<256x128xf32>
    %c0_31 = arith.constant 0 : index
    %c0_32 = arith.constant 0 : index
    %c0_33 = arith.constant 0 : index
    %38 = vector.load %arg16[%c0_31, %c0_32, %c0_33] : memref<18x18x128xf32, #tpu.memory_space<vmem>>, vector<16x16x128xf32>
    %39 = vector.shape_cast %38 : vector<16x16x128xf32> to vector<256x128xf32>
    %40 = arith.truncf %39 : vector<256x128xf32> to vector<256x128xbf16>
    %c0_34 = arith.constant 0 : index
    %c0_35 = arith.constant 0 : index
    %c0_36 = arith.constant 0 : index
    %41 = vector.load %arg3[%c0_34, %c0_35, %c0_36] : memref<9x128x128xbf16, #tpu.memory_space<vmem>>, vector<1x128x128xbf16>
    %42 = vector.shape_cast %41 : vector<1x128x128xbf16> to vector<128x128xbf16>
    %cst_37 = arith.constant dense<0.000000e+00> : vector<256x128xf32>
    %43 = tpu.matmul %40, %42, %cst_37 {dimension_numbers = #tpu.dot_dimension_numbers<[1], [0], [0], [1], [0, 0, 1, 1], [], []>} : vector<256x128xbf16>, vector<128x128xbf16>, vector<256x128xf32> -> vector<256x128xf32>
    %44 = arith.addf %37, %43 : vector<256x128xf32>
    %c0_38 = arith.constant 0 : index
    %c1_39 = arith.constant 1 : index
    %c0_40 = arith.constant 0 : index
    %45 = vector.load %arg16[%c0_38, %c1_39, %c0_40] : memref<18x18x128xf32, #tpu.memory_space<vmem>>, vector<16x16x128xf32>
    %46 = vector.shape_cast %45 : vector<16x16x128xf32> to vector<256x128xf32>
    %47 = arith.truncf %46 : vector<256x128xf32> to vector<256x128xbf16>
    %c1_41 = arith.constant 1 : index
    %c0_42 = arith.constant 0 : index
    %c0_43 = arith.constant 0 : index
    %48 = vector.load %arg3[%c1_41, %c0_42, %c0_43] : memref<9x128x128xbf16, #tpu.memory_space<vmem>>, vector<1x128x128xbf16>
    %49 = vector.shape_cast %48 : vector<1x128x128xbf16> to vector<128x128xbf16>
    %cst_44 = arith.constant dense<0.000000e+00> : vector<256x128xf32>
    %50 = tpu.matmul %47, %49, %cst_44 {dimension_numbers = #tpu.dot_dimension_numbers<[1], [0], [0], [1], [0, 0, 1, 1], [], []>} : vector<256x128xbf16>, vector<128x128xbf16>, vector<256x128xf32> -> vector<256x128xf32>
    %51 = arith.addf %44, %50 : vector<256x128xf32>
    %c0_45 = arith.constant 0 : index
    %c2 = arith.constant 2 : index
    %c0_46 = arith.constant 0 : index
    %52 = vector.load %arg16[%c0_45, %c2, %c0_46] : memref<18x18x128xf32, #tpu.memory_space<vmem>>, vector<16x16x128xf32>
    %53 = vector.shape_cast %52 : vector<16x16x128xf32> to vector<256x128xf32>
    %54 = arith.truncf %53 : vector<256x128xf32> to vector<256x128xbf16>
    %c2_47 = arith.constant 2 : index
    %c0_48 = arith.constant 0 : index
    %c0_49 = arith.constant 0 : index
    %55 = vector.load %arg3[%c2_47, %c0_48, %c0_49] : memref<9x128x128xbf16, #tpu.memory_space<vmem>>, vector<1x128x128xbf16>
    %56 = vector.shape_cast %55 : vector<1x128x128xbf16> to vector<128x128xbf16>
    %cst_50 = arith.constant dense<0.000000e+00> : vector<256x128xf32>
    %57 = tpu.matmul %54, %56, %cst_50 {dimension_numbers = #tpu.dot_dimension_numbers<[1], [0], [0], [1], [0, 0, 1, 1], [], []>} : vector<256x128xbf16>, vector<128x128xbf16>, vector<256x128xf32> -> vector<256x128xf32>
    %58 = arith.addf %51, %57 : vector<256x128xf32>
    %c1_51 = arith.constant 1 : index
    %c0_52 = arith.constant 0 : index
    %c0_53 = arith.constant 0 : index
    %59 = vector.load %arg16[%c1_51, %c0_52, %c0_53] : memref<18x18x128xf32, #tpu.memory_space<vmem>>, vector<16x16x128xf32>
    %60 = vector.shape_cast %59 : vector<16x16x128xf32> to vector<256x128xf32>
    %61 = arith.truncf %60 : vector<256x128xf32> to vector<256x128xbf16>
    %c3 = arith.constant 3 : index
    %c0_54 = arith.constant 0 : index
    %c0_55 = arith.constant 0 : index
    %62 = vector.load %arg3[%c3, %c0_54, %c0_55] : memref<9x128x128xbf16, #tpu.memory_space<vmem>>, vector<1x128x128xbf16>
    %63 = vector.shape_cast %62 : vector<1x128x128xbf16> to vector<128x128xbf16>
    %cst_56 = arith.constant dense<0.000000e+00> : vector<256x128xf32>
    %64 = tpu.matmul %61, %63, %cst_56 {dimension_numbers = #tpu.dot_dimension_numbers<[1], [0], [0], [1], [0, 0, 1, 1], [], []>} : vector<256x128xbf16>, vector<128x128xbf16>, vector<256x128xf32> -> vector<256x128xf32>
    %65 = arith.addf %58, %64 : vector<256x128xf32>
    %c1_57 = arith.constant 1 : index
    %c1_58 = arith.constant 1 : index
    %c0_59 = arith.constant 0 : index
    %66 = vector.load %arg16[%c1_57, %c1_58, %c0_59] : memref<18x18x128xf32, #tpu.memory_space<vmem>>, vector<16x16x128xf32>
    %67 = vector.shape_cast %66 : vector<16x16x128xf32> to vector<256x128xf32>
    %68 = arith.truncf %67 : vector<256x128xf32> to vector<256x128xbf16>
    %c4 = arith.constant 4 : index
    %c0_60 = arith.constant 0 : index
    %c0_61 = arith.constant 0 : index
    %69 = vector.load %arg3[%c4, %c0_60, %c0_61] : memref<9x128x128xbf16, #tpu.memory_space<vmem>>, vector<1x128x128xbf16>
    %70 = vector.shape_cast %69 : vector<1x128x128xbf16> to vector<128x128xbf16>
    %cst_62 = arith.constant dense<0.000000e+00> : vector<256x128xf32>
    %71 = tpu.matmul %68, %70, %cst_62 {dimension_numbers = #tpu.dot_dimension_numbers<[1], [0], [0], [1], [0, 0, 1, 1], [], []>} : vector<256x128xbf16>, vector<128x128xbf16>, vector<256x128xf32> -> vector<256x128xf32>
    %72 = arith.addf %65, %71 : vector<256x128xf32>
    %c1_63 = arith.constant 1 : index
    %c2_64 = arith.constant 2 : index
    %c0_65 = arith.constant 0 : index
    %73 = vector.load %arg16[%c1_63, %c2_64, %c0_65] : memref<18x18x128xf32, #tpu.memory_space<vmem>>, vector<16x16x128xf32>
    %74 = vector.shape_cast %73 : vector<16x16x128xf32> to vector<256x128xf32>
    %75 = arith.truncf %74 : vector<256x128xf32> to vector<256x128xbf16>
    %c5 = arith.constant 5 : index
    %c0_66 = arith.constant 0 : index
    %c0_67 = arith.constant 0 : index
    %76 = vector.load %arg3[%c5, %c0_66, %c0_67] : memref<9x128x128xbf16, #tpu.memory_space<vmem>>, vector<1x128x128xbf16>
    %77 = vector.shape_cast %76 : vector<1x128x128xbf16> to vector<128x128xbf16>
    %cst_68 = arith.constant dense<0.000000e+00> : vector<256x128xf32>
    %78 = tpu.matmul %75, %77, %cst_68 {dimension_numbers = #tpu.dot_dimension_numbers<[1], [0], [0], [1], [0, 0, 1, 1], [], []>} : vector<256x128xbf16>, vector<128x128xbf16>, vector<256x128xf32> -> vector<256x128xf32>
    %79 = arith.addf %72, %78 : vector<256x128xf32>
    %c2_69 = arith.constant 2 : index
    %c0_70 = arith.constant 0 : index
    %c0_71 = arith.constant 0 : index
    %80 = vector.load %arg16[%c2_69, %c0_70, %c0_71] : memref<18x18x128xf32, #tpu.memory_space<vmem>>, vector<16x16x128xf32>
    %81 = vector.shape_cast %80 : vector<16x16x128xf32> to vector<256x128xf32>
    %82 = arith.truncf %81 : vector<256x128xf32> to vector<256x128xbf16>
    %c6 = arith.constant 6 : index
    %c0_72 = arith.constant 0 : index
    %c0_73 = arith.constant 0 : index
    %83 = vector.load %arg3[%c6, %c0_72, %c0_73] : memref<9x128x128xbf16, #tpu.memory_space<vmem>>, vector<1x128x128xbf16>
    %84 = vector.shape_cast %83 : vector<1x128x128xbf16> to vector<128x128xbf16>
    %cst_74 = arith.constant dense<0.000000e+00> : vector<256x128xf32>
    %85 = tpu.matmul %82, %84, %cst_74 {dimension_numbers = #tpu.dot_dimension_numbers<[1], [0], [0], [1], [0, 0, 1, 1], [], []>} : vector<256x128xbf16>, vector<128x128xbf16>, vector<256x128xf32> -> vector<256x128xf32>
    %86 = arith.addf %79, %85 : vector<256x128xf32>
    %c2_75 = arith.constant 2 : index
    %c1_76 = arith.constant 1 : index
    %c0_77 = arith.constant 0 : index
    %87 = vector.load %arg16[%c2_75, %c1_76, %c0_77] : memref<18x18x128xf32, #tpu.memory_space<vmem>>, vector<16x16x128xf32>
    %88 = vector.shape_cast %87 : vector<16x16x128xf32> to vector<256x128xf32>
    %89 = arith.truncf %88 : vector<256x128xf32> to vector<256x128xbf16>
    %c7 = arith.constant 7 : index
    %c0_78 = arith.constant 0 : index
    %c0_79 = arith.constant 0 : index
    %90 = vector.load %arg3[%c7, %c0_78, %c0_79] : memref<9x128x128xbf16, #tpu.memory_space<vmem>>, vector<1x128x128xbf16>
    %91 = vector.shape_cast %90 : vector<1x128x128xbf16> to vector<128x128xbf16>
    %cst_80 = arith.constant dense<0.000000e+00> : vector<256x128xf32>
    %92 = tpu.matmul %89, %91, %cst_80 {dimension_numbers = #tpu.dot_dimension_numbers<[1], [0], [0], [1], [0, 0, 1, 1], [], []>} : vector<256x128xbf16>, vector<128x128xbf16>, vector<256x128xf32> -> vector<256x128xf32>
    %93 = arith.addf %86, %92 : vector<256x128xf32>
    %c2_81 = arith.constant 2 : index
    %c2_82 = arith.constant 2 : index
    %c0_83 = arith.constant 0 : index
    %94 = vector.load %arg16[%c2_81, %c2_82, %c0_83] : memref<18x18x128xf32, #tpu.memory_space<vmem>>, vector<16x16x128xf32>
    %95 = vector.shape_cast %94 : vector<16x16x128xf32> to vector<256x128xf32>
    %96 = arith.truncf %95 : vector<256x128xf32> to vector<256x128xbf16>
    %c8 = arith.constant 8 : index
    %c0_84 = arith.constant 0 : index
    %c0_85 = arith.constant 0 : index
    %97 = vector.load %arg3[%c8, %c0_84, %c0_85] : memref<9x128x128xbf16, #tpu.memory_space<vmem>>, vector<1x128x128xbf16>
    %98 = vector.shape_cast %97 : vector<1x128x128xbf16> to vector<128x128xbf16>
    %cst_86 = arith.constant dense<0.000000e+00> : vector<256x128xf32>
    %99 = tpu.matmul %96, %98, %cst_86 {dimension_numbers = #tpu.dot_dimension_numbers<[1], [0], [0], [1], [0, 0, 1, 1], [], []>} : vector<256x128xbf16>, vector<128x128xbf16>, vector<256x128xf32> -> vector<256x128xf32>
    %100 = arith.addf %93, %99 : vector<256x128xf32>
    %c0_87 = arith.constant 0 : index
    %c0_88 = arith.constant 0 : index
    %101 = vector.load %arg8[%c0_87, %c0_88] : memref<1x128xf32, #tpu.memory_space<vmem>>, vector<1x128xf32>
    %c0_89 = arith.constant 0 : index
    %c0_90 = arith.constant 0 : index
    %102 = vector.load %arg9[%c0_89, %c0_90] : memref<1x128xf32, #tpu.memory_space<vmem>>, vector<1x128xf32>
    %cst_91 = arith.constant dense<0.000000e+00> : vector<128xf32>
    %103 = vector.multi_reduction <add>, %100, %cst_91 [0] : vector<256x128xf32> to vector<128xf32>
    %104 = vector.shape_cast %103 : vector<128xf32> to vector<1x128xf32>
    %105 = arith.mulf %100, %100 : vector<256x128xf32>
    %cst_92 = arith.constant dense<0.000000e+00> : vector<128xf32>
    %106 = vector.multi_reduction <add>, %105, %cst_92 [0] : vector<256x128xf32> to vector<128xf32>
    %107 = vector.shape_cast %106 : vector<128xf32> to vector<1x128xf32>
    %cst_93 = arith.constant 3.906250e-03 : f32
    %108 = vector.broadcast %cst_93 : f32 to vector<1x128xf32>
    %109 = arith.mulf %104, %108 : vector<1x128xf32>
    %cst_94 = arith.constant 3.906250e-03 : f32
    %110 = vector.broadcast %cst_94 : f32 to vector<1x128xf32>
    %111 = arith.mulf %107, %110 : vector<1x128xf32>
    %112 = arith.mulf %109, %109 : vector<1x128xf32>
    %113 = arith.subf %111, %112 : vector<1x128xf32>
    %cst_95 = arith.constant 9.99999997E-7 : f32
    %114 = vector.broadcast %cst_95 : f32 to vector<1x128xf32>
    %115 = arith.addf %113, %114 : vector<1x128xf32>
    %116 = math.rsqrt %115 : vector<1x128xf32>
    %117 = arith.mulf %116, %101 : vector<1x128xf32>
    %118 = arith.mulf %109, %117 : vector<1x128xf32>
    %119 = arith.subf %102, %118 : vector<1x128xf32>
    %120 = vector.broadcast %117 : vector<1x128xf32> to vector<256x128xf32>
    %121 = arith.mulf %100, %120 : vector<256x128xf32>
    %122 = vector.broadcast %119 : vector<1x128xf32> to vector<256x128xf32>
    %123 = arith.addf %121, %122 : vector<256x128xf32>
    %cst_96 = arith.constant 0.000000e+00 : f32
    %124 = vector.broadcast %cst_96 : f32 to vector<256x128xf32>
    %125 = arith.maximumf %123, %124 : vector<256x128xf32>
    %126 = arith.truncf %125 : vector<256x128xf32> to vector<256x128xbf16>
    %c0_97 = arith.constant 0 : index
    %c0_98 = arith.constant 0 : index
    %127 = vector.load %arg4[%c0_97, %c0_98] : memref<128x128xbf16, #tpu.memory_space<vmem>>, vector<128x128xbf16>
    %cst_99 = arith.constant dense<0.000000e+00> : vector<256x128xf32>
    %128 = tpu.matmul %126, %127, %cst_99 {dimension_numbers = #tpu.dot_dimension_numbers<[1], [0], [0], [1], [0, 0, 1, 1], [], []>} : vector<256x128xbf16>, vector<128x128xbf16>, vector<256x128xf32> -> vector<256x128xf32>
    %c0_100 = arith.constant 0 : index
    %c0_101 = arith.constant 0 : index
    %129 = vector.load %arg10[%c0_100, %c0_101] : memref<1x128xf32, #tpu.memory_space<vmem>>, vector<1x128xf32>
    %c0_102 = arith.constant 0 : index
    %c0_103 = arith.constant 0 : index
    %130 = vector.load %arg11[%c0_102, %c0_103] : memref<1x128xf32, #tpu.memory_space<vmem>>, vector<1x128xf32>
    %cst_104 = arith.constant dense<0.000000e+00> : vector<128xf32>
    %131 = vector.multi_reduction <add>, %128, %cst_104 [0] : vector<256x128xf32> to vector<128xf32>
    %132 = vector.shape_cast %131 : vector<128xf32> to vector<1x128xf32>
    %133 = arith.mulf %128, %128 : vector<256x128xf32>
    %cst_105 = arith.constant dense<0.000000e+00> : vector<128xf32>
    %134 = vector.multi_reduction <add>, %133, %cst_105 [0] : vector<256x128xf32> to vector<128xf32>
    %135 = vector.shape_cast %134 : vector<128xf32> to vector<1x128xf32>
    %cst_106 = arith.constant dense<0.000000e+00> : vector<1x128xf32>
    %136 = tpu.matmul %132, %0, %cst_106 {dimension_numbers = #tpu.dot_dimension_numbers<[1], [0], [0], [1], [0, 0, 1, 1], [], []>} : vector<1x128xf32>, vector<128x128xf32>, vector<1x128xf32> -> vector<1x128xf32>
    %cst_107 = arith.constant dense<0.000000e+00> : vector<1x128xf32>
    %137 = tpu.matmul %135, %0, %cst_107 {dimension_numbers = #tpu.dot_dimension_numbers<[1], [0], [0], [1], [0, 0, 1, 1], [], []>} : vector<1x128xf32>, vector<128x128xf32>, vector<1x128xf32> -> vector<1x128xf32>
    %cst_108 = arith.constant 9.765625E-4 : f32
    %138 = vector.broadcast %cst_108 : f32 to vector<1x128xf32>
    %139 = arith.mulf %136, %138 : vector<1x128xf32>
    %cst_109 = arith.constant 9.765625E-4 : f32
    %140 = vector.broadcast %cst_109 : f32 to vector<1x128xf32>
    %141 = arith.mulf %137, %140 : vector<1x128xf32>
    %142 = arith.mulf %139, %139 : vector<1x128xf32>
    %143 = arith.subf %141, %142 : vector<1x128xf32>
    %cst_110 = arith.constant 9.99999997E-7 : f32
    %144 = vector.broadcast %cst_110 : f32 to vector<1x128xf32>
    %145 = arith.addf %143, %144 : vector<1x128xf32>
    %146 = math.rsqrt %145 : vector<1x128xf32>
    %147 = arith.mulf %146, %129 : vector<1x128xf32>
    %148 = arith.mulf %139, %147 : vector<1x128xf32>
    %149 = arith.subf %130, %148 : vector<1x128xf32>
    %150 = vector.broadcast %147 : vector<1x128xf32> to vector<256x128xf32>
    %151 = arith.mulf %128, %150 : vector<256x128xf32>
    %152 = vector.broadcast %149 : vector<1x128xf32> to vector<256x128xf32>
    %153 = arith.addf %151, %152 : vector<256x128xf32>
    %c0_111 = arith.constant 0 : index
    %c0_112 = arith.constant 0 : index
    %154 = vector.load %arg1[%c0_111, %c0_112] : memref<256x64xbf16, #tpu.memory_space<vmem>>, vector<256x64xbf16>
    %c0_113 = arith.constant 0 : index
    %c0_114 = arith.constant 0 : index
    %155 = vector.load %arg5[%c0_113, %c0_114] : memref<64x128xbf16, #tpu.memory_space<vmem>>, vector<64x128xbf16>
    %cst_115 = arith.constant dense<0.000000e+00> : vector<256x128xf32>
    %156 = tpu.matmul %154, %155, %cst_115 {dimension_numbers = #tpu.dot_dimension_numbers<[1], [0], [0], [1], [0, 0, 1, 1], [], []>} : vector<256x64xbf16>, vector<64x128xbf16>, vector<256x128xf32> -> vector<256x128xf32>
    %c0_116 = arith.constant 0 : index
    %c0_117 = arith.constant 0 : index
    %157 = vector.load %arg12[%c0_116, %c0_117] : memref<1x128xf32, #tpu.memory_space<vmem>>, vector<1x128xf32>
    %c0_118 = arith.constant 0 : index
    %c0_119 = arith.constant 0 : index
    %158 = vector.load %arg13[%c0_118, %c0_119] : memref<1x128xf32, #tpu.memory_space<vmem>>, vector<1x128xf32>
    %cst_120 = arith.constant dense<0.000000e+00> : vector<128xf32>
    %159 = vector.multi_reduction <add>, %156, %cst_120 [0] : vector<256x128xf32> to vector<128xf32>
    %160 = vector.shape_cast %159 : vector<128xf32> to vector<1x128xf32>
    %161 = arith.mulf %156, %156 : vector<256x128xf32>
    %cst_121 = arith.constant dense<0.000000e+00> : vector<128xf32>
    %162 = vector.multi_reduction <add>, %161, %cst_121 [0] : vector<256x128xf32> to vector<128xf32>
    %163 = vector.shape_cast %162 : vector<128xf32> to vector<1x128xf32>
    %cst_122 = arith.constant 3.906250e-03 : f32
    %164 = vector.broadcast %cst_122 : f32 to vector<1x128xf32>
    %165 = arith.mulf %160, %164 : vector<1x128xf32>
    %cst_123 = arith.constant 3.906250e-03 : f32
    %166 = vector.broadcast %cst_123 : f32 to vector<1x128xf32>
    %167 = arith.mulf %163, %166 : vector<1x128xf32>
    %168 = arith.mulf %165, %165 : vector<1x128xf32>
    %169 = arith.subf %167, %168 : vector<1x128xf32>
    %cst_124 = arith.constant 9.99999974E-6 : f32
    %170 = vector.broadcast %cst_124 : f32 to vector<1x128xf32>
    %171 = arith.addf %169, %170 : vector<1x128xf32>
    %172 = math.rsqrt %171 : vector<1x128xf32>
    %173 = arith.mulf %172, %157 : vector<1x128xf32>
    %174 = arith.mulf %165, %173 : vector<1x128xf32>
    %175 = arith.subf %158, %174 : vector<1x128xf32>
    %176 = vector.broadcast %173 : vector<1x128xf32> to vector<256x128xf32>
    %177 = arith.mulf %156, %176 : vector<256x128xf32>
    %178 = vector.broadcast %175 : vector<1x128xf32> to vector<256x128xf32>
    %179 = arith.addf %177, %178 : vector<256x128xf32>
    %180 = arith.addf %153, %179 : vector<256x128xf32>
    %cst_125 = arith.constant 0.000000e+00 : f32
    %181 = vector.broadcast %cst_125 : f32 to vector<256x128xf32>
    %182 = arith.maximumf %180, %181 : vector<256x128xf32>
    %183 = arith.truncf %182 : vector<256x128xf32> to vector<256x128xbf16>
    %c0_126 = arith.constant 0 : index
    %c0_127 = arith.constant 0 : index
    %184 = vector.load %arg15[%c0_126, %c0_127] : memref<256x128xbf16, #tpu.memory_space<vmem>>, vector<256x128xbf16>
    tpu.vector_store %arg15[%c0_126, %c0_127], %183 {strides = array<i32>} : memref<256x128xbf16, #tpu.memory_space<vmem>>, vector<256x128xbf16>,
    return
  }
  func.func @transform_0(%arg0: i32) -> (i32, i32) {
    %c0_i32 = arith.constant 0 : i32
    %c0_i32_0 = arith.constant 0 : i32
    return %arg0, %c0_i32 : i32, i32
  }
  func.func @transform_1(%arg0: i32) -> (i32, i32) {
    %c0_i32 = arith.constant 0 : i32
    %c0_i32_0 = arith.constant 0 : i32
    %c0_i32_1 = arith.constant 0 : i32
    return %c0_i32, %c0_i32_0 : i32, i32
  }
  func.func @transform_2(%arg0: i32) -> (i32, i32, i32) {
    %c0_i32 = arith.constant 0 : i32
    %c0_i32_0 = arith.constant 0 : i32
    %c0_i32_1 = arith.constant 0 : i32
    %c0_i32_2 = arith.constant 0 : i32
    return %c0_i32, %c0_i32_0, %c0_i32_1 : i32, i32, i32
  }
  func.func @transform_3(%arg0: i32) -> (i32, i32) {
    %c0_i32 = arith.constant 0 : i32
    %c0_i32_0 = arith.constant 0 : i32
    %c0_i32_1 = arith.constant 0 : i32
    return %c0_i32, %c0_i32_0 : i32, i32
  }
  func.func @transform_4(%arg0: i32) -> (i32, i32) {
    %c0_i32 = arith.constant 0 : i32
    %c0_i32_0 = arith.constant 0 : i32
    %c0_i32_1 = arith.constant 0 : i32
    return %c0_i32, %c0_i32_0 : i32, i32
  }
  func.func @transform_5(%arg0: i32) -> (i32, i32) {
    %c0_i32 = arith.constant 0 : i32
    %c0_i32_0 = arith.constant 0 : i32
    %c0_i32_1 = arith.constant 0 : i32
    return %c0_i32, %c0_i32_0 : i32, i32
  }
  func.func @transform_6(%arg0: i32) -> (i32, i32) {
    %c0_i32 = arith.constant 0 : i32
    %c0_i32_0 = arith.constant 0 : i32
    %c0_i32_1 = arith.constant 0 : i32
    return %c0_i32, %c0_i32_0 : i32, i32
  }
  func.func @transform_7(%arg0: i32) -> (i32, i32) {
    %c0_i32 = arith.constant 0 : i32
    %c0_i32_0 = arith.constant 0 : i32
    %c0_i32_1 = arith.constant 0 : i32
    return %c0_i32, %c0_i32_0 : i32, i32
  }
  func.func @transform_8(%arg0: i32) -> (i32, i32) {
    %c0_i32 = arith.constant 0 : i32
    %c0_i32_0 = arith.constant 0 : i32
    %c0_i32_1 = arith.constant 0 : i32
    return %c0_i32, %c0_i32_0 : i32, i32
  }
  func.func @transform_9(%arg0: i32) -> (i32, i32) {
    %c0_i32 = arith.constant 0 : i32
    %c0_i32_0 = arith.constant 0 : i32
    %c0_i32_1 = arith.constant 0 : i32
    return %c0_i32, %c0_i32_0 : i32, i32
  }
  func.func @transform_10(%arg0: i32) -> (i32, i32) {
    %c0_i32 = arith.constant 0 : i32
    %c0_i32_0 = arith.constant 0 : i32
    %c0_i32_1 = arith.constant 0 : i32
    return %c0_i32, %c0_i32_0 : i32, i32
  }
  func.func @transform_11(%arg0: i32) -> (i32, i32) {
    %c0_i32 = arith.constant 0 : i32
    %c0_i32_0 = arith.constant 0 : i32
    %c0_i32_1 = arith.constant 0 : i32
    return %c0_i32, %c0_i32_0 : i32, i32
  }
  func.func @transform_12(%arg0: i32) -> (i32, i32) {
    %c0_i32 = arith.constant 0 : i32
    %c0_i32_0 = arith.constant 0 : i32
    %c0_i32_1 = arith.constant 0 : i32
    return %c0_i32, %c0_i32_0 : i32, i32
  }
  func.func @transform_13(%arg0: i32) -> (i32, i32) {
    %c0_i32 = arith.constant 0 : i32
    %c0_i32_0 = arith.constant 0 : i32
    %c0_i32_1 = arith.constant 0 : i32
    return %c0_i32, %c0_i32_0 : i32, i32
  }
  func.func @transform_14(%arg0: i32) -> (i32, i32) {
    %c0_i32 = arith.constant 0 : i32
    %c0_i32_0 = arith.constant 0 : i32
    return %arg0, %c0_i32 : i32, i32
  }
}

</mosaic_0001>

<bundles_post_ra>
// kernel: fwd.1
= control target key start
LH: loop header
LB: loop body
LE: loop exit
PB: predicated region body
PF: predicated region fallthrough
CT: control target
= control target key end

     0   :  { %s9989_s0 = inlined_call_operand.hbm [shape: bf16[512,64], index: 0, kind: input, shape index: {}]   ;;  %s9990_s1 = inlined_call_operand.hbm [shape: bf16[64,128], index: 1, kind: input, shape index: {}]   ;;  %s9991_s2 = inlined_call_operand.hbm [shape: bf16[9,128,128], index: 2, kind: input, shape index: {}]   ;;  %s9992_s3 = inlined_call_operand.hbm [shape: bf16[128,128], index: 3, kind: input, shape index: {}]   ;;  %s9993_s4 = inlined_call_operand.hbm [shape: bf16[64,128], index: 4, kind: input, shape index: {}]   ;;  %s9994_s5 = inlined_call_operand.vmem [shape: f32[1,128], index: 5, kind: input, shape index: {}]   ;;  %s9995_s6 = inlined_call_operand.hbm [shape: f32[1,128], index: 6, kind: input, shape index: {}]   ;;  %s9996_s7 = inlined_call_operand.vmem [shape: f32[1,128], index: 7, kind: input, shape index: {}]   ;;  %s9997_s8 = inlined_call_operand.vmem [shape: f32[1,128], index: 8, kind: input, shape index: {}]   ;;  %s9998_s9 = inlined_call_operand.vmem [shape: f32[1,128], index: 9, kind: input, shape index: {}]   ;;  %s9999_s10 = inlined_call_operand.vmem [shape: f32[1,128], index: 10, kind: input, shape index: {}]   ;;  %s10000_s11 = inlined_call_operand.vmem [shape: f32[1,128], index: 11, kind: input, shape index: {}]   ;;  %s10001_s12 = inlined_call_operand.vmem [shape: f32[1,128], index: 12, kind: input, shape index: {}]   ;;  %s10002_s13 = inlined_call_operand.hbm [shape: f32[128,128], index: 13, kind: input, shape index: {}]   ;;  %s10003_s14 = inlined_call_operand.hbm [shape: bf16[512,128], index: 14, kind: output, shape index: {}]  }
   0x1   :  { %10045 = sst [smem:[#allocation54_spill]] %s9990_s1 }
   0x2   :  { %10046 = sst [smem:[#allocation55_spill]] %s9991_s2 }
   0x3   :  { %10047 = sst [smem:[#allocation56_spill]] %s9992_s3 }
   0x4   :  { %10048 = sst [smem:[#allocation57_spill]] %s9993_s4 }
   0x5   :  { %10049 = sst [smem:[#allocation58_spill]] %s9995_s6 }
   0x6   :  { %10050 = sst [smem:[#allocation59_spill]] %s10002_s13 }
   0x7   :  { %10051 = sst [smem:[#allocation60_spill]] %s10003_s14 }
   0x8   :  { %19 = vsyncpa [#allocation4], 0 }
   0x9   :  { %21 = vsyncpa [#allocation4 + $0x1], 0 }
   0xa   :  { %22 = vsyncpa [#allocation7], 0 }
   0xb   :  { %23 = vsyncpa [#allocation10], 0 }
   0xc   :  { %24 = vsyncpa [#allocation13], 0 }
   0xd   :  { %25 = vsyncpa [#allocation5], 0 }
   0xe   :  { %27 = vsyncpa [#allocation5 + $0x1], 0  ;;  %s7534_s29 = smov 0   ;;  %s7536_s30 = smov 0  }
   0xf   :  { %s7538_s15 = smov 0   ;;  %s7540_s16 = smov 0  }
  0x10 LB: > { %10052 = sst [smem:[#allocation21_spill]] %s7436_s15  ;;  %s7442_s17 = smov [#allocation6]   ;;  %s7440_s16 = sphi %s7540_s16, %s10215_s16   ;;  %s7436_s15 = sphi %s7538_s15, %s10217_s15   ;;  %s7432_s30 = sphi %s7536_s30, %s10219_s30   ;;  %s7428_s29 = sphi %s7534_s29, %s10218_s29  }
  0x11   : > { %s375_s18 = sshll.u32 %s7442_s17, 4  ;;  %s7555_s19 = sadd.s32 4294967295, %s7440_s16   ;;  %s376_s18 = int_to_ptr.vmem [resolvable:$true] %s375_s18 }
  0x12   : > { %p5637_p0 = scmp.ge.s32.totalorder %s7440_s16, 1  ;;  %p10010_p1 = scmp.eq.s32.totalorder %s7555_s19, 0 }
  0x13   : > { %p363_p2 = scmp.lt.s32.totalorder %s7440_s16, 3  ;;  %s7443_s21 = smov [#allocation9]  }
  0x14   : > { %s401_s22 = sshll.u32 %s7443_s21, 4  ;;  %s7444_s24 = smov [#allocation12]   ;;  %s7573_s22 = int_to_ptr.vmem [resolvable:$true] %s401_s22 }
  0x15   : > { %p7560_p3 = pnand %p5637_p0, %p363_p2  ;;  %s431_s25 = sshll.u32 %s7444_s24, 4  ;;  %s7575_s25 = int_to_ptr.vmem [resolvable:$true] %s431_s25 }
  0x16   : > { %s7191_s27 = scalar_lea.vmem %s376_s18, 512  ;;  %p7199_p11 = scmp.lt.s32.totalorder %s376_s18, %s376_s18 }
  0x17   : > { %s10053_s20 = scalar_select %p7560_p3, 1, 0 }
  0x18   : > { %p6963_p5 = pneg %p7560_p3  ;;  %p7192_p8 = scmp.ne.s32.totalorder %s376_s18, %s7191_s27 }
  0x19   : > { %p7200_p12 = scmp.lt.s32.totalorder %s7191_s27, %s7191_s27 }
  0x1a   : > { %p7569_p6 = pnand %p6963_p5, %p10010_p1 }
  0x1b   : > { %p7201_p13 = por %p7200_p12, %p7199_p11 }
  0x1c   : > { %p7579_p7 = pneg %p7569_p6 }
  0x1e   : > { %p7194_p9 = pnand %p7192_p8, %p7579_p7 }
  0x20   : > { %p7195_p10 = pneg %p7194_p9 }
  0x22   : > { %p7202_p0 = pnand %p7201_p13, %p7195_p10 }
  0x24   : > { %7205 = shalt.err (!%p7202_p0)
}
  0x25   : > { %s10005_s28 = smov 64   ;;  %s10007_s17 = smov 4  }
  0x26   : > { %s10056_s1 = sld [smem:[#allocation54_spill]]  ;;  %s7217_s14 = scalar_lea.vmem %s7573_s22, 1024 }
  0x27   : > { %p7218_p2 = scmp.ne.s32.totalorder %s7573_s22, %s7217_s14  ;;  %p7225_p9 = scmp.lt.s32.totalorder %s7573_s22, %s7573_s22 }
  0x28   : > { %p7226_p10 = scmp.lt.s32.totalorder %s7217_s14, %s7217_s14 }
  0x29   : > { %p7220_p5 = pnand %p7218_p2, %p7579_p7 }
  0x2a   : > { %p7227_p11 = por %p7226_p10, %p7225_p9 }
  0x2b   : > { %p7221_p8 = pneg %p7220_p5 }
  0x2c   : > { %6966 = dma.hbm_to_vmem [thread:$0]  (!%p7569_p6), %s10056_s1, 512, %s376_s18, [#allocation7], %s10005_s28, %s10005_s28, %s10007_s17  }
  0x2d   : > { %p7228_p12 = pnand %p7227_p11, %p7221_p8 }
  0x2f   : > { %7231 = shalt.err (!%p7228_p12)
}
  0x30   : > { %s10057_s3 = sld [smem:[#allocation56_spill]]  ;;  %s7243_s18 = scalar_lea.vmem %s7575_s25, 16 }
  0x31   : > { %p7244_p13 = scmp.ne.s32.totalorder %s7575_s25, %s7243_s18  ;;  %s7250_s14 = scalar_lea.vmem %s7575_s25, 32 }
  0x32   : > { %p7251_p5 = scmp.lt.s32.totalorder %s7575_s25, %s7575_s25  ;;  %p7252_p8 = scmp.lt.s32.totalorder %s7250_s14, %s7243_s18 }
  0x33   : > { %p7246_p0 = pnand %p7244_p13, %p7579_p7 }
  0x34   : > { %p7253_p9 = por %p7252_p8, %p7251_p5 }
  0x35   : > { %p7247_p2 = pneg %p7246_p0 }
  0x36   : > { %6972 = dma.hbm_to_vmem [thread:$0]  (!%p7569_p6), %s10057_s3, 1024, %s7573_s22, [#allocation10], %s10005_s28, %s10005_s28, %s10007_s17  }
  0x37   : > { %p7254_p10 = pnand %p7253_p9, %p7247_p2 }
  0x39   : > { %7257 = shalt.err (!%p7254_p10)
}
  0x3a   : > { %s10058_s6 = sld [smem:[#allocation58_spill]]  ;;  %s7447_s22 = smov [#allocation8]  }
  0x3b   : > { %s388_s21 = sshll.u32 %s7447_s22, 4  ;;  %s7448_s28 = smov [#allocation11]   ;;  %s389_s21 = int_to_ptr.vmem [resolvable:$true] %s388_s21 }
  0x3c   : > { %s414_s17 = sshll.u32 %s7448_s28, 4  ;;  %s7269_s1 = scalar_lea.vmem %s389_s21, 9216  ;;  %s415_s17 = int_to_ptr.vmem [resolvable:$true] %s414_s17 }
  0x3d   : > { %p7270_p11 = scmp.ne.s32.totalorder %s389_s21, %s7269_s1  ;;  %p7277_p0 = scmp.lt.s32.totalorder %s389_s21, %s389_s21 }
  0x3e   : > { %p7278_p2 = scmp.lt.s32.totalorder %s7269_s1, %s7269_s1 }
  0x3f   : > { %p7272_p12 = pnand %p7270_p11, %p7579_p7 }
  0x40   : > { %6978 = dma.hbm_to_vmem [thread:$0]  (!%p7569_p6), %s10058_s6, 16, %s7575_s25, [#allocation13]  }
  0x41   : > { %p7273_p13 = pneg %p7272_p12  ;;  %p7279_p5 = por %p7278_p2, %p7277_p0 }
  0x43   : > { %p7280_p8 = pnand %p7279_p5, %p7273_p13 }
  0x45   : > { %7283 = shalt.err (!%p7280_p8)
}
  0x46   : > { %s10059_s18 = smov 4   ;;  %s10060_s14 = smov 64  }
  0x47   : > { %s10061_s2 = sld [smem:[#allocation55_spill]]  ;;  %s7295_s28 = scalar_lea.vmem %s415_s17, 512 }
  0x48   : > { %p7296_p9 = scmp.ne.s32.totalorder %s415_s17, %s7295_s28  ;;  %p7303_p12 = scmp.lt.s32.totalorder %s415_s17, %s415_s17 }
  0x49   : > { %p7304_p0 = scmp.lt.s32.totalorder %s7295_s28, %s7295_s28 }
  0x4a   : > { %p7298_p10 = pnand %p7296_p9, %p7579_p7 }
  0x4b   : > { %p7305_p13 = por %p7304_p0, %p7303_p12 }
  0x4c   : > { %p7299_p11 = pneg %p7298_p10 }
  0x4d   : > { %6969 = dma.hbm_to_vmem [thread:$0]  (!%p7569_p6), %s10061_s2, 9216, %s389_s21, [#allocation7], %s10060_s14, %s10060_s14, %s10059_s18  }
  0x4e   : > { %p7306_p2 = pnand %p7305_p13, %p7299_p11 }
  0x50   : > { %7309 = shalt.err (!%p7306_p2)
}
  0x51   : > { %s10062_s4 = sld [smem:[#allocation57_spill]]  ;;  %s7449_s22 = smov [#allocation14]  }
  0x52   : > { %s459_s21 = sshll.u32 %s7449_s22, 4  ;;  %s460_s21 = int_to_ptr.vmem [resolvable:$true] %s459_s21 }
  0x53   : > { %s7321_s25 = scalar_lea.vmem %s460_s21, 2048  ;;  %p7329_p10 = scmp.lt.s32.totalorder %s460_s21, %s460_s21 }
  0x54   : > { %p7322_p5 = scmp.ne.s32.totalorder %s460_s21, %s7321_s25  ;;  %p7330_p11 = scmp.lt.s32.totalorder %s7321_s25, %s7321_s25 }
  0x56   : > { %p7324_p8 = pnand %p7322_p5, %p7579_p7  ;;  %p7331_p12 = por %p7330_p11, %p7329_p10 }
  0x57   : > { %6975 = dma.hbm_to_vmem [thread:$0]  (!%p7569_p6), %s10062_s4, 512, %s415_s17, [#allocation10], %s10060_s14, %s10060_s14, %s10059_s18  }
  0x58   : > { %p7325_p9 = pneg %p7324_p8 }
  0x5a   : > { %p7332_p0 = pnand %p7331_p12, %p7325_p9 }
  0x5c   : > { %7335 = shalt.err (!%p7332_p0)
}
  0x5d   : > { %s7450_s24 = smov 128   ;;  %s7451_s26 = smov 8  }
  0x5e   : > { %s10063_s13 = sld [smem:[#allocation59_spill]]  ;;  %s5636_s1 = sadd.s32 4294967294, %s7440_s16  }
  0x5f   : > { %s7650_s27 = sadd.s32 1, %s7440_s16   ;;  %s40_s25 = sadd.s32 1, %s7436_s15 }
  0x60   : > { %10064 = sst [smem:[#allocation22_spill]] %s7650_s27  ;;  %s37_s22 = ssub.s32 %s7440_s16, %s7650_s27 }
  0x61   : > { %p38_p7 = scmp.eq.s32.totalorder %s37_s22, 0  ;;  %p47_p13 = scmp.ne.s32.totalorder %s7436_s15, %s7432_s30 }
  0x62   : > { %p48_p2 = scmp.eq.s32.totalorder %s7440_s16, 0  ;;  %p53_p5 = scmp.ne.s32.totalorder %s7432_s30, %s7428_s29 }
  0x63   : > { %s7661_s2 = scalar_select %p38_p7, %s7436_s15, %s40_s25  }
  0x64   : > { %6981 = dma.hbm_to_vmem [thread:$0]  (!%p7569_p6), %s10063_s13, 2048, %s460_s21, [#allocation13], %s7450_s24, %s7450_s24, %s7451_s26  }
  0x65   : > { %10065 = sst [smem:[#allocation23_spill]] %s7661_s2  ;;  %p7663_p8 = por %p48_p2, %p47_p13 }
  0x66   : > { %p7669_p6 = por %p10010_p1, %p53_p5  ;;  %p350_p9 = scmp.eq.s32.totalorder %s7555_s19, 1 }
  0x67   : > { %p356_p10 = scmp.eq.s32.totalorder %s5636_s1, 1  ;;  %p6996_p11 = scmp.lt.s32.totalorder %s7440_s16, 2 }
  0x68   : > { %s10067_s21 = scalar_select %p7669_p6, 1, 0 }
  0x69   : > { %s473_s24 = sand.u32 1, %s7436_s15   ;;  %p7676_p12 = por %p350_p9, %p47_p13 }
  0x6a   : > { %p7680_p0 = por %p356_p10, %p53_p5  ;;  %s5645_s28 = sshll.u32 %s473_s24, 7 }
  0x6b   : > { %s10068_s26 = scalar_select %p7676_p12, 1, 0 }
  0x6c   : > { %s10069_s17 = scalar_select %p7680_p0, 1, 0 }
  0x6d   : > { %s5846_s22 = sshll.u32 %s7440_s16, 11  ;;  %s477_s1 = scalar_lea.vmem [#allocation3], %s5645_s28 }
  0x6e   : > { %s7688_s4 = scalar_lea.hbm %s9989_s0, %s5846_s22  ;;  %s484_s6 = sshll.u32 %s477_s1, 4  ;;  %s7690_s6 = int_to_ptr.vmem [resolvable:$true] %s484_s6 }
  0x6f   : > { %p7694_p7 = pnand %p6996_p11, %p7663_p8  ;;  %s7698_s2 = scalar_lea.sflag [#allocation4], %s473_s24 }
  0x70   : > { %s7336_s15 = scalar_lea.hbm %s7688_s4, 2048  ;;  %s7341_s28 = scalar_lea.hbm %s9989_s0, 4096 }
  0x71   : > { %p7337_p13 = scmp.ne.s32.totalorder %s7688_s4, %s7336_s15  ;;  %p7338_p2 = pneg %p7694_p7 }
  0x72   : > { %p7342_p8 = scmp.lt.s32.totalorder %s7688_s4, %s9989_s0  ;;  %p7343_p10 = scmp.lt.s32.totalorder %s7341_s28, %s7336_s15 }
  0x73   : > { %p7339_p5 = pnand %p7338_p2, %p7337_p13 }
  0x74   : > { %p7344_p11 = por %p7343_p10, %p7342_p8 }
  0x75   : > { %p7340_p9 = pneg %p7339_p5 }
  0x77   : > { %p7345_p4 = pnand %p7344_p11, %p7340_p9 }
  0x79   : > { %7348 = shalt.err (!%p7345_p4)
}
  0x7a   : > { %s7349_s23 = scalar_lea.vmem %s7690_s6, 2048  ;;  %s7452_s24 = smov [#allocation3]  }
  0x7b   : > { %p7350_p1 = scmp.ne.s32.totalorder %s7690_s6, %s7349_s23  ;;  %s7354_s27 = sshll.u32 %s7452_s24, 4  ;;  %s7355_s27 = int_to_ptr.vmem [resolvable:$false] %s7354_s27 }
  0x7c   : > { %s7356_s3 = scalar_lea.vmem %s7355_s27, 4096  ;;  %p7357_p5 = scmp.lt.s32.totalorder %s7690_s6, %s7355_s27 }
  0x7d   : > { %p7352_p0 = pnand %p7350_p1, %p7338_p2  ;;  %p7358_p12 = scmp.lt.s32.totalorder %s7356_s3, %s7349_s23 }
  0x7f   : > { %p7353_p13 = pneg %p7352_p0  ;;  %p7359_p6 = por %p7358_p12, %p7357_p5 }
  0x81   : > { %p7360_p3 = pnand %p7359_p6, %p7353_p13 }
  0x83   : > { %7363 = shalt.err (!%p7360_p3)
}
  0x84   : > { %6985 = dma.hbm_to_vmem [thread:$0]  (!%p7694_p7), %s7688_s4, 2048, %s7690_s6, %s7698_s2, %s10060_s14, %s10060_s14, %s10059_s18  }
  0x85   : > { %p10071_p1 = scmp.ne.s32.totalorder %s10053_s20, 0 }
  0x87   : > { %496 = sbr.rel (%p10071_p1) target bundleno = 1696 (0x6a0), region = 76 }
  0x8c   : > { %s7725_s15 = sand.u32 1, %s7432_s30   ;;  %p10072_p3 = scmp.ne.s32.totalorder %s10067_s21, 0 }
  0x8d   : > { %s5649_s27 = sshll.u32 %s7725_s15, 7  ;;  %s499_s22 = scalar_lea.sflag [#allocation4], %s7725_s15 }
  0x8e   : > { %s7731_s13 = scalar_lea.vmem [#allocation3], %s5649_s27 }
  0x8f   : > { %7407 = dma.done.wait (%p10072_p3), %s499_s22, 2048  }
  0x90   : > { %7409 = vsyncadd (%p10072_p3), %s499_s22, 4294965248  ;;  %p10073_p4 = scmp.eq.s32.totalorder %s7555_s19, 0 }
  0x92   : > { %7411 = dma.done.wait (%p10073_p4), [#allocation7], 9728   ;;  %p10074_p6 = pmov %p10073_p4 }
  0x93   : > { %p10075_p12 = pmov %p10073_p4 }
  0x94   : > { %7413 = vsyncadd (%p10074_p6), [#allocation7], 4294957568 }
  0x95   : > { %7415 = dma.done.wait (%p10075_p12), [#allocation10], 1536   ;;  %p10076_p0 = pmov %p10073_p4 }
  0x97   : > { %7417 = vsyncadd (%p10076_p0), [#allocation10], 4294965760  ;;  %p10077_p7 = pmov %p10076_p0 }
  0x98   : > { %p10078_p2 = pmov %p10076_p0 }
  0x99   : > { %7419 = dma.done.wait (%p10077_p7), [#allocation13], 2064  }
  0x9a   : > { %7421 = vsyncadd (%p10078_p2), [#allocation13], 4294965232  ;;  %v7050_v0 = vld [vmem:[#allocation6 + $0x18] sm:$0xff]   ;;  %v7051_v1 = vld [vmem:[#allocation6 + $0x10] sm:$0xff]   ;;  %vm734_vm0 = vcmask 523264   ;;  %v7453_v30 = vmov 0.0  }
  0x9b   : > { %6289 = vmatprep.subr.bf16.mxu0 %v7050_v0  ;;  %6919 = vmatprep.subr.bf16.mxu1 %v7050_v0  ;;  %v7052_v2 = vld [vmem:[#allocation6 + $0x8] sm:$0xff]   ;;  %v7054_v3 = vld [vmem:[%s7731_s13] sm:$0xff]   ;;  %v7056_v7 = vld [vmem:[%s7731_s13 + $0x10] sm:$0xff]   ;;  %1167 = vst [vmem:[#allocation2] sm:$0xff] %v7453_v30  ;;  %v7454_v50 = vmov 0.0|0.0   ;;  %vm7455_vm1 = vmmov 0  }
  0x9c   : > { %6290 = vmatpush3.bf16.msra.mxu0 %v7050_v0  ;;  %6923 = vmatpush3.bf16.msra.mxu1 %v7050_v0  ;;  %v7053_v4 = vld [vmem:[#allocation6] sm:$0xff]   ;;  %v7055_v5 = vld [vmem:[%s7731_s13 + $0x8] sm:$0xff]   ;;  %v7064_v9 = vld [vmem:[%s7731_s13 + $0x50] sm:$0xff]   ;;  %1168 = vst [vmem:[#allocation2 + $0x8] sm:$0xff] %v7453_v30  ;;  %s10211_s6 = sld [smem:[#allocation60_spill]]  ;;  %s5493_s18 = scalar_lea.sflag [#allocation5], %s7725_s15 }
  0x9d   : > { %6291 = vmatprep.subr.bf16.mxu0 %v7051_v1  ;;  %6920 = vmatprep.subr.bf16.mxu1 %v7051_v1  ;;  %v7062_v6 = vld [vmem:[%s7731_s13 + $0x40] sm:$0xff]   ;;  %v7063_v8 = vld [vmem:[%s7731_s13 + $0x48] sm:$0xff]   ;;  %v7057_v10 = vld [vmem:[%s7731_s13 + $0x18] sm:$0xff]   ;;  %1169 = vst [vmem:[#allocation2 + $0x10] sm:$0x3] %v7453_v30  ;;  %p10212_p8 = scmp.ne.s32.totalorder %s10068_s26, 0 }
  0x9e   : > { %6297 = vmatprep.mubr.msk.bf16.mxu0 %vm734_vm0, %v7054_v3  ;;  %6313 = vmatprep.mubr.msk.bf16.mxu1 %vm734_vm0, %v7062_v6  ;;  %v7065_v11 = vld [vmem:[%s7731_s13 + $0x58] sm:$0xff]   ;;  %v7058_v12 = vld [vmem:[%s7731_s13 + $0x20] sm:$0xff]   ;;  %v7059_v14 = vld [vmem:[%s7731_s13 + $0x28] sm:$0xff]   ;;  %1171 = vst [vmem:[#allocation2 + $0x198] sm:$0xff] %v7453_v30  ;;  %s7456_s21 = smov [#allocation15]  }
  0x9f   : > { %v7066_v13 = vld [vmem:[%s7731_s13 + $0x60] sm:$0xff]   ;;  %v7067_v15 = vld [vmem:[%s7731_s13 + $0x68] sm:$0xff]   ;;  %v7060_v16 = vld [vmem:[%s7731_s13 + $0x30] sm:$0xff]   ;;  %1172 = vst [vmem:[#allocation2 + $0x1a0] sm:$0xff] %v7453_v30  ;;  %s7368_s28 = sshll.u32 %s7456_s21, 4  ;;  %s7369_s28 = int_to_ptr.vmem [resolvable:$false] %s7368_s28 }
  0xa0   : > { %6292 = vmatpush3.bf16.msra.mxu0 %v7051_v1  ;;  %6924 = vmatpush3.bf16.msra.mxu1 %v7051_v1  ;;  %v7068_v17 = vld [vmem:[%s7731_s13 + $0x70] sm:$0xff]   ;;  %v7061_v18 = vld [vmem:[%s7731_s13 + $0x38] sm:$0xff]   ;;  %v7074_v23 = vld [vmem:[#allocation8 + $0x68] sm:$0xff]   ;;  %1173 = vst [vmem:[#allocation2 + $0x1a8] sm:$0x3] %v7453_v30  ;;  %s7370_s25 = scalar_lea.vmem %s7369_s28, 4096 }
  0xa1   : > { %6293 = vmatprep.subr.bf16.mxu0 %v7052_v2  ;;  %6921 = vmatprep.subr.bf16.mxu1 %v7052_v2  ;;  %v7069_v19 = vld [vmem:[%s7731_s13 + $0x78] sm:$0xff]   ;;  %v7072_v21 = vld [vmem:[#allocation8 + $0x70] sm:$0xff]   ;;  %v7076_v25 = vld [vmem:[#allocation8 + $0x60] sm:$0xff]   ;;  %1175 = vst [vmem:[#allocation2 + $0x18] sm:$0x1] %v7453_v30 }
  0xa2   : > { %v7070_v20 = vld [vmem:[#allocation8 + $0x78] sm:$0xff]   ;;  %v7073_v24 = vld [vmem:[#allocation8 + $0x30] sm:$0xff]   ;;  %v7075_v26 = vld [vmem:[#allocation8 + $0x28] sm:$0xff]   ;;  %1176 = vst [vmem:[#allocation2 + $0x30] sm:$0x1] %v7453_v30 }
  0xa3   : > { %v7071_v22 = vld [vmem:[#allocation8 + $0x38] sm:$0xff]   ;;  %v7077_v28 = vld [vmem:[#allocation8 + $0x20] sm:$0xff]   ;;  %v7080_v29 = vld [vmem:[#allocation8 + $0x50] sm:$0xff]   ;;  %1177 = vst [vmem:[#allocation2 + $0x48] sm:$0x1] %v7453_v30 }
  0xa4   : > { %6294 = vmatpush3.bf16.msra.mxu0 %v7052_v2  ;;  %6925 = vmatpush3.bf16.msra.mxu1 %v7052_v2  ;;  %v7078_v27 = vld [vmem:[#allocation8 + $0x58] sm:$0xff]   ;;  %1178 = vst [vmem:[#allocation2 + $0x60] sm:$0x1] %v7453_v30  ;;  %1179 = vst [vmem:[#allocation2 + $0x78] sm:$0x1] %v7453_v30  ;;  %v7082_v32 = vld [vmem:[#allocation8 + $0x48] sm:$0xff]  }
  0xa5   : > { %6295 = vmatprep.subr.bf16.mxu0 %v7053_v4  ;;  %6922 = vmatprep.subr.bf16.mxu1 %v7053_v4  ;;  %1180 = vst [vmem:[#allocation2 + $0x90] sm:$0x1] %v7453_v30  ;;  %1181 = vst [vmem:[#allocation2 + $0xa8] sm:$0x1] %v7453_v30  ;;  %v7079_v31 = vld [vmem:[#allocation8 + $0x18] sm:$0xff]   ;;  %v7081_v35 = vld [vmem:[#allocation8 + $0x10] sm:$0xff]  }
  0xa6   : > { %1182 = vst [vmem:[#allocation2 + $0xc0] sm:$0x1] %v7453_v30  ;;  %1183 = vst [vmem:[#allocation2 + $0xd8] sm:$0x1] %v7453_v30  ;;  %v7084_v36 = vld [vmem:[#allocation8 + $0x40] sm:$0xff]   ;;  %v1303_v38 = vld [vmem:[#allocation2 + $0x1] sm:$0xff] }
  0xa7   : > { %1184 = vst [vmem:[#allocation2 + $0xf0] sm:$0x1] %v7453_v30  ;;  %1185 = vst [vmem:[#allocation2 + $0x108] sm:$0x1] %v7453_v30  ;;  %v1304_v39 = vld [vmem:[#allocation2 + $0x9] sm:$0xff]  ;;  %v7083_v43 = vld [vmem:[#allocation8 + $0x8] sm:$0xff]  }
  0xa8   : > { %6296 = vmatpush3.bf16.msra.mxu0 %v7053_v4  ;;  %6926 = vmatpush3.bf16.msra.mxu1 %v7053_v4  ;;  %1186 = vst [vmem:[#allocation2 + $0x120] sm:$0x1] %v7453_v30  ;;  %1187 = vst [vmem:[#allocation2 + $0x138] sm:$0x1] %v7453_v30  ;;  %v1335_v42 = vpack.c.bf16 %v1304_v39, %v1303_v38  ;;  %v7085_v44 = vld [vmem:[#allocation8] sm:$0xff]   ;;  %v7791_v45 = vld [vmem:[#allocation8 + $0xb8] sm:$0xff]  }
  0xa9   : > { %6329 = vmatprep.subr.bf16.mxu1 %v7070_v20  ;;  %6377 = vmatprep.subr.bf16.mxu0 %v7071_v22  ;;  %1188 = vst [vmem:[#allocation2 + $0x150] sm:$0x1] %v7453_v30  ;;  %1189 = vst [vmem:[#allocation2 + $0x168] sm:$0x1] %v7453_v30 }
  0xaa   : > { %1190 = vst [vmem:[#allocation2 + $0x180] sm:$0x1] %v7453_v30  ;;  %1191 = vst [vmem:[#allocation2 + $0x29] sm:$0x1] %v7453_v30 }
  0xab   : > { %6298 = vmatmul.mubr.msk.bf16.vlgmr.msra.gmra.mxu0 %vm734_vm0, %v7055_v5  ;;  %6314 = vmatmul.mubr.msk.bf16.vlgmr.msra.gmra.mxu1 %vm734_vm0, %v7063_v8  ;;  %1192 = vst [vmem:[#allocation2 + $0x41] sm:$0x1] %v7453_v30  ;;  %1193 = vst [vmem:[#allocation2 + $0x59] sm:$0x1] %v7453_v30 }
  0xac   : > { %6301 = vmatprep.mubr.msk.bf16.mxu0 %vm734_vm0, %v7056_v7  ;;  %6317 = vmatprep.mubr.msk.bf16.mxu1 %vm734_vm0, %v7064_v9  ;;  %1194 = vst [vmem:[#allocation2 + $0x71] sm:$0x1] %v7453_v30  ;;  %1195 = vst [vmem:[#allocation2 + $0x89] sm:$0x1] %v7453_v30 }
  0xad   : > { %6330 = vmatpush3.bf16.msra.mxu1 %v7070_v20  ;;  %6378 = vmatpush3.bf16.msra.mxu0 %v7071_v22  ;;  %1196 = vst [vmem:[#allocation2 + $0xa1] sm:$0x1] %v7453_v30  ;;  %1197 = vst [vmem:[#allocation2 + $0xb9] sm:$0x1] %v7453_v30 }
  0xae   : > { %6331 = vmatprep.subr.bf16.mxu1 %v7072_v21  ;;  %6379 = vmatprep.subr.bf16.mxu0 %v7073_v24  ;;  %1198 = vst [vmem:[#allocation2 + $0xd1] sm:$0x1] %v7453_v30  ;;  %1199 = vst [vmem:[#allocation2 + $0xe9] sm:$0x1] %v7453_v30 }
  0xaf   : > { %1200 = vst [vmem:[#allocation2 + $0x101] sm:$0x1] %v7453_v30  ;;  %1201 = vst [vmem:[#allocation2 + $0x119] sm:$0x1] %v7453_v30 }
  0xb0   : > { %1202 = vst [vmem:[#allocation2 + $0x131] sm:$0x1] %v7453_v30  ;;  %1203 = vst [vmem:[#allocation2 + $0x149] sm:$0x1] %v7453_v30 }
  0xb1   : > { %6332 = vmatpush3.bf16.msra.mxu1 %v7072_v21  ;;  %6380 = vmatpush3.bf16.msra.mxu0 %v7073_v24  ;;  %1204 = vst [vmem:[#allocation2 + $0x161] sm:$0x1] %v7453_v30  ;;  %1205 = vst [vmem:[#allocation2 + $0x179] sm:$0x1] %v7453_v30 }
  0xb2   : > { %6333 = vmatprep.subr.bf16.mxu1 %v7074_v23  ;;  %6381 = vmatprep.subr.bf16.mxu0 %v7075_v26  ;;  %1206 = vst [vmem:[#allocation2 + $0x191] sm:$0x1] %v7453_v30 }
  0xb3   : > { %6302 = vmatmul.mubr.msk.bf16.gmra.mxu0 %vm734_vm0, %v7057_v10  ;;  %6318 = vmatmul.mubr.msk.bf16.gmra.mxu1 %vm734_vm0, %v7065_v11 }
  0xb4   : > { %6305 = vmatprep.mubr.msk.bf16.mxu0 %vm734_vm0, %v7058_v12  ;;  %6321 = vmatprep.mubr.msk.bf16.mxu1 %vm734_vm0, %v7066_v13 }
  0xb5   : > { %6334 = vmatpush3.bf16.msra.mxu1 %v7074_v23  ;;  %6382 = vmatpush3.bf16.msra.mxu0 %v7075_v26 }
  0xb6   : > { %6335 = vmatprep.subr.bf16.mxu1 %v7076_v25  ;;  %6383 = vmatprep.subr.bf16.mxu0 %v7077_v28 }
  0xb9   : > { %6336 = vmatpush3.bf16.msra.mxu1 %v7076_v25  ;;  %6384 = vmatpush3.bf16.msra.mxu0 %v7077_v28 }
  0xba   : > { %6337 = vmatprep.subr.bf16.mxu1 %v7078_v27  ;;  %6385 = vmatprep.subr.bf16.mxu0 %v7079_v31 }
  0xbb   : > { %6306 = vmatmul.mubr.msk.bf16.gmra.mxu0 %vm734_vm0, %v7059_v14  ;;  %6322 = vmatmul.mubr.msk.bf16.gmra.mxu1 %vm734_vm0, %v7067_v15 }
  0xbc   : > { %6309 = vmatprep.mubr.msk.bf16.mxu0 %vm734_vm0, %v7060_v16  ;;  %6325 = vmatprep.mubr.msk.bf16.mxu1 %vm734_vm0, %v7068_v17 }
  0xbd   : > { %6338 = vmatpush3.bf16.msra.mxu1 %v7078_v27  ;;  %6386 = vmatpush3.bf16.msra.mxu0 %v7079_v31 }
  0xbe   : > { %6339 = vmatprep.subr.bf16.mxu1 %v7080_v29  ;;  %6387 = vmatprep.subr.bf16.mxu0 %v7081_v35 }
  0xc1   : > { %6340 = vmatpush3.bf16.msra.mxu1 %v7080_v29  ;;  %6388 = vmatpush3.bf16.msra.mxu0 %v7081_v35 }
  0xc2   : > { %6341 = vmatprep.subr.bf16.mxu1 %v7082_v32  ;;  %6389 = vmatprep.subr.bf16.mxu0 %v7083_v43 }
  0xc3   : > { %6310 = vmatmul.mubr.msk.bf16.gmra.mxu0 %vm734_vm0, %v7061_v18  ;;  %6326 = vmatmul.mubr.msk.bf16.gmra.mxu1 %vm734_vm0, %v7069_v19 }
  0xc4   : > { %6345 = vmatprep.mubr.bf16.mxu1 %v1335_v42  ;;  %6393 = vmatprep.mubr.bf16.mxu0 %v7454_v50 }
  0xc5   : > { %6342 = vmatpush3.bf16.msra.mxu1 %v7082_v32  ;;  %6390 = vmatpush3.bf16.msra.mxu0 %v7083_v43 }
  0xc6   : > { %6343 = vmatprep.subr.bf16.mxu1 %v7084_v36  ;;  %6391 = vmatprep.subr.bf16.mxu0 %v7085_v44 }
  0xc9   : > { %6344 = vmatpush3.bf16.msra.mxu1 %v7084_v36  ;;  %6392 = vmatpush3.bf16.msra.mxu0 %v7085_v44 }
  0xca   : > { %6425 = vmatprep.subr.bf16.mxu1 %v7791_v45 }
 0x16b   : > { %v7781_v33 = vpop.f32.mrf.mxu0  ;;  %v7783_v34 = vpop.f32.mrf.mxu1 }
 0x16c   : > { %v985_v53 = vmul.f32 %v7781_v33, %v7781_v33 }
 0x16d   : > { %v7785_v37 = vpop.f32.mrf.mxu0  ;;  %v7789_v41 = vpop.f32.mrf.mxu1 }
 0x16e   : > { %v983_v47 = vmul.f32 %v7785_v37, %v7785_v37 }
 0x16f   : > { %v7787_v40 = vpop.f32.mrf.mxu0  ;;  %v7803_v52 = vpop.f32.mrf.mxu1 }
 0x170   : > { %v986_v57 = vmul.f32 %v7787_v40, %v7787_v40 }
 0x171   : > { %v7793_v46 = vpop.f32.mrf.mxu0  ;;  %v7816_v61 = vpop.f32.mrf.mxu1 }
 0x172   : > { %v946_v48 = vadd.f32 %v7793_v46, %v7785_v37  ;;  %v984_v49 = vmul.f32 %v7793_v46, %v7793_v46 }
 0x173   : > { %v7801_v51 = vpop.f32.mrf.mxu0  ;;  %v7828_v6 = vpop.f32.mrf.mxu1 }
 0x174   : > { %v1015_v54 = vadd.f32 %v984_v49, %v983_v47  ;;  %v947_v55 = vadd.f32 %v7781_v33, %v946_v48  ;;  %v989_v7 = vmul.f32 %v7801_v51, %v7801_v51 }
 0x175   : > { %v7809_v56 = vpop.f32.mrf.mxu0  ;;  %v7840_v15 = vpop.f32.mrf.mxu1 }
 0x176   : > { %v948_v58 = vadd.f32 %v7787_v40, %v947_v55  ;;  %v1016_v59 = vadd.f32 %v1015_v54, %v985_v53  ;;  %v987_v63 = vmul.f32 %v7809_v56, %v7809_v56 }
 0x177   : > { %v7814_v60 = vpop.f32.mrf.mxu0  ;;  %v7852_v24 = vpop.f32.mrf.mxu1 }
 0x178   : > { %v949_v62 = vadd.f32 %v948_v58, %v7809_v56  ;;  %v1017_v0 = vadd.f32 %v1016_v59, %v986_v57  ;;  %v990_v11 = vmul.f32 %v7814_v60, %v7814_v60  ;;  %v999_v59 = vmul.f32 %v7789_v41, %v7789_v41 }
 0x179   : > { %v7821_v1 = vpop.f32.mrf.mxu0  ;;  %v7864_v35 = vpop.f32.mrf.mxu1 }
 0x17a   : > { %v1018_v2 = vadd.f32 %v1017_v0, %v987_v63  ;;  %v950_v3 = vadd.f32 %v949_v62, %v7821_v1  ;;  %v988_v4 = vmul.f32 %v7821_v1, %v7821_v1 }
 0x17b   : > { %v7826_v5 = vpop.f32.mrf.mxu0  ;;  %v7874_v48 = vpop.f32.mrf.mxu1 }
 0x17c   : > { %v1019_v8 = vadd.f32 %v1018_v2, %v988_v4  ;;  %v951_v9 = vadd.f32 %v7801_v51, %v950_v3  ;;  %v993_v25 = vmul.f32 %v7826_v5, %v7826_v5  ;;  %v1000_v2 = vmul.f32 %v7816_v61, %v7816_v61 }
 0x17d   : > { %v7833_v10 = vpop.f32.mrf.mxu0  ;;  %v7882_v58 = vpop.f32.mrf.mxu1 }
 0x17e   : > { %v952_v12 = vadd.f32 %v7814_v60, %v951_v9  ;;  %v1020_v13 = vadd.f32 %v1019_v8, %v989_v7  ;;  %v991_v17 = vmul.f32 %v7833_v10, %v7833_v10  ;;  %v7892_v7 = vld [vmem:[#allocation8 + $0xf8] sm:$0xff]   ;;  %v1001_v8 = vmul.f32 %v7783_v34, %v7783_v34 }
 0x17f   : > { %v7838_v14 = vpop.f32.mrf.mxu0  ;;  %v7890_v4 = vpop.f32.mrf.mxu1  ;;  %6473 = vmatprep.subr.bf16.mxu0 %v7892_v7 }
 0x180   : > { %v953_v16 = vadd.f32 %v952_v12, %v7833_v10  ;;  %v1021_v18 = vadd.f32 %v1020_v13, %v990_v11  ;;  %v994_v29 = vmul.f32 %v7838_v14, %v7838_v14  ;;  %v1002_v12 = vmul.f32 %v7803_v52, %v7803_v52 }
 0x181   : > { %v7845_v19 = vpop.f32.mrf.mxu0 }
 0x182   : > { %v1022_v20 = vadd.f32 %v1021_v18, %v991_v17  ;;  %v954_v21 = vadd.f32 %v953_v16, %v7845_v19  ;;  %v992_v22 = vmul.f32 %v7845_v19, %v7845_v19  ;;  %v7901_v17 = vpop.f32.mrf.mxu1 }
 0x183   : > { %v7850_v23 = vpop.f32.mrf.mxu0 }
 0x184   : > { %v1023_v26 = vadd.f32 %v1022_v20, %v992_v22  ;;  %v955_v27 = vadd.f32 %v7826_v5, %v954_v21  ;;  %v997_v49 = vmul.f32 %v7850_v23, %v7850_v23  ;;  %v1003_v20 = vmul.f32 %v7840_v15, %v7840_v15 }
 0x185   : > { %v7857_v28 = vpop.f32.mrf.mxu0 }
 0x186   : > { %v956_v30 = vadd.f32 %v7838_v14, %v955_v27  ;;  %v1024_v31 = vadd.f32 %v1023_v26, %v993_v25  ;;  %v995_v38 = vmul.f32 %v7857_v28, %v7857_v28  ;;  %v1004_v26 = vmul.f32 %v7864_v35, %v7864_v35  ;;  %v7909_v27 = vpop.f32.mrf.mxu1 }
 0x187   : > { %v7862_v32 = vpop.f32.mrf.mxu0 }
 0x188   : > { %v957_v36 = vadd.f32 %v956_v30, %v7857_v28  ;;  %v1025_v39 = vadd.f32 %v1024_v31, %v994_v29  ;;  %v998_v54 = vmul.f32 %v7862_v32, %v7862_v32  ;;  %v1005_v29 = vmul.f32 %v7828_v6, %v7828_v6 }
 0x189   : > { %v7869_v42 = vpop.f32.mrf.mxu0 }
 0x18a   : > { %v1026_v43 = vadd.f32 %v1025_v39, %v995_v38  ;;  %v958_v44 = vadd.f32 %v957_v36, %v7869_v42  ;;  %v996_v47 = vmul.f32 %v7869_v42, %v7869_v42  ;;  %v1006_v36 = vmul.f32 %v7852_v24, %v7852_v24 }
 0x18c   : > { %v959_v50 = vadd.f32 %v7850_v23, %v958_v44  ;;  %v1027_v53 = vadd.f32 %v1026_v43, %v996_v47  ;;  %v7917_v43 = vpop.f32.mrf.mxu1  ;;  %v1007_v47 = vmul.f32 %v7882_v58, %v7882_v58 }
 0x18e   : > { %v1028_v55 = vadd.f32 %v1027_v53, %v997_v49  ;;  %v960_v57 = vadd.f32 %v7862_v32, %v959_v50 }
 0x190   : > { %v961_v62 = vadd.f32 %v960_v57, %v7789_v41  ;;  %v1029_v63 = vadd.f32 %v1028_v55, %v998_v54  ;;  %v1008_v54 = vmul.f32 %v7901_v17, %v7901_v17  ;;  %v7925_v55 = vpop.f32.mrf.mxu1  ;;  %v1009_v57 = vmul.f32 %v7874_v48, %v7874_v48 }
 0x192   : > { %v962_v0 = vadd.f32 %v961_v62, %v7816_v61  ;;  %v1030_v3 = vadd.f32 %v1029_v63, %v999_v59  ;;  %v1010_v63 = vmul.f32 %v7890_v4, %v7890_v4 }
 0x194   : > { %v1031_v9 = vadd.f32 %v1030_v3, %v1000_v2  ;;  %v963_v11 = vadd.f32 %v7783_v34, %v962_v0  ;;  %v932_v3 = vpop.f32.mrf.mxu1 }
 0x196   : > { %v964_v13 = vadd.f32 %v7803_v52, %v963_v11  ;;  %v1032_v16 = vadd.f32 %v1031_v9, %v1001_v8  ;;  %v1011_v9 = vmul.f32 %v7917_v43, %v7917_v43 }
 0x198   : > { %v965_v18 = vadd.f32 %v964_v13, %v7840_v15  ;;  %v1033_v21 = vadd.f32 %v1032_v16, %v1002_v12  ;;  %v1012_v16 = vmul.f32 %v932_v3, %v932_v3 }
 0x19a   : > { %v1034_v22 = vadd.f32 %v1033_v21, %v1003_v20  ;;  %v966_v25 = vadd.f32 %v965_v18, %v7864_v35  ;;  %v1013_v18 = vmul.f32 %v7909_v27, %v7909_v27 }
 0x19c   : > { %v1035_v30 = vadd.f32 %v1034_v22, %v1004_v26  ;;  %v967_v31 = vadd.f32 %v7828_v6, %v966_v25  ;;  %v1014_v22 = vmul.f32 %v7925_v55, %v7925_v55 }
 0x19e   : > { %v968_v38 = vadd.f32 %v7852_v24, %v967_v31  ;;  %v1036_v39 = vadd.f32 %v1035_v30, %v1005_v29 }
 0x1a0   : > { %v969_v44 = vadd.f32 %v968_v38, %v7882_v58  ;;  %v1037_v49 = vadd.f32 %v1036_v39, %v1006_v36 }
 0x1a2   : > { %v1038_v50 = vadd.f32 %v1037_v49, %v1007_v47  ;;  %v970_v53 = vadd.f32 %v969_v44, %v7901_v17 }
 0x1a4   : > { %v1039_v59 = vadd.f32 %v1038_v50, %v1008_v54  ;;  %v971_v62 = vadd.f32 %v7874_v48, %v970_v53 }
 0x1a6   : > { %v972_v0 = vadd.f32 %v7890_v4, %v971_v62  ;;  %v1040_v2 = vadd.f32 %v1039_v59, %v1009_v57 }
 0x1a8   : > { %v973_v8 = vadd.f32 %v972_v0, %v7917_v43  ;;  %v1041_v11 = vadd.f32 %v1040_v2, %v1010_v63 }
 0x1aa   : > { %v1042_v12 = vadd.f32 %v1041_v11, %v1011_v9  ;;  %v974_v13 = vadd.f32 %v973_v8, %v932_v3  ;;  %v1061_v8 = vlaneseq  ;;  %v944_v11 = vld [vmem:[%s9994_s5] sm:$0x1] }
 0x1ac   : > { %v975_v20 = vadd.f32 %v7909_v27, %v974_v13  ;;  %v1043_v21 = vadd.f32 %v1042_v12, %v1012_v16  ;;  %v1062_v9 = vshrl.u32 %v1061_v8, 7 }
 0x1ae   : > { %v976_v25 = vadd.f32 %v7925_v55, %v975_v20  ;;  %v1044_v26 = vadd.f32 %v1043_v21, %v1013_v18  ;;  %v7945_v12 = vsub.s32 0, %v1062_v9  ;;  %v945_v18 = vld [vmem:[#allocation12] sm:$0x1] }
 0x1b0   : > { %v977_v29 = vrot.slane %v976_v25, 4  ;;  %v1045_v30 = vadd.f32 %v1044_v26, %v1014_v22  ;;  %10079 = vst [vmem:[#allocation24_spill] sm:$0xff] %v7945_v12 }
 0x1b2   : > { %v978_v31 = vadd.f32 %v977_v29, %v976_v25  ;;  %v1046_v36 = vrot.slane %v1045_v30, 4 }
 0x1b4   : > { %v979_v38 = vrot.slane %v978_v31, 2  ;;  %v1047_v39 = vadd.f32 %v1046_v36, %v1045_v30 }
 0x1b6   : > { %v980_v44 = vadd.f32 %v979_v38, %v978_v31  ;;  %v1048_v47 = vrot.slane %v1047_v39, 2 }
 0x1b8   : > { %v981_v49 = vrot.slane %v980_v44, 1  ;;  %v1049_v50 = vadd.f32 %v1048_v47, %v1047_v39 }
 0x1ba   : > { %v982_v53 = vadd.f32 %v981_v49, %v980_v44  ;;  %v1050_v54 = vrot.slane %v1049_v50, 1 }
 0x1bc   : > { %v1051_v57 = vadd.f32 %v1050_v54, %v1049_v50  ;;  %v1052_v59 = vmul.f32 0.00390625, %v982_v53 }
 0x1be   : > { %v1053_v62 = vmul.f32 0.00390625, %v1051_v57  ;;  %v1054_v63 = vmul.f32 %v1052_v59, %v1052_v59 }
 0x1c0   : > { %v1055_v0 = vsub.f32 %v1053_v62, %v1054_v63 }
 0x1c2   : > { %v1056_v2 = vadd.f32 1e-06, %v1055_v0 }
 0x1c4   : > { %7170 = vrsqrt.f32 %v1056_v2 }
 0x1d1   : > { %v7171_v13 = vpop.eup %7170 }
 0x1d2   : > { %v1058_v16 = vmul.f32 %v7171_v13, %v944_v11 }
 0x1d4   : > { %v1059_v20 = vmul.f32 %v1058_v16, %v1052_v59  ;;  %v1064_v21 = vrot.slane %v1058_v16, %v7945_v12 }
 0x1d6   : > { %v1060_v22 = vsub.f32 %v945_v18, %v1059_v20  ;;  %v1094_v25 = vmul.f32 %v1064_v21, %v932_v3  ;;  %v1065_v26 = vmul.f32 %v1064_v21, %v7785_v37  ;;  %v1066_v29 = vmul.f32 %v1064_v21, %v7793_v46 }
 0x1d7   : > { %v1067_v30 = vmul.f32 %v7781_v33, %v1064_v21  ;;  %v1068_v31 = vmul.f32 %v7787_v40, %v1064_v21  ;;  %v1069_v36 = vmul.f32 %v1064_v21, %v7809_v56  ;;  %v1070_v38 = vmul.f32 %v1064_v21, %v7821_v1 }
 0x1d8   : > { %v1101_v39 = vrot.slane %v1060_v22, %v7945_v12  ;;  %v1071_v44 = vmul.f32 %v7801_v51, %v1064_v21  ;;  %v1072_v47 = vmul.f32 %v7814_v60, %v1064_v21  ;;  %v1073_v3 = vmul.f32 %v1064_v21, %v7833_v10 }
 0x1d9   : > { %v1074_v37 = vmul.f32 %v1064_v21, %v7845_v19  ;;  %v1075_v46 = vmul.f32 %v7826_v5, %v1064_v21  ;;  %v1076_v33 = vmul.f32 %v7838_v14, %v1064_v21  ;;  %v1077_v40 = vmul.f32 %v1064_v21, %v7857_v28 }
 0x1da   : > { %v7962_v49 = vadd.f32 %v1101_v39, %v1094_v25  ;;  %v1078_v56 = vmul.f32 %v1064_v21, %v7869_v42  ;;  %v1079_v1 = vmul.f32 %v7850_v23, %v1064_v21  ;;  %v1080_v51 = vmul.f32 %v7862_v32, %v1064_v21 }
 0x1db   : > { %v1081_v60 = vmul.f32 %v1064_v21, %v7789_v41  ;;  %v1082_v10 = vmul.f32 %v1064_v21, %v7816_v61  ;;  %v1083_v19 = vmul.f32 %v7783_v34, %v1064_v21  ;;  %v1084_v5 = vmul.f32 %v7803_v52, %v1064_v21 }
 0x1dc   : > { %v10016_v14 = vmax.f32 %v7962_v49, 0.0  ;;  %v1085_v28 = vmul.f32 %v1064_v21, %v7840_v15  ;;  %v1086_v50 = vmul.f32 %v1064_v21, %v7864_v35  ;;  %v1087_v42 = vmul.f32 %v7828_v6, %v1064_v21 }
 0x1dd   : > { %v1088_v23 = vmul.f32 %v7852_v24, %v1064_v21  ;;  %v1089_v32 = vmul.f32 %v1064_v21, %v7882_v58  ;;  %v1090_v41 = vmul.f32 %v1064_v21, %v7901_v17  ;;  %v1091_v61 = vmul.f32 %v7874_v48, %v1064_v21 }
 0x1de   : > { %1236 = vst [vmem:[#allocation2 + $0x171] sm:$0xff] %v10016_v14  ;;  %v1092_v34 = vmul.f32 %v7890_v4, %v1064_v21  ;;  %v1093_v52 = vmul.f32 %v1064_v21, %v7917_v43  ;;  %v1095_v15 = vmul.f32 %v7909_v27, %v1064_v21  ;;  %v1096_v35 = vmul.f32 %v7925_v55, %v1064_v21 }
 0x1df   : > { %v7985_v6 = vadd.f32 %v1101_v39, %v1065_v26  ;;  %v7987_v24 = vadd.f32 %v1101_v39, %v1066_v29  ;;  %v7989_v58 = vadd.f32 %v1101_v39, %v1067_v30  ;;  %v7991_v17 = vadd.f32 %v1101_v39, %v1068_v31 }
 0x1e0   : > { %v7993_v48 = vadd.f32 %v1101_v39, %v1069_v36  ;;  %v7995_v53 = vadd.f32 %v1101_v39, %v1070_v38  ;;  %v7997_v54 = vadd.f32 %v1101_v39, %v1071_v44  ;;  %v7999_v4 = vadd.f32 %v1101_v39, %v1072_v47 }
 0x1e1   : > { %v8001_v43 = vadd.f32 %v1101_v39, %v1073_v3  ;;  %v8003_v27 = vadd.f32 %v1101_v39, %v1074_v37  ;;  %v8005_v55 = vadd.f32 %v1101_v39, %v1075_v46  ;;  %v8007_v57 = vadd.f32 %v1101_v39, %v1076_v33 }
 0x1e2   : > { %v8009_v59 = vadd.f32 %v1101_v39, %v1077_v40  ;;  %v8011_v62 = vadd.f32 %v1101_v39, %v1078_v56  ;;  %v8013_v63 = vadd.f32 %v1101_v39, %v1079_v1  ;;  %v8015_v0 = vadd.f32 %v1101_v39, %v1080_v51 }
 0x1e3   : > { %v8017_v2 = vadd.f32 %v1101_v39, %v1081_v60  ;;  %v8019_v8 = vadd.f32 %v1101_v39, %v1082_v10  ;;  %v8021_v9 = vadd.f32 %v1101_v39, %v1083_v19  ;;  %v8023_v11 = vadd.f32 %v1101_v39, %v1084_v5 }
 0x1e4   : > { %v8025_v13 = vadd.f32 %v1101_v39, %v1085_v28  ;;  %v8027_v16 = vadd.f32 %v1101_v39, %v1086_v50  ;;  %v8029_v18 = vadd.f32 %v1101_v39, %v1087_v42  ;;  %v8031_v20 = vadd.f32 %v1101_v39, %v1088_v23 }
 0x1e5   : > { %v8033_v21 = vadd.f32 %v1101_v39, %v1089_v32  ;;  %v8035_v22 = vadd.f32 %v1101_v39, %v1090_v41  ;;  %v8037_v25 = vadd.f32 %v1101_v39, %v1091_v61  ;;  %v8039_v26 = vadd.f32 %v1101_v39, %v1092_v34 }
 0x1e6   : > { %v8041_v29 = vadd.f32 %v1101_v39, %v1093_v52  ;;  %v8043_v30 = vadd.f32 %v1101_v39, %v1095_v15  ;;  %v8045_v31 = vadd.f32 %v1101_v39, %v1096_v35  ;;  %v1135_v36 = vmax.f32 %v7985_v6, 0.0 }
 0x1e7   : > { %v1136_v38 = vmax.f32 %v7987_v24, 0.0  ;;  %v1137_v44 = vmax.f32 %v7989_v58, 0.0  ;;  %v1138_v47 = vmax.f32 %v7991_v17, 0.0  ;;  %v1139_v3 = vmax.f32 %v7993_v48, 0.0  ;;  %v7095_v48 = vld [vmem:[#allocation8 + $0xe0] sm:$0xff]  }
 0x1e8   : > { %v1140_v37 = vmax.f32 %v7995_v53, 0.0  ;;  %v1141_v46 = vmax.f32 %v7997_v54, 0.0  ;;  %v1142_v33 = vmax.f32 %v7999_v4, 0.0  ;;  %v1143_v40 = vmax.f32 %v8001_v43, 0.0  ;;  %1207 = vst [vmem:[#allocation2 + $0x19] sm:$0xff] %v1135_v36  ;;  %v7093_v54 = vld [vmem:[#allocation8 + $0x90] sm:$0xff]  }
 0x1e9   : > { %v1144_v39 = vmax.f32 %v8003_v27, 0.0  ;;  %v1145_v56 = vmax.f32 %v8005_v55, 0.0  ;;  %v1146_v1 = vmax.f32 %v8007_v57, 0.0  ;;  %v1147_v51 = vmax.f32 %v8009_v59, 0.0  ;;  %1208 = vst [vmem:[#allocation2 + $0x21] sm:$0xff] %v1136_v38  ;;  %1209 = vst [vmem:[#allocation2 + $0x31] sm:$0xff] %v1137_v44 }
 0x1ea   : > { %1210 = vst [vmem:[#allocation2 + $0x39] sm:$0xff] %v1138_v47  ;;  %1211 = vst [vmem:[#allocation2 + $0x49] sm:$0xff] %v1139_v3  ;;  %v1148_v60 = vmax.f32 %v8011_v62, 0.0  ;;  %v1149_v10 = vmax.f32 %v8013_v63, 0.0  ;;  %v1150_v19 = vmax.f32 %v8015_v0, 0.0  ;;  %v1151_v5 = vmax.f32 %v8017_v2, 0.0 }
 0x1eb   : > { %1212 = vst [vmem:[#allocation2 + $0x51] sm:$0xff] %v1140_v37  ;;  %1213 = vst [vmem:[#allocation2 + $0x61] sm:$0xff] %v1141_v46  ;;  %v1152_v28 = vmax.f32 %v8019_v8, 0.0  ;;  %v1153_v50 = vmax.f32 %v8021_v9, 0.0  ;;  %v10017_v42 = vmax.f32 %v8023_v11, 0.0  ;;  %v1155_v23 = vmax.f32 %v8025_v13, 0.0 }
 0x1ec   : > { %1214 = vst [vmem:[#allocation2 + $0x69] sm:$0xff] %v1142_v33  ;;  %1215 = vst [vmem:[#allocation2 + $0x79] sm:$0xff] %v1143_v40  ;;  %v1156_v32 = vmax.f32 %v8027_v16, 0.0  ;;  %v1157_v41 = vmax.f32 %v8029_v18, 0.0  ;;  %v1158_v61 = vmax.f32 %v8031_v20, 0.0  ;;  %v1159_v34 = vmax.f32 %v8033_v21, 0.0 }
 0x1ed   : > { %1216 = vst [vmem:[#allocation2 + $0x81] sm:$0xff] %v1144_v39  ;;  %1217 = vst [vmem:[#allocation2 + $0x91] sm:$0xff] %v1145_v56  ;;  %v1160_v52 = vmax.f32 %v8035_v22, 0.0  ;;  %v10018_v15 = vmax.f32 %v8037_v25, 0.0  ;;  %v10019_v35 = vmax.f32 %v8039_v26, 0.0  ;;  %v1163_v6 = vmax.f32 %v8041_v29, 0.0 }
 0x1ee   : > { %1218 = vst [vmem:[#allocation2 + $0x99] sm:$0xff] %v1146_v1  ;;  %1219 = vst [vmem:[#allocation2 + $0xa9] sm:$0xff] %v1147_v51  ;;  %v1165_v24 = vmax.f32 %v8043_v30, 0.0  ;;  %v1166_v58 = vmax.f32 %v8045_v31, 0.0  ;;  %v1336_v17 = vpack.c.bf16 %v1136_v38, %v1135_v36  ;;  %v1337_v14 = vpack.c.bf16 %v1138_v47, %v1137_v44  ;;  %v7098_v43 = vld [vmem:[#allocation8 + $0xd0] sm:$0xff]   ;;  %v7099_v55 = vld [vmem:[#allocation8 + $0x80] sm:$0xff]  }
 0x1ef   : > { %1220 = vst [vmem:[#allocation2 + $0xb1] sm:$0xff] %v1148_v60  ;;  %1221 = vst [vmem:[#allocation2 + $0xc1] sm:$0xff] %v1149_v10  ;;  %v1241_v30 = vld [vmem:[#allocation2 + $0x18] sm:$0xff]  ;;  %v1340_v4 = vpack.c.bf16 %v1144_v39, %v1143_v40  ;;  %v1342_v57 = vpack.c.bf16 %v1148_v60, %v1147_v51  ;;  %v7101_v59 = vld [vmem:[#allocation8 + $0xc0] sm:$0xff]   ;;  %v1344_v0 = vpack.c.bf16 %v1152_v28, %v1151_v5  ;;  %v10081_v20 = vmax.f32 %v8037_v25, 0.0 }
 0x1f0   : > { %1222 = vst [vmem:[#allocation2 + $0xc9] sm:$0xff] %v1150_v19  ;;  %1223 = vst [vmem:[#allocation2 + $0xd9] sm:$0xff] %v1151_v5  ;;  %6346 = vmatmul.mubr.bf16.vlgmr.msra.gmra.mxu1 %v1336_v17  ;;  %v1242_v31 = vld [vmem:[#allocation2 + $0x20] sm:$0xff]  ;;  %v1243_v36 = vld [vmem:[#allocation2 + $0x30] sm:$0xff]  ;;  %v1346_v8 = vpack.c.bf16 %v1156_v32, %v1155_v23  ;;  %v1347_v5 = vpack.c.bf16 %v1158_v61, %v1157_v41  ;;  %v1348_v13 = vpack.c.bf16 %v1160_v52, %v1159_v34 }
 0x1f1   : > { %1224 = vst [vmem:[#allocation2 + $0xe1] sm:$0xff] %v1152_v28  ;;  %1225 = vst [vmem:[#allocation2 + $0xf1] sm:$0xff] %v1153_v50  ;;  %v1244_v38 = vld [vmem:[#allocation2 + $0x38] sm:$0xff]  ;;  %v8128_v44 = vpack.c.bf16 %v1242_v31, %v1241_v30  ;;  %6426 = vmatpush3.bf16.msra.mxu1 %v7791_v45  ;;  %6349 = vmatprep.mubr.bf16.mxu1 %v1337_v14  ;;  %v1338_v45 = vpack.c.bf16 %v1140_v37, %v1139_v3  ;;  %v1245_v14 = vld [vmem:[#allocation2 + $0x48] sm:$0xff]  ;;  %v10083_v25 = vmax.f32 %v7962_v49, 0.0 }
 0x1f2   : > { %1226 = vst [vmem:[#allocation2 + $0xf9] sm:$0xff] %v10017_v42  ;;  %1227 = vst [vmem:[#allocation2 + $0x109] sm:$0xff] %v1155_v23  ;;  %v7087_v42 = vld [vmem:[#allocation8 + $0xb0] sm:$0xff]   ;;  %v8131_v47 = vpack.c.bf16 %v1244_v38, %v1243_v36  ;;  %v7094_v17 = vld [vmem:[#allocation8 + $0xe8] sm:$0xff]   ;;  %v1339_v30 = vpack.c.bf16 %v1142_v33, %v1141_v46  ;;  %v10082_v23 = vmax.f32 %v8039_v26, 0.0 }
 0x1f3   : > { %1228 = vst [vmem:[#allocation2 + $0x111] sm:$0xff] %v1156_v32  ;;  %1229 = vst [vmem:[#allocation2 + $0x121] sm:$0xff] %v1157_v41  ;;  %6427 = vmatprep.subr.bf16.mxu1 %v7087_v42  ;;  %6394 = vmatmul.mubr.bf16.vlgmr.msra.gmra.mxu0 %v8128_v44  ;;  %v1247_v31 = vld [vmem:[#allocation2 + $0x60] sm:$0xff]  ;;  %v1248_v36 = vld [vmem:[#allocation2 + $0x68] sm:$0xff]  ;;  %v1350_v26 = vpack.c.bf16 %v10083_v25, %v1163_v6 }
 0x1f4   : > { %1230 = vst [vmem:[#allocation2 + $0x129] sm:$0xff] %v1158_v61  ;;  %1231 = vst [vmem:[#allocation2 + $0x139] sm:$0xff] %v1159_v34  ;;  %6397 = vmatprep.mubr.bf16.mxu0 %v8131_v47  ;;  %6474 = vmatpush3.bf16.msra.mxu0 %v7892_v7  ;;  %v8146_v53 = vpack.c.bf16 %v1248_v36, %v1247_v31  ;;  %v7090_v3 = vld [vmem:[#allocation8 + $0x98] sm:$0xff]   ;;  %v1249_v37 = vld [vmem:[#allocation2 + $0x78] sm:$0xff]  ;;  %v1349_v32 = vpack.c.bf16 %v10082_v23, %v10081_v20 }
 0x1f5   : > { %1232 = vst [vmem:[#allocation2 + $0x141] sm:$0xff] %v1160_v52  ;;  %1233 = vst [vmem:[#allocation2 + $0x151] sm:$0xff] %v10018_v15  ;;  %v7092_v15 = vld [vmem:[#allocation8 + $0xf0] sm:$0xff]   ;;  %6428 = vmatpush3.bf16.msra.mxu1 %v7087_v42  ;;  %v7097_v33 = vld [vmem:[#allocation8 + $0xd8] sm:$0xff]   ;;  %v1341_v42 = vpack.c.bf16 %v1146_v1, %v1145_v56 }
 0x1f6   : > { %1234 = vst [vmem:[#allocation2 + $0x159] sm:$0xff] %v10019_v35  ;;  %1235 = vst [vmem:[#allocation2 + $0x169] sm:$0xff] %v1163_v6  ;;  %v7088_v35 = vld [vmem:[#allocation8 + $0xa8] sm:$0xff]   ;;  %6475 = vmatprep.subr.bf16.mxu0 %v7092_v15  ;;  %v1250_v46 = vld [vmem:[#allocation2 + $0x80] sm:$0xff] }
 0x1f7   : > { %1237 = vst [vmem:[#allocation2 + $0x181] sm:$0xff] %v1165_v24  ;;  %1238 = vst [vmem:[#allocation2 + $0x189] sm:$0xff] %v1166_v58  ;;  %v7089_v24 = vld [vmem:[#allocation8 + $0xa0] sm:$0xff]   ;;  %6429 = vmatprep.subr.bf16.mxu1 %v7088_v35  ;;  %v8158_v38 = vpack.c.bf16 %v1250_v46, %v1249_v37  ;;  %v7096_v40 = vld [vmem:[#allocation8 + $0x88] sm:$0xff]  }
 0x1f8   : > { %v1246_v58 = vld [vmem:[#allocation2 + $0x50] sm:$0xff]  ;;  %6350 = vmatmul.mubr.bf16.gmra.mxu1 %v1338_v45  ;;  %6476 = vmatpush3.bf16.msra.mxu0 %v7092_v15  ;;  %v1253_v39 = vld [vmem:[#allocation2 + $0xa8] sm:$0xff]  ;;  %v7100_v1 = vld [vmem:[#allocation8 + $0xc8] sm:$0xff]  }
 0x1f9   : > { %v8144_v7 = vpack.c.bf16 %v1246_v58, %v1245_v14  ;;  %6353 = vmatprep.mubr.bf16.mxu1 %v1339_v30  ;;  %6430 = vmatpush3.bf16.msra.mxu1 %v7088_v35  ;;  %v1251_v15 = vld [vmem:[#allocation2 + $0x90] sm:$0xff]  ;;  %v1252_v35 = vld [vmem:[#allocation2 + $0x98] sm:$0xff]  ;;  %v1255_v45 = vld [vmem:[#allocation2 + $0xc0] sm:$0xff] }
 0x1fa   : > { %6431 = vmatprep.subr.bf16.mxu1 %v7089_v24  ;;  %6477 = vmatprep.subr.bf16.mxu0 %v7094_v17  ;;  %v8160_v27 = vpack.c.bf16 %v1252_v35, %v1251_v15  ;;  %v1254_v56 = vld [vmem:[#allocation2 + $0xb0] sm:$0xff]  ;;  %v1256_v14 = vld [vmem:[#allocation2 + $0xc8] sm:$0xff]  ;;  %v1257_v60 = vld [vmem:[#allocation2 + $0xd8] sm:$0xff] }
 0x1fb   : > { %6398 = vmatmul.mubr.bf16.gmra.mxu0 %v8144_v7  ;;  %v8172_v58 = vpack.c.bf16 %v1254_v56, %v1253_v39  ;;  %v8174_v62 = vpack.c.bf16 %v1256_v14, %v1255_v45  ;;  %v8176_v51 = vld [vmem:[#allocation8 + $0x138] sm:$0xff]   ;;  %v1259_v30 = vld [vmem:[#allocation2 + $0xf0] sm:$0xff]  ;;  %v1260_v31 = vld [vmem:[#allocation2 + $0xf8] sm:$0xff] }
 0x1fc   : > { %6401 = vmatprep.mubr.bf16.mxu0 %v8146_v53  ;;  %6478 = vmatpush3.bf16.msra.mxu0 %v7094_v17  ;;  %v8180_v63 = vld [vmem:[#allocation8 + $0x178] sm:$0xff]   ;;  %v8194_v2 = vpack.c.bf16 %v1260_v31, %v1259_v30  ;;  %v1263_v28 = vld [vmem:[#allocation2 + $0x120] sm:$0xff]  ;;  %v1265_v16 = vld [vmem:[#allocation2 + $0x138] sm:$0xff] }
 0x1fd   : > { %6432 = vmatpush3.bf16.msra.mxu1 %v7089_v24  ;;  %6479 = vmatprep.subr.bf16.mxu0 %v7095_v48  ;;  %v1343_v24 = vpack.c.bf16 %v1150_v19, %v1149_v10  ;;  %v1258_v10 = vld [vmem:[#allocation2 + $0xe0] sm:$0xff]  ;;  %v10080_v19 = vmax.f32 %v8023_v11, 0.0  ;;  %v1261_v9 = vld [vmem:[#allocation2 + $0x108] sm:$0xff]  ;;  %v1262_v11 = vld [vmem:[#allocation2 + $0x110] sm:$0xff] }
 0x1fe   : > { %6433 = vmatprep.subr.bf16.mxu1 %v7090_v3  ;;  %v8191_v36 = vpack.c.bf16 %v1258_v10, %v1257_v60  ;;  %v1266_v18 = vld [vmem:[#allocation2 + $0x140] sm:$0xff]  ;;  %v1267_v41 = vld [vmem:[#allocation2 + $0x150] sm:$0xff]  ;;  %v1268_v61 = vld [vmem:[#allocation2 + $0x158] sm:$0xff] }
 0x1ff   : > { %v1345_v17 = vpack.c.bf16 %v10080_v19, %v1153_v50  ;;  %v1264_v50 = vld [vmem:[#allocation2 + $0x128] sm:$0xff]  ;;  %v1270_v52 = vld [vmem:[#allocation2 + $0x170] sm:$0xff]  ;;  %v1791_v35 = vld [vmem:[#allocation2 + $0x3a] sm:$0xff] }
 0x200   : > { %6354 = vmatmul.mubr.bf16.gmra.mxu1 %v1340_v4  ;;  %6480 = vmatpush3.bf16.msra.mxu0 %v7095_v48  ;;  %v8206_v48 = vpack.c.bf16 %v1262_v11, %v1261_v9  ;;  %v8222_v4 = vpack.c.bf16 %v1268_v61, %v1267_v41  ;;  %v1786_v37 = vld [vmem:[#allocation2 + $0x2] sm:$0xff]  ;;  %v1787_v21 = vld [vmem:[#allocation2 + $0xa] sm:$0xff]  ;;  %v1790_v15 = vld [vmem:[#allocation2 + $0x32] sm:$0xff] }
 0x201   : > { %6357 = vmatprep.mubr.bf16.mxu1 %v1341_v42  ;;  %6434 = vmatpush3.bf16.msra.mxu1 %v7090_v3  ;;  %v8208_v3 = vpack.c.bf16 %v1264_v50, %v1263_v28  ;;  %v1818_v22 = vpack.c.bf16 %v1787_v21, %v1786_v37  ;;  %v1269_v34 = vld [vmem:[#allocation2 + $0x168] sm:$0xff]  ;;  %v7103_v29 = vld [vmem:[#allocation8 + $0x130] sm:$0xff]   ;;  %v7104_v6 = vld [vmem:[#allocation8 + $0x128] sm:$0xff]  }
 0x202   : > { %6435 = vmatprep.subr.bf16.mxu1 %v7093_v54  ;;  %6481 = vmatprep.subr.bf16.mxu0 %v7097_v33  ;;  %v8230_v46 = vpack.c.bf16 %v1270_v52, %v1269_v34  ;;  %v1789_v42 = vld [vmem:[#allocation2 + $0x22] sm:$0xff]  ;;  %v1795_v39 = vld [vmem:[#allocation2 + $0x6a] sm:$0xff]  ;;  %v1796_v14 = vld [vmem:[#allocation2 + $0x7a] sm:$0xff] }
 0x203   : > { %6402 = vmatmul.mubr.bf16.gmra.mxu0 %v8158_v38  ;;  %v7108_v49 = vld [vmem:[#allocation8 + $0x170] sm:$0xff]   ;;  %v7113_v10 = vld [vmem:[#allocation8 + $0x158] sm:$0xff]   ;;  %v1801_v30 = vld [vmem:[#allocation2 + $0xb2] sm:$0xff] }
 0x204   : > { %6405 = vmatprep.mubr.bf16.mxu0 %v8160_v27  ;;  %6482 = vmatpush3.bf16.msra.mxu0 %v7097_v33  ;;  %v1788_v33 = vld [vmem:[#allocation2 + $0x1a] sm:$0xff]  ;;  %v1802_v31 = vld [vmem:[#allocation2 + $0xc2] sm:$0xff]  ;;  %v7115_v11 = vld [vmem:[#allocation8 + $0x100] sm:$0xff]  }
 0x205   : > { %6436 = vmatpush3.bf16.msra.mxu1 %v7093_v54  ;;  %6483 = vmatprep.subr.bf16.mxu0 %v7098_v43  ;;  %v8220_v54 = vpack.c.bf16 %v1266_v18, %v1265_v16  ;;  %v7109_v60 = vld [vmem:[#allocation8 + $0x110] sm:$0xff]   ;;  %v1806_v16 = vld [vmem:[#allocation2 + $0xf2] sm:$0xff]  ;;  %v7123_v20 = vld [vmem:[#allocation8 + $0x1f8] sm:$0xff]  }
 0x206   : > { %6437 = vmatprep.subr.bf16.mxu1 %v7096_v40  ;;  %v1804_v50 = vld [vmem:[#allocation2 + $0xda] sm:$0xff]  ;;  %v1810_v41 = vld [vmem:[#allocation2 + $0x122] sm:$0xff]  ;;  %v1811_v61 = vld [vmem:[#allocation2 + $0x12a] sm:$0xff] }
 0x207   : > { %v1807_v18 = vld [vmem:[#allocation2 + $0xfa] sm:$0xff]  ;;  %v8278_v21 = vpack.c.bf16 %v1811_v61, %v1810_v41  ;;  %v1813_v25 = vld [vmem:[#allocation2 + $0x142] sm:$0xff]  ;;  %v1816_v52 = vld [vmem:[#allocation2 + $0x16a] sm:$0xff] }
 0x208   : > { %6358 = vmatmul.mubr.bf16.gmra.mxu1 %v1342_v57  ;;  %6484 = vmatpush3.bf16.msra.mxu0 %v7098_v43  ;;  %v8234_v43 = vpack.c.bf16 %v1789_v42, %v1788_v33  ;;  %v1794_v57 = vld [vmem:[#allocation2 + $0x62] sm:$0xff]  ;;  %v1817_v33 = vld [vmem:[#allocation2 + $0x172] sm:$0xff] }
 0x209   : > { %6361 = vmatprep.mubr.bf16.mxu1 %v1343_v24  ;;  %6438 = vmatpush3.bf16.msra.mxu1 %v7096_v40  ;;  %v8236_v40 = vpack.c.bf16 %v1791_v35, %v1790_v15  ;;  %v7110_v24 = vld [vmem:[#allocation8 + $0x168] sm:$0xff]   ;;  %v8246_v45 = vpack.c.bf16 %v1795_v39, %v1794_v57  ;;  %v2399_v42 = vld [vmem:[#allocation2 + $0x21] sm:$0xff]  ;;  %v8292_v15 = vpack.c.bf16 %v1817_v33, %v1816_v52  ;;  %v2418_v41 = vld [vmem:[#allocation2 + $0x109] sm:$0xff] }
 0x20a   : > { %6439 = vmatprep.subr.bf16.mxu1 %v7099_v55  ;;  %6485 = vmatprep.subr.bf16.mxu0 %v7100_v1  ;;  %v2123_v35 = vld [vmem:[#allocation2 + $0x188] sm:$0xff]  ;;  %v7119_v57 = vld [vmem:[#allocation8 + $0x1b0] sm:$0xff]   ;;  %v2419_v61 = vld [vmem:[#allocation2 + $0x111] sm:$0xff] }
 0x20b   : > { %6406 = vmatmul.mubr.bf16.gmra.mxu0 %v8172_v58 }
 0x20c   : > { %6409 = vmatprep.mubr.bf16.mxu0 %v8174_v62  ;;  %6486 = vmatpush3.bf16.msra.mxu0 %v7100_v1  ;;  %v7105_v1 = vld [vmem:[#allocation8 + $0x120] sm:$0xff]  }
 0x20d   : > { %6440 = vmatpush3.bf16.msra.mxu1 %v7099_v55  ;;  %6487 = vmatprep.subr.bf16.mxu0 %v7101_v59  ;;  %v1792_v55 = vld [vmem:[#allocation2 + $0x4a] sm:$0xff] }
 0x20e   : > { %6521 = vmatprep.subr.bf16.mxu1 %v8176_v51 }
 0x210   : > { %6362 = vmatmul.mubr.bf16.gmra.mxu1 %v1344_v0  ;;  %6488 = vmatpush3.bf16.msra.mxu0 %v7101_v59  ;;  %v1797_v59 = vld [vmem:[#allocation2 + $0x82] sm:$0xff] }
 0x211   : > { %6365 = vmatprep.mubr.bf16.mxu1 %v1345_v17  ;;  %6569 = vmatprep.subr.bf16.mxu0 %v8180_v63  ;;  %v8252_v0 = vpack.c.bf16 %v1797_v59, %v1796_v14  ;;  %v1800_v17 = vld [vmem:[#allocation2 + $0xaa] sm:$0xff]  ;;  %v2407_v14 = vld [vmem:[#allocation2 + $0x81] sm:$0xff] }
 0x212   : > { %v8260_v9 = vpack.c.bf16 %v1801_v30, %v1800_v17  ;;  %v2411_v17 = vld [vmem:[#allocation2 + $0xb1] sm:$0xff] }
 0x213   : > { %6410 = vmatmul.mubr.bf16.gmra.mxu0 %v8191_v36 }
 0x214   : > { %6413 = vmatprep.mubr.bf16.mxu0 %v8194_v2 }
 0x218   : > { %6366 = vmatmul.mubr.bf16.gmra.mxu1 %v1346_v8  ;;  %v1803_v8 = vld [vmem:[#allocation2 + $0xca] sm:$0xff] }
 0x219   : > { %6369 = vmatprep.mubr.bf16.mxu1 %v1347_v5  ;;  %v7116_v5 = vld [vmem:[#allocation8 + $0x148] sm:$0xff]   ;;  %v8262_v28 = vpack.c.bf16 %v1803_v8, %v1802_v31  ;;  %v7125_v31 = vld [vmem:[#allocation8 + $0x190] sm:$0xff]   ;;  %v7129_v8 = vld [vmem:[#allocation8 + $0x1d8] sm:$0xff]  }
 0x21b   : > { %6414 = vmatmul.mubr.bf16.gmra.mxu0 %v8206_v48 }
 0x21c   : > { %6417 = vmatprep.mubr.bf16.mxu0 %v8208_v3 }
 0x220   : > { %6370 = vmatmul.mubr.bf16.gmra.mxu1 %v1348_v13  ;;  %v1805_v13 = vld [vmem:[#allocation2 + $0xe2] sm:$0xff] }
 0x221   : > { %6373 = vmatprep.mubr.bf16.mxu1 %v1349_v32  ;;  %v8268_v23 = vpack.c.bf16 %v1805_v13, %v1804_v50  ;;  %v8270_v32 = vpack.c.bf16 %v1807_v18, %v1806_v16  ;;  %v2415_v50 = vld [vmem:[#allocation2 + $0xe1] sm:$0xff]  ;;  %v7131_v16 = vld [vmem:[#allocation8 + $0x180] sm:$0xff]   ;;  %v7132_v18 = vld [vmem:[#allocation8 + $0x1c8] sm:$0xff]  }
 0x223   : > { %6418 = vmatmul.mubr.bf16.gmra.mxu0 %v8220_v54 }
 0x224   : > { %6421 = vmatprep.mubr.bf16.mxu0 %v8222_v4 }
 0x228   : > { %6374 = vmatmul.mubr.bf16.gmra.mxu1 %v1350_v26  ;;  %v1815_v26 = vld [vmem:[#allocation2 + $0x15a] sm:$0xff] }
 0x229   : > { %6441 = vmatprep.mubr.bf16.mxu1 %v1818_v22  ;;  %v1812_v22 = vld [vmem:[#allocation2 + $0x13a] sm:$0xff] }
 0x22a   : > { %v8284_v34 = vpack.c.bf16 %v1813_v25, %v1812_v22  ;;  %v8333_v25 = vpack.c.bf16 %v2419_v61, %v2418_v41  ;;  %v3022_v41 = vld [vmem:[#allocation2 + $0xb0] sm:$0xff] }
 0x22b   : > { %6422 = vmatmul.mubr.bf16.gmra.mxu0 %v8230_v46 }
 0x22c   : > { %6489 = vmatprep.mubr.bf16.mxu0 %v8128_v44  ;;  %v1793_v44 = vld [vmem:[#allocation2 + $0x52] sm:$0xff] }
 0x22d   : > { %v8244_v56 = vpack.c.bf16 %v1793_v44, %v1792_v55  ;;  %v2402_v55 = vld [vmem:[#allocation2 + $0x49] sm:$0xff] }
 0x230   : > { %6442 = vmatmul.mubr.bf16.vlgmr.msra.gmra.mxu1 %v8234_v43 }
 0x231   : > { %6522 = vmatpush3.bf16.msra.mxu1 %v8176_v51  ;;  %6445 = vmatprep.mubr.bf16.mxu1 %v8236_v40  ;;  %v1798_v51 = vld [vmem:[#allocation2 + $0x92] sm:$0xff] }
 0x232   : > { %6523 = vmatprep.subr.bf16.mxu1 %v7103_v29 }
 0x233   : > { %6490 = vmatmul.mubr.bf16.vlgmr.msra.gmra.mxu0 %v8131_v47  ;;  %v7111_v47 = vld [vmem:[#allocation8 + $0x160] sm:$0xff]  }
 0x234   : > { %6493 = vmatprep.mubr.bf16.mxu0 %v8144_v7  ;;  %6570 = vmatpush3.bf16.msra.mxu0 %v8180_v63  ;;  %v7106_v7 = vld [vmem:[#allocation8 + $0x118] sm:$0xff]   ;;  %v1799_v63 = vld [vmem:[#allocation2 + $0x9a] sm:$0xff] }
 0x235   : > { %6524 = vmatpush3.bf16.msra.mxu1 %v7103_v29  ;;  %6571 = vmatprep.subr.bf16.mxu0 %v7108_v49  ;;  %v8254_v19 = vpack.c.bf16 %v1799_v63, %v1798_v51  ;;  %v7121_v51 = vld [vmem:[#allocation8 + $0x1a0] sm:$0xff]   ;;  %v7126_v63 = vld [vmem:[#allocation8 + $0x1e8] sm:$0xff]  }
 0x236   : > { %6525 = vmatprep.subr.bf16.mxu1 %v7104_v6 }
 0x238   : > { %6446 = vmatmul.mubr.bf16.gmra.mxu1 %v8244_v56  ;;  %6572 = vmatpush3.bf16.msra.mxu0 %v7108_v49 }
 0x239   : > { %6449 = vmatprep.mubr.bf16.mxu1 %v8246_v45  ;;  %6526 = vmatpush3.bf16.msra.mxu1 %v7104_v6  ;;  %v2400_v6 = vld [vmem:[#allocation2 + $0x31] sm:$0xff] }
 0x23a   : > { %6527 = vmatprep.subr.bf16.mxu1 %v7105_v1  ;;  %6573 = vmatprep.subr.bf16.mxu0 %v7110_v24 }
 0x23b   : > { %6494 = vmatmul.mubr.bf16.gmra.mxu0 %v8146_v53  ;;  %v7114_v53 = vld [vmem:[#allocation8 + $0x150] sm:$0xff]  }
 0x23c   : > { %6497 = vmatprep.mubr.bf16.mxu0 %v8158_v38  ;;  %6574 = vmatpush3.bf16.msra.mxu0 %v7110_v24  ;;  %v7112_v38 = vld [vmem:[#allocation8 + $0x108] sm:$0xff]  }
 0x23d   : > { %6528 = vmatpush3.bf16.msra.mxu1 %v7105_v1  ;;  %6575 = vmatprep.subr.bf16.mxu0 %v7111_v47  ;;  %v7124_v1 = vld [vmem:[#allocation8 + $0x1f0] sm:$0xff]   ;;  %v7120_v24 = vld [vmem:[#allocation8 + $0x1a8] sm:$0xff]  }
 0x23e   : > { %6529 = vmatprep.subr.bf16.mxu1 %v7106_v7 }
 0x240   : > { %6450 = vmatmul.mubr.bf16.gmra.mxu1 %v8252_v0  ;;  %6576 = vmatpush3.bf16.msra.mxu0 %v7111_v47  ;;  %v2404_v47 = vld [vmem:[#allocation2 + $0x61] sm:$0xff] }
 0x241   : > { %6453 = vmatprep.mubr.bf16.mxu1 %v8254_v19  ;;  %6530 = vmatpush3.bf16.msra.mxu1 %v7106_v7  ;;  %v2405_v7 = vld [vmem:[#allocation2 + $0x69] sm:$0xff] }
 0x242   : > { %6531 = vmatprep.subr.bf16.mxu1 %v7109_v60  ;;  %6577 = vmatprep.subr.bf16.mxu0 %v7113_v10  ;;  %v8307_v59 = vpack.c.bf16 %v2405_v7, %v2404_v47  ;;  %v3015_v47 = vld [vmem:[#allocation2 + $0x60] sm:$0xff] }
 0x243   : > { %6498 = vmatmul.mubr.bf16.gmra.mxu0 %v8160_v27  ;;  %v7117_v27 = vld [vmem:[#allocation8 + $0x140] sm:$0xff]  }
 0x244   : > { %6501 = vmatprep.mubr.bf16.mxu0 %v8172_v58  ;;  %6578 = vmatpush3.bf16.msra.mxu0 %v7113_v10  ;;  %v7118_v58 = vld [vmem:[#allocation8 + $0x1b8] sm:$0xff]   ;;  %v2408_v10 = vld [vmem:[#allocation2 + $0x91] sm:$0xff] }
 0x245   : > { %6532 = vmatpush3.bf16.msra.mxu1 %v7109_v60  ;;  %6579 = vmatprep.subr.bf16.mxu0 %v7114_v53 }
 0x246   : > { %6533 = vmatprep.subr.bf16.mxu1 %v7112_v38 }
 0x248   : > { %6454 = vmatmul.mubr.bf16.gmra.mxu1 %v8260_v9  ;;  %6580 = vmatpush3.bf16.msra.mxu0 %v7114_v53  ;;  %v2409_v53 = vld [vmem:[#allocation2 + $0x99] sm:$0xff] }
 0x249   : > { %6457 = vmatprep.mubr.bf16.mxu1 %v8262_v28  ;;  %6534 = vmatpush3.bf16.msra.mxu1 %v7112_v38  ;;  %v2410_v38 = vld [vmem:[#allocation2 + $0xa9] sm:$0xff]  ;;  %v8315_v30 = vpack.c.bf16 %v2409_v53, %v2408_v10  ;;  %v3017_v10 = vld [vmem:[#allocation2 + $0x78] sm:$0xff]  ;;  %v3018_v53 = vld [vmem:[#allocation2 + $0x80] sm:$0xff] }
 0x24a   : > { %6535 = vmatprep.subr.bf16.mxu1 %v7115_v11  ;;  %6581 = vmatprep.subr.bf16.mxu0 %v7116_v5 }
 0x24b   : > { %6502 = vmatmul.mubr.bf16.gmra.mxu0 %v8174_v62  ;;  %v1808_v62 = vld [vmem:[#allocation2 + $0x10a] sm:$0xff] }
 0x24c   : > { %6505 = vmatprep.mubr.bf16.mxu0 %v8191_v36  ;;  %6582 = vmatpush3.bf16.msra.mxu0 %v7116_v5  ;;  %v1809_v36 = vld [vmem:[#allocation2 + $0x112] sm:$0xff]  ;;  %v2412_v5 = vld [vmem:[#allocation2 + $0xc1] sm:$0xff] }
 0x24d   : > { %6536 = vmatpush3.bf16.msra.mxu1 %v7115_v11  ;;  %6583 = vmatprep.subr.bf16.mxu0 %v7117_v27  ;;  %v8276_v37 = vpack.c.bf16 %v1809_v36, %v1808_v62  ;;  %v8317_v11 = vpack.c.bf16 %v2411_v17, %v2410_v38  ;;  %v2416_v62 = vld [vmem:[#allocation2 + $0xf1] sm:$0xff]  ;;  %v2417_v36 = vld [vmem:[#allocation2 + $0xf9] sm:$0xff] }
 0x24e   : > { %6617 = vmatprep.subr.bf16.mxu1 %v7118_v58  ;;  %v8331_v22 = vpack.c.bf16 %v2417_v36, %v2416_v62  ;;  %v3019_v17 = vld [vmem:[#allocation2 + $0x90] sm:$0xff]  ;;  %v3021_v36 = vld [vmem:[#allocation2 + $0xa8] sm:$0xff] }
 0x250   : > { %6458 = vmatmul.mubr.bf16.gmra.mxu1 %v8268_v23  ;;  %6584 = vmatpush3.bf16.msra.mxu0 %v7117_v27  ;;  %v2413_v27 = vld [vmem:[#allocation2 + $0xc9] sm:$0xff] }
 0x251   : > { %6461 = vmatprep.mubr.bf16.mxu1 %v8270_v32  ;;  %6665 = vmatprep.subr.bf16.mxu0 %v7123_v20  ;;  %v8323_v13 = vpack.c.bf16 %v2413_v27, %v2412_v5  ;;  %v3046_v5 = vpack.c.bf16 %v3018_v53, %v3017_v10  ;;  %v7137_v27 = vld [vmem:[#allocation8 + $0x220] sm:$0xff]  }
 0x253   : > { %6506 = vmatmul.mubr.bf16.gmra.mxu0 %v8194_v2  ;;  %v1814_v2 = vld [vmem:[#allocation2 + $0x152] sm:$0xff] }
 0x254   : > { %6509 = vmatprep.mubr.bf16.mxu0 %v8206_v48  ;;  %v8286_v48 = vpack.c.bf16 %v1815_v26, %v1814_v2  ;;  %v2421_v2 = vld [vmem:[#allocation2 + $0x129] sm:$0xff]  ;;  %v2423_v26 = vld [vmem:[#allocation2 + $0x141] sm:$0xff] }
 0x258   : > { %6462 = vmatmul.mubr.bf16.gmra.mxu1 %v8276_v37 }
 0x259   : > { %6465 = vmatprep.mubr.bf16.mxu1 %v8278_v21 }
 0x25b   : > { %6510 = vmatmul.mubr.bf16.gmra.mxu0 %v8208_v3  ;;  %v2398_v3 = vld [vmem:[#allocation2 + $0x19] sm:$0xff] }
 0x25c   : > { %6513 = vmatprep.mubr.bf16.mxu0 %v8220_v54  ;;  %v2122_v54 = vld [vmem:[#allocation2 + $0x180] sm:$0xff]  ;;  %v2430_v29 = vpack.c.bf16 %v2399_v42, %v2398_v3  ;;  %v2424_v3 = vld [vmem:[#allocation2 + $0x151] sm:$0xff] }
 0x25d   : > { %v8295_v49 = vpack.c.bf16 %v2123_v35, %v2122_v54  ;;  %v2425_v42 = vld [vmem:[#allocation2 + $0x159] sm:$0xff]  ;;  %v2427_v54 = vld [vmem:[#allocation2 + $0x171] sm:$0xff] }
 0x25e   : > { %v8347_v35 = vpack.c.bf16 %v2425_v42, %v2424_v3 }
 0x260   : > { %6466 = vmatmul.mubr.bf16.gmra.mxu1 %v8284_v34 }
 0x261   : > { %6469 = vmatprep.mubr.bf16.mxu1 %v8286_v48 }
 0x263   : > { %6514 = vmatmul.mubr.bf16.gmra.mxu0 %v8222_v4  ;;  %v2401_v4 = vld [vmem:[#allocation2 + $0x39] sm:$0xff] }
 0x264   : > { %6517 = vmatprep.mubr.bf16.mxu0 %v8230_v46  ;;  %v2403_v46 = vld [vmem:[#allocation2 + $0x51] sm:$0xff]  ;;  %v8299_v44 = vpack.c.bf16 %v2401_v4, %v2400_v6  ;;  %v2429_v6 = vld [vmem:[#allocation2 + $0x189] sm:$0xff] }
 0x265   : > { %v8301_v39 = vpack.c.bf16 %v2403_v46, %v2402_v55  ;;  %v3012_v4 = vld [vmem:[#allocation2 + $0x38] sm:$0xff]  ;;  %v2735_v46 = vld [vmem:[#allocation2 + $0x18a] sm:$0xff] }
 0x268   : > { %6470 = vmatmul.mubr.bf16.gmra.mxu1 %v8292_v15 }
 0x269   : > { %6537 = vmatprep.mubr.bf16.mxu1 %v2430_v29  ;;  %v2428_v29 = vld [vmem:[#allocation2 + $0x181] sm:$0xff] }
 0x26a   : > { %v8355_v55 = vpack.c.bf16 %v2429_v6, %v2428_v29 }
 0x26b   : > { %6518 = vmatmul.mubr.bf16.gmra.mxu0 %v8295_v49 }
 0x26c   : > { %6585 = vmatprep.mubr.bf16.mxu0 %v8234_v43  ;;  %v2406_v43 = vld [vmem:[#allocation2 + $0x79] sm:$0xff] }
 0x26d   : > { %v8309_v60 = vpack.c.bf16 %v2407_v14, %v2406_v43  ;;  %v7135_v43 = vld [vmem:[#allocation8 + $0x230] sm:$0xff]  }
 0x270   : > { %6538 = vmatmul.mubr.bf16.vlgmr.msra.gmra.mxu1 %v8299_v44 }
 0x271   : > { %6618 = vmatpush3.bf16.msra.mxu1 %v7118_v58  ;;  %6541 = vmatprep.mubr.bf16.mxu1 %v8301_v39  ;;  %v2414_v58 = vld [vmem:[#allocation2 + $0xd9] sm:$0xff] }
 0x272   : > { %6619 = vmatprep.subr.bf16.mxu1 %v7119_v57 }
 0x273   : > { %6586 = vmatmul.mubr.bf16.vlgmr.msra.gmra.mxu0 %v8236_v40  ;;  %v7127_v40 = vld [vmem:[#allocation8 + $0x1e0] sm:$0xff]  }
 0x274   : > { %6589 = vmatprep.mubr.bf16.mxu0 %v8244_v56  ;;  %6666 = vmatpush3.bf16.msra.mxu0 %v7123_v20  ;;  %v7122_v56 = vld [vmem:[#allocation8 + $0x198] sm:$0xff]   ;;  %v8325_v20 = vpack.c.bf16 %v2415_v50, %v2414_v58 }
 0x275   : > { %6620 = vmatpush3.bf16.msra.mxu1 %v7119_v57  ;;  %6667 = vmatprep.subr.bf16.mxu0 %v7124_v1 }
 0x276   : > { %6621 = vmatprep.subr.bf16.mxu1 %v7120_v24 }
 0x278   : > { %6542 = vmatmul.mubr.bf16.gmra.mxu1 %v8307_v59  ;;  %6668 = vmatpush3.bf16.msra.mxu0 %v7124_v1 }
 0x279   : > { %6545 = vmatprep.mubr.bf16.mxu1 %v8309_v60  ;;  %6622 = vmatpush3.bf16.msra.mxu1 %v7120_v24  ;;  %v3013_v24 = vld [vmem:[#allocation2 + $0x48] sm:$0xff] }
 0x27a   : > { %6623 = vmatprep.subr.bf16.mxu1 %v7121_v51  ;;  %6669 = vmatprep.subr.bf16.mxu0 %v7126_v63 }
 0x27b   : > { %6590 = vmatmul.mubr.bf16.gmra.mxu0 %v8246_v45  ;;  %v7130_v45 = vld [vmem:[#allocation8 + $0x1d0] sm:$0xff]  }
 0x27c   : > { %6593 = vmatprep.mubr.bf16.mxu0 %v8252_v0  ;;  %6670 = vmatpush3.bf16.msra.mxu0 %v7126_v63  ;;  %v7128_v0 = vld [vmem:[#allocation8 + $0x188] sm:$0xff]  }
 0x27d   : > { %6624 = vmatpush3.bf16.msra.mxu1 %v7121_v51  ;;  %6671 = vmatprep.subr.bf16.mxu0 %v7127_v40 }
 0x27e   : > { %6625 = vmatprep.subr.bf16.mxu1 %v7122_v56 }
 0x280   : > { %6546 = vmatmul.mubr.bf16.gmra.mxu1 %v8315_v30  ;;  %6672 = vmatpush3.bf16.msra.mxu0 %v7127_v40  ;;  %v7136_v40 = vld [vmem:[#allocation8 + $0x228] sm:$0xff]  }
 0x281   : > { %6549 = vmatprep.mubr.bf16.mxu1 %v8317_v11  ;;  %6626 = vmatpush3.bf16.msra.mxu1 %v7122_v56 }
 0x282   : > { %6627 = vmatprep.subr.bf16.mxu1 %v7125_v31  ;;  %6673 = vmatprep.subr.bf16.mxu0 %v7129_v8 }
 0x283   : > { %6594 = vmatmul.mubr.bf16.gmra.mxu0 %v8254_v19  ;;  %v7133_v19 = vld [vmem:[#allocation8 + $0x1c0] sm:$0xff]  }
 0x284   : > { %6597 = vmatprep.mubr.bf16.mxu0 %v8260_v9  ;;  %6674 = vmatpush3.bf16.msra.mxu0 %v7129_v8  ;;  %v7134_v9 = vld [vmem:[#allocation8 + $0x238] sm:$0xff]  }
 0x285   : > { %6628 = vmatpush3.bf16.msra.mxu1 %v7125_v31  ;;  %6675 = vmatprep.subr.bf16.mxu0 %v7130_v45  ;;  %v3020_v31 = vld [vmem:[#allocation2 + $0x98] sm:$0xff] }
 0x286   : > { %6629 = vmatprep.subr.bf16.mxu1 %v7128_v0  ;;  %v3047_v50 = vpack.c.bf16 %v3020_v31, %v3019_v17 }
 0x288   : > { %6550 = vmatmul.mubr.bf16.gmra.mxu1 %v8323_v13  ;;  %6676 = vmatpush3.bf16.msra.mxu0 %v7130_v45 }
 0x289   : > { %6553 = vmatprep.mubr.bf16.mxu1 %v8325_v20  ;;  %6630 = vmatpush3.bf16.msra.mxu1 %v7128_v0 }
 0x28a   : > { %6631 = vmatprep.subr.bf16.mxu1 %v7131_v16  ;;  %6677 = vmatprep.subr.bf16.mxu0 %v7132_v18 }
 0x28b   : > { %6598 = vmatmul.mubr.bf16.gmra.mxu0 %v8262_v28  ;;  %v2420_v28 = vld [vmem:[#allocation2 + $0x121] sm:$0xff] }
 0x28c   : > { %6601 = vmatprep.mubr.bf16.mxu0 %v8268_v23  ;;  %6678 = vmatpush3.bf16.msra.mxu0 %v7132_v18  ;;  %v2422_v23 = vld [vmem:[#allocation2 + $0x139] sm:$0xff]  ;;  %v8339_v52 = vpack.c.bf16 %v2421_v2, %v2420_v28 }
 0x28d   : > { %6632 = vmatpush3.bf16.msra.mxu1 %v7131_v16  ;;  %6679 = vmatprep.subr.bf16.mxu0 %v7133_v19  ;;  %v8341_v33 = vpack.c.bf16 %v2423_v26, %v2422_v23  ;;  %v3023_v2 = vld [vmem:[#allocation2 + $0xc0] sm:$0xff]  ;;  %v3024_v23 = vld [vmem:[#allocation2 + $0xc8] sm:$0xff] }
 0x28e   : > { %6713 = vmatprep.subr.bf16.mxu1 %v7134_v9  ;;  %v3049_v6 = vpack.c.bf16 %v3024_v23, %v3023_v2 }
 0x290   : > { %6554 = vmatmul.mubr.bf16.gmra.mxu1 %v8331_v22  ;;  %6680 = vmatpush3.bf16.msra.mxu0 %v7133_v19 }
 0x291   : > { %6557 = vmatprep.mubr.bf16.mxu1 %v8333_v25 }
 0x293   : > { %6602 = vmatmul.mubr.bf16.gmra.mxu0 %v8270_v32  ;;  %v2426_v32 = vld [vmem:[#allocation2 + $0x169] sm:$0xff] }
 0x294   : > { %6605 = vmatprep.mubr.bf16.mxu0 %v8276_v37  ;;  %v8349_v37 = vpack.c.bf16 %v2427_v54, %v2426_v32  ;;  %v3048_v32 = vpack.c.bf16 %v3022_v41, %v3021_v36  ;;  %v7139_v54 = vld [vmem:[#allocation8 + $0x210] sm:$0xff]  }
 0x295   : > { %v8398_v36 = vld [vmem:[#allocation2] sm:$0xff] }
 0x298   : > { %6558 = vmatmul.mubr.bf16.gmra.mxu1 %v8339_v52 }
 0x299   : > { %6561 = vmatprep.mubr.bf16.mxu1 %v8341_v33 }
 0x29b   : > { %6606 = vmatmul.mubr.bf16.gmra.mxu0 %v8278_v21  ;;  %v3011_v21 = vld [vmem:[#allocation2 + $0x30] sm:$0xff] }
 0x29c   : > { %6609 = vmatprep.mubr.bf16.mxu0 %v8284_v34  ;;  %v2734_v34 = vld [vmem:[#allocation2 + $0x182] sm:$0xff]  ;;  %v3043_v57 = vpack.c.bf16 %v3012_v4, %v3011_v21 }
 0x29d   : > { %v8358_v1 = vpack.c.bf16 %v2735_v46, %v2734_v34  ;;  %v7140_v46 = vld [vmem:[#allocation8 + $0x208] sm:$0xff]  }
 0x2a0   : > { %6562 = vmatmul.mubr.bf16.gmra.mxu1 %v8347_v35 }
 0x2a1   : > { %6565 = vmatprep.mubr.bf16.mxu1 %v8349_v37 }
 0x2a3   : > { %6610 = vmatmul.mubr.bf16.gmra.mxu0 %v8286_v48  ;;  %v3014_v48 = vld [vmem:[#allocation2 + $0x50] sm:$0xff] }
 0x2a4   : > { %6613 = vmatprep.mubr.bf16.mxu0 %v8292_v15  ;;  %v3016_v15 = vld [vmem:[#allocation2 + $0x68] sm:$0xff]  ;;  %v3044_v7 = vpack.c.bf16 %v3014_v48, %v3013_v24  ;;  %v3025_v24 = vld [vmem:[#allocation2 + $0xd8] sm:$0xff]  ;;  %v3026_v48 = vld [vmem:[#allocation2 + $0xe0] sm:$0xff] }
 0x2a5   : > { %v3045_v14 = vpack.c.bf16 %v3016_v15, %v3015_v47 }
 0x2a8   : > { %6566 = vmatmul.mubr.bf16.gmra.mxu1 %v8355_v55 }
 0x2a9   : > { %6633 = vmatprep.mubr.bf16.mxu1 %v3043_v57 }
 0x2ab   : > { %6614 = vmatmul.mubr.bf16.gmra.mxu0 %v8358_v1 }
 0x2ac   : > { %6681 = vmatprep.mubr.bf16.mxu0 %v8299_v44 }
 0x2b0   : > { %v6347_v51 = vpop.f32.mrf.mxu1  ;;  %6634 = vmatmul.mubr.bf16.vlgmr.msra.gmra.mxu1 %v3044_v7  ;;  %v3027_v7 = vld [vmem:[#allocation2 + $0xf0] sm:$0xff] }
 0x2b1   : > { %6714 = vmatpush3.bf16.msra.mxu1 %v7134_v9  ;;  %6637 = vmatprep.mubr.bf16.mxu1 %v3045_v14  ;;  %v7138_v9 = vld [vmem:[#allocation8 + $0x218] sm:$0xff]  }
 0x2b2   : > { %v1450_v63 = vpop.f32.mrf.mxu1  ;;  %6715 = vmatprep.subr.bf16.mxu1 %v7135_v43 }
 0x2b3   : > { %v6395_v56 = vpop.f32.mrf.mxu0  ;;  %6682 = vmatmul.mubr.bf16.vlgmr.msra.gmra.mxu0 %v8301_v39 }
 0x2b4   : > { %v8363_v38 = vadd.f32 %v6395_v56, %v6347_v51  ;;  %6685 = vmatprep.mubr.bf16.mxu0 %v8307_v59  ;;  %v6348_v44 = vpop.f32.mrf.mxu1  ;;  %v7141_v56 = vld [vmem:[#allocation8 + $0x200] sm:$0xff]  }
 0x2b5   : > { %v1659_v8 = vpop.f32.mrf.mxu0  ;;  %6716 = vmatpush3.bf16.msra.mxu1 %v7135_v43  ;;  %v3028_v43 = vld [vmem:[#allocation2 + $0xf8] sm:$0xff] }
 0x2b6   : > { %v8366_v45 = vadd.f32 %v1659_v8, %v1450_v63  ;;  %v1453_v0 = vpop.f32.mrf.mxu1  ;;  %6717 = vmatprep.subr.bf16.mxu1 %v7136_v40  ;;  %v3051_v53 = vpack.c.bf16 %v3028_v43, %v3027_v7 }
 0x2b7   : > { %v6396_v58 = vpop.f32.mrf.mxu0 }
 0x2b8   : > { %v8368_v39 = vadd.f32 %v6396_v58, %v6348_v44  ;;  %v6351_v16 = vpop.f32.mrf.mxu1  ;;  %6638 = vmatmul.mubr.bf16.gmra.mxu1 %v3046_v5  ;;  %v3030_v5 = vld [vmem:[#allocation2 + $0x110] sm:$0xff] }
 0x2b9   : > { %v1662_v18 = vpop.f32.mrf.mxu0  ;;  %6641 = vmatprep.mubr.bf16.mxu1 %v3047_v50  ;;  %6718 = vmatpush3.bf16.msra.mxu1 %v7136_v40  ;;  %v3050_v40 = vpack.c.bf16 %v3026_v48, %v3025_v24  ;;  %v3031_v50 = vld [vmem:[#allocation2 + $0x120] sm:$0xff] }
 0x2ba   : > { %v8370_v59 = vadd.f32 %v1662_v18, %v1453_v0  ;;  %v1466_v19 = vpop.f32.mrf.mxu1  ;;  %6719 = vmatprep.subr.bf16.mxu1 %v7137_v27  ;;  %v3029_v0 = vld [vmem:[#allocation2 + $0x108] sm:$0xff] }
 0x2bb   : > { %v6399_v62 = vpop.f32.mrf.mxu0  ;;  %6686 = vmatmul.mubr.bf16.gmra.mxu0 %v8309_v60 }
 0x2bc   : > { %v8373_v61 = vadd.f32 %v6399_v62, %v6351_v16  ;;  %6689 = vmatprep.mubr.bf16.mxu0 %v8315_v30  ;;  %v6352_v28 = vpop.f32.mrf.mxu1  ;;  %v3032_v16 = vld [vmem:[#allocation2 + $0x128] sm:$0xff]  ;;  %v3052_v62 = vpack.c.bf16 %v3030_v5, %v3029_v0 }
 0x2bd   : > { %v1675_v26 = vpop.f32.mrf.mxu0  ;;  %6720 = vmatpush3.bf16.msra.mxu1 %v7137_v27  ;;  %v3053_v41 = vpack.c.bf16 %v3032_v16, %v3031_v50 }
 0x2be   : > { %v8376_v3 = vadd.f32 %v1675_v26, %v1466_v19  ;;  %v1469_v42 = vpop.f32.mrf.mxu1  ;;  %6721 = vmatprep.subr.bf16.mxu1 %v7138_v9 }
 0x2bf   : > { %v6400_v29 = vpop.f32.mrf.mxu0 }
 0x2c0   : > { %v8378_v60 = vadd.f32 %v6400_v29, %v6352_v28  ;;  %v6355_v21 = vpop.f32.mrf.mxu1  ;;  %6642 = vmatmul.mubr.bf16.gmra.mxu1 %v3048_v32  ;;  %v3033_v32 = vld [vmem:[#allocation2 + $0x138] sm:$0xff] }
 0x2c1   : > { %v1678_v4 = vpop.f32.mrf.mxu0  ;;  %6645 = vmatprep.mubr.bf16.mxu1 %v3049_v6  ;;  %6722 = vmatpush3.bf16.msra.mxu1 %v7138_v9 }
 0x2c2   : > { %v8380_v30 = vadd.f32 %v1678_v4, %v1469_v42  ;;  %v1482_v34 = vpop.f32.mrf.mxu1  ;;  %6723 = vmatprep.subr.bf16.mxu1 %v7139_v54  ;;  %v3036_v4 = vld [vmem:[#allocation2 + $0x158] sm:$0xff] }
 0x2c3   : > { %v6403_v57 = vpop.f32.mrf.mxu0  ;;  %6690 = vmatmul.mubr.bf16.gmra.mxu0 %v8317_v11 }
 0x2c4   : > { %v8383_v47 = vadd.f32 %v6403_v57, %v6355_v21  ;;  %6693 = vmatprep.mubr.bf16.mxu0 %v8323_v13  ;;  %v6356_v15 = vpop.f32.mrf.mxu1  ;;  %v3035_v21 = vld [vmem:[#allocation2 + $0x150] sm:$0xff] }
 0x2c5   : > { %v1691_v14 = vpop.f32.mrf.mxu0  ;;  %6724 = vmatpush3.bf16.msra.mxu1 %v7139_v54  ;;  %v3034_v54 = vld [vmem:[#allocation2 + $0x140] sm:$0xff] }
 0x2c6   : > { %v8386_v51 = vadd.f32 %v1691_v14, %v1482_v34  ;;  %v1485_v63 = vpop.f32.mrf.mxu1  ;;  %6725 = vmatprep.subr.bf16.mxu1 %v7140_v46  ;;  %v3054_v24 = vpack.c.bf16 %v3034_v54, %v3033_v32 }
 0x2c7   : > { %v6404_v10 = vpop.f32.mrf.mxu0 }
 0x2c8   : > { %v8388_v11 = vadd.f32 %v6404_v10, %v6356_v15  ;;  %v6359_v44 = vpop.f32.mrf.mxu1  ;;  %6646 = vmatmul.mubr.bf16.gmra.mxu1 %v3050_v40  ;;  %v3055_v15 = vpack.c.bf16 %v3036_v4, %v3035_v21  ;;  %v3038_v40 = vld [vmem:[#allocation2 + $0x170] sm:$0xff] }
 0x2c9   : > { %v1694_v17 = vpop.f32.mrf.mxu0  ;;  %6649 = vmatprep.mubr.bf16.mxu1 %v3051_v53  ;;  %6726 = vmatpush3.bf16.msra.mxu1 %v7140_v46  ;;  %v3625_v21 = vld [vmem:[#allocation2 + $0x4a] sm:$0xff]  ;;  %v3626_v4 = vld [vmem:[#allocation2 + $0x52] sm:$0xff] }
 0x2ca   : > { %v8390_v13 = vadd.f32 %v1694_v17, %v1485_v63  ;;  %v1498_v31 = vpop.f32.mrf.mxu1  ;;  %6727 = vmatprep.subr.bf16.mxu1 %v7141_v56  ;;  %v3037_v63 = vld [vmem:[#allocation2 + $0x168] sm:$0xff] }
 0x2cb   : > { %v6407_v8 = vpop.f32.mrf.mxu0  ;;  %6694 = vmatmul.mubr.bf16.gmra.mxu0 %v8325_v20 }
 0x2cc   : > { %v8393_v27 = vadd.f32 %v6407_v8, %v6359_v44  ;;  %6697 = vmatprep.mubr.bf16.mxu0 %v8331_v22  ;;  %v6360_v58 = vpop.f32.mrf.mxu1 }
 0x2cd   : > { %v1707_v18 = vpop.f32.mrf.mxu0  ;;  %6728 = vmatpush3.bf16.msra.mxu1 %v7141_v56 }
 0x2ce   : > { %v8396_v19 = vadd.f32 %v1707_v18, %v1498_v31  ;;  %v1501_v9 = vpop.f32.mrf.mxu1  ;;  %6809 = vmatprep.subr.mxu1 %v8398_v36  ;;  %v3056_v31 = vpack.c.bf16 %v3038_v40, %v3037_v63  ;;  %v3656_v63 = vpack.c.bf16 %v3626_v4, %v3625_v21 }
 0x2cf   : > { %v6408_v20 = vpop.f32.mrf.mxu0 }
 0x2d0   : > { %v8401_v28 = vadd.f32 %v6408_v20, %v6360_v58  ;;  %v6363_v2 = vpop.f32.mrf.mxu1  ;;  %6650 = vmatmul.mubr.bf16.gmra.mxu1 %v3052_v62  ;;  %v3624_v62 = vld [vmem:[#allocation2 + $0x3a] sm:$0xff] }
 0x2d1   : > { %v1710_v22 = vpop.f32.mrf.mxu0  ;;  %6653 = vmatprep.mubr.bf16.mxu1 %v3053_v41  ;;  %v3347_v20 = vld [vmem:[#allocation2 + $0x199] sm:$0xff]  ;;  %v3348_v41 = vld [vmem:[#allocation2 + $0x1a1] sm:$0xff] }
 0x2d2   : > { %v8403_v23 = vadd.f32 %v1710_v22, %v1501_v9  ;;  %v1514_v26 = vpop.f32.mrf.mxu1  ;;  %v3058_v9 = vpack.c.bf16 %v8398_v36, %v8398_v36 }
 0x2d3   : > { %v6411_v42 = vpop.f32.mrf.mxu0  ;;  %6698 = vmatmul.mubr.bf16.gmra.mxu0 %v8333_v25 }
 0x2d4   : > { %v8406_v29 = vadd.f32 %v6411_v42, %v6363_v2  ;;  %6701 = vmatprep.mubr.bf16.mxu0 %v8339_v52  ;;  %v6364_v6 = vpop.f32.mrf.mxu1 }
 0x2d5   : > { %v1723_v34 = vpop.f32.mrf.mxu0 }
 0x2d6   : > { %v8409_v46 = vadd.f32 %v1723_v34, %v1514_v26  ;;  %v8411_v57 = vpop.f32.mrf.mxu1 }
 0x2d7   : > { %v6412_v48 = vpop.f32.mrf.mxu0 }
 0x2d8   : > { %v8413_v7 = vadd.f32 %v6412_v48, %v6364_v6  ;;  %v6367_v25 = vpop.f32.mrf.mxu1  ;;  %6654 = vmatmul.mubr.bf16.gmra.mxu1 %v3054_v24  ;;  %v3627_v48 = vld [vmem:[#allocation2 + $0x62] sm:$0xff] }
 0x2d9   : > { %v8415_v43 = vpop.f32.mrf.mxu0  ;;  %6657 = vmatprep.mubr.bf16.mxu1 %v3055_v15  ;;  %v3628_v15 = vld [vmem:[#allocation2 + $0x6a] sm:$0xff] }
 0x2da   : > { %v1530_v14 = vpop.f32.mrf.mxu1 }
 0x2db   : > { %v6415_v52 = vpop.f32.mrf.mxu0  ;;  %6702 = vmatmul.mubr.bf16.gmra.mxu0 %v8341_v33 }
 0x2dc   : > { %v8418_v56 = vadd.f32 %v6415_v52, %v6367_v25  ;;  %6705 = vmatprep.mubr.bf16.mxu0 %v8347_v35  ;;  %v6368_v10 = vpop.f32.mrf.mxu1  ;;  %v3623_v35 = vld [vmem:[#allocation2 + $0x32] sm:$0xff] }
 0x2dd   : > { %v1739_v53 = vpop.f32.mrf.mxu0  ;;  %v3655_v42 = vpack.c.bf16 %v3624_v62, %v3623_v35 }
 0x2de   : > { %v8421_v44 = vadd.f32 %v1739_v53, %v1530_v14  ;;  %v8423_v17 = vpop.f32.mrf.mxu1 }
 0x2df   : > { %v6416_v8 = vpop.f32.mrf.mxu0 }
 0x2e0   : > { %v8425_v0 = vadd.f32 %v6416_v8, %v6368_v10  ;;  %v6371_v5 = vpop.f32.mrf.mxu1  ;;  %6658 = vmatmul.mubr.bf16.gmra.mxu1 %v3056_v31  ;;  %v3657_v10 = vpack.c.bf16 %v3628_v15, %v3627_v48 }
 0x2e1   : > { %v8427_v58 = vpop.f32.mrf.mxu0  ;;  %6661 = vmatprep.mubr.bf16.mxu1 %v8295_v49 }
 0x2e2   : > { %v1546_v33 = vpop.f32.mrf.mxu1 }
 0x2e3   : > { %v6419_v50 = vpop.f32.mrf.mxu0  ;;  %6706 = vmatmul.mubr.bf16.gmra.mxu0 %v8349_v37  ;;  %v3364_v37 = vpack.c.bf16 %v3348_v41, %v3347_v20  ;;  %v3631_v41 = vld [vmem:[#allocation2 + $0x92] sm:$0xff] }
 0x2e4   : > { %v8431_v16 = vadd.f32 %v6419_v50, %v6371_v5  ;;  %6709 = vmatprep.mubr.bf16.mxu0 %v8355_v55  ;;  %v6372_v18 = vpop.f32.mrf.mxu1 }
 0x2e5   : > { %v1755_v2 = vpop.f32.mrf.mxu0 }
 0x2e6   : > { %v8436_v22 = vadd.f32 %v1755_v2, %v1546_v33  ;;  %v8438_v49 = vpop.f32.mrf.mxu1  ;;  %v3632_v2 = vld [vmem:[#allocation2 + $0x9a] sm:$0xff] }
 0x2e7   : > { %v6420_v26 = vpop.f32.mrf.mxu0  ;;  %v3659_v21 = vpack.c.bf16 %v3632_v2, %v3631_v41 }
 0x2e8   : > { %v8440_v32 = vadd.f32 %v6420_v26, %v6372_v18  ;;  %v6375_v54 = vpop.f32.mrf.mxu1  ;;  %6662 = vmatmul.mubr.bf16.gmra.mxu1 %v3058_v9  ;;  %v3629_v18 = vld [vmem:[#allocation2 + $0x7a] sm:$0xff]  ;;  %v3630_v9 = vld [vmem:[#allocation2 + $0x82] sm:$0xff] }
 0x2e9   : > { %v8442_v55 = vpop.f32.mrf.mxu0  ;;  %6729 = vmatprep.mubr.bf16.mxu1 %v3655_v42 }
 0x2ea   : > { %v1562_v6 = vpop.f32.mrf.mxu1 }
 0x2eb   : > { %v6423_v36 = vpop.f32.mrf.mxu0  ;;  %6710 = vmatmul.mubr.bf16.gmra.mxu0 %v3364_v37 }
 0x2ec   : > { %v8444_v34 = vadd.f32 %v6423_v36, %v6375_v54  ;;  %v6376_v24 = vpop.f32.mrf.mxu1 }
 0x2ed   : > { %v1771_v25 = vpop.f32.mrf.mxu0 }
 0x2ee   : > { %v8446_v14 = vadd.f32 %v1771_v25, %v1562_v6  ;;  %v8448_v52 = vpop.f32.mrf.mxu1  ;;  %v3658_v6 = vpack.c.bf16 %v3630_v9, %v3629_v18 }
 0x2ef   : > { %v6424_v40 = vpop.f32.mrf.mxu0 }
 0x2f0   : > { %v8450_v53 = vadd.f32 %v6424_v40, %v6376_v24  ;;  %v6443_v31 = vpop.f32.mrf.mxu1  ;;  %6730 = vmatmul.mubr.bf16.vlgmr.msra.gmra.mxu1 %v3656_v63  ;;  %v3633_v63 = vld [vmem:[#allocation2 + $0xaa] sm:$0xff]  ;;  %v3634_v40 = vld [vmem:[#allocation2 + $0xb2] sm:$0xff] }
 0x2f1   : > { %v8452_v8 = vpop.f32.mrf.mxu0  ;;  %v2062_v5 = vadd.f32 %v6443_v31, %v8363_v38  ;;  %6733 = vmatprep.mubr.bf16.mxu1 %v3657_v10  ;;  %v3635_v31 = vld [vmem:[#allocation2 + $0xc2] sm:$0xff]  ;;  %v3660_v9 = vpack.c.bf16 %v3634_v40, %v3633_v63 }
 0x2f2   : > { %v1933_v33 = vpop.f32.mrf.mxu1 }
 0x2f3   : > { %v6491_v50 = vpop.f32.mrf.mxu0  ;;  %v2060_v35 = vadd.f32 %v1933_v33, %v8366_v45 }
 0x2f4   : > { %v8456_v62 = vadd.f32 %v6491_v50, %v2062_v5  ;;  %v6444_v20 = vpop.f32.mrf.mxu1  ;;  %v3636_v5 = vld [vmem:[#allocation2 + $0xca] sm:$0xff] }
 0x2f5   : > { %v2239_v26 = vpop.f32.mrf.mxu0  ;;  %v2063_v42 = vadd.f32 %v6444_v20, %v8368_v39  ;;  %v3661_v41 = vpack.c.bf16 %v3636_v5, %v3635_v31 }
 0x2f6   : > { %v8459_v37 = vadd.f32 %v2239_v26, %v2060_v35  ;;  %v1936_v54 = vpop.f32.mrf.mxu1 }
 0x2f7   : > { %v6492_v38 = vpop.f32.mrf.mxu0  ;;  %v8462_v36 = vadd.f32 %v1936_v54, %v8370_v59 }
 0x2f8   : > { %v8464_v45 = vadd.f32 %v6492_v38, %v2063_v42  ;;  %v6447_v4 = vpop.f32.mrf.mxu1  ;;  %6734 = vmatmul.mubr.bf16.gmra.mxu1 %v3658_v6  ;;  %v3637_v38 = vld [vmem:[#allocation2 + $0xda] sm:$0xff] }
 0x2f9   : > { %v8466_v24 = vpop.f32.mrf.mxu0  ;;  %v2066_v48 = vadd.f32 %v6447_v4, %v8373_v61  ;;  %6737 = vmatprep.mubr.bf16.mxu1 %v3659_v21  ;;  %v3638_v21 = vld [vmem:[#allocation2 + $0xe2] sm:$0xff] }
 0x2fa   : > { %v1949_v15 = vpop.f32.mrf.mxu1 }
 0x2fb   : > { %v6495_v39 = vpop.f32.mrf.mxu0  ;;  %v2064_v25 = vadd.f32 %v1949_v15, %v8376_v3  ;;  %v3640_v15 = vld [vmem:[#allocation2 + $0xfa] sm:$0xff] }
 0x2fc   : > { %v8470_v10 = vadd.f32 %v6495_v39, %v2066_v48  ;;  %v6448_v59 = vpop.f32.mrf.mxu1  ;;  %v3639_v48 = vld [vmem:[#allocation2 + $0xf2] sm:$0xff] }
 0x2fd   : > { %v2255_v33 = vpop.f32.mrf.mxu0  ;;  %v2067_v50 = vadd.f32 %v6448_v59, %v8378_v60  ;;  %v3662_v59 = vpack.c.bf16 %v3638_v21, %v3637_v38  ;;  %v3663_v5 = vpack.c.bf16 %v3640_v15, %v3639_v48 }
 0x2fe   : > { %v8473_v35 = vadd.f32 %v2255_v33, %v2064_v25  ;;  %v1952_v18 = vpop.f32.mrf.mxu1 }
 0x2ff   : > { %v6496_v61 = vpop.f32.mrf.mxu0  ;;  %v8476_v20 = vadd.f32 %v1952_v18, %v8380_v30 }
 0x300   : > { %v8478_v3 = vadd.f32 %v6496_v61, %v2067_v50  ;;  %v6451_v2 = vpop.f32.mrf.mxu1  ;;  %6738 = vmatmul.mubr.bf16.gmra.mxu1 %v3660_v9 }
 0x301   : > { %v8480_v26 = vpop.f32.mrf.mxu0  ;;  %v2070_v42 = vadd.f32 %v6451_v2, %v8383_v47  ;;  %6741 = vmatprep.mubr.bf16.mxu1 %v3661_v41  ;;  %v3641_v41 = vld [vmem:[#allocation2 + $0x10a] sm:$0xff]  ;;  %v3642_v2 = vld [vmem:[#allocation2 + $0x112] sm:$0xff] }
 0x302   : > { %v1965_v54 = vpop.f32.mrf.mxu1  ;;  %v3664_v48 = vpack.c.bf16 %v3642_v2, %v3641_v41 }
 0x303   : > { %v6499_v60 = vpop.f32.mrf.mxu0  ;;  %v2068_v6 = vadd.f32 %v1965_v54, %v8386_v51  ;;  %v3643_v54 = vld [vmem:[#allocation2 + $0x122] sm:$0xff] }
 0x304   : > { %v8484_v4 = vadd.f32 %v6499_v60, %v2070_v42  ;;  %v6452_v30 = vpop.f32.mrf.mxu1  ;;  %v3644_v60 = vld [vmem:[#allocation2 + $0x12a] sm:$0xff] }
 0x305   : > { %v2271_v39 = vpop.f32.mrf.mxu0  ;;  %v2071_v25 = vadd.f32 %v6452_v30, %v8388_v11 }
 0x306   : > { %v8487_v63 = vadd.f32 %v2271_v39, %v2068_v6  ;;  %v1968_v40 = vpop.f32.mrf.mxu1  ;;  %v3665_v39 = vpack.c.bf16 %v3644_v60, %v3643_v54 }
 0x307   : > { %v6500_v47 = vpop.f32.mrf.mxu0  ;;  %v8490_v31 = vadd.f32 %v1968_v40, %v8390_v13 }
 0x308   : > { %v8492_v51 = vadd.f32 %v6500_v47, %v2071_v25  ;;  %v6455_v33 = vpop.f32.mrf.mxu1  ;;  %6742 = vmatmul.mubr.bf16.gmra.mxu1 %v3662_v59 }
 0x309   : > { %v8494_v50 = vpop.f32.mrf.mxu0  ;;  %v2074_v18 = vadd.f32 %v6455_v33, %v8393_v27  ;;  %6745 = vmatprep.mubr.bf16.mxu1 %v3663_v5  ;;  %v3645_v5 = vld [vmem:[#allocation2 + $0x13a] sm:$0xff]  ;;  %v3646_v33 = vld [vmem:[#allocation2 + $0x142] sm:$0xff] }
 0x30a   : > { %v1981_v9 = vpop.f32.mrf.mxu1 }
 0x30b   : > { %v6503_v11 = vpop.f32.mrf.mxu0  ;;  %v2072_v61 = vadd.f32 %v1981_v9, %v8396_v19 }
 0x30c   : > { %v8498_v42 = vadd.f32 %v6503_v11, %v2074_v18  ;;  %v6456_v13 = vpop.f32.mrf.mxu1  ;;  %v3647_v11 = vld [vmem:[#allocation2 + $0x152] sm:$0xff] }
 0x30d   : > { %v2287_v6 = vpop.f32.mrf.mxu0  ;;  %v2075_v38 = vadd.f32 %v6456_v13, %v8401_v28 }
 0x30e   : > { %v8501_v21 = vadd.f32 %v2287_v6, %v2072_v61  ;;  %v1984_v30 = vpop.f32.mrf.mxu1  ;;  %v3648_v61 = vld [vmem:[#allocation2 + $0x15a] sm:$0xff] }
 0x30f   : > { %v6504_v27 = vpop.f32.mrf.mxu0  ;;  %v8504_v15 = vadd.f32 %v1984_v30, %v8403_v23  ;;  %v3667_v6 = vpack.c.bf16 %v3648_v61, %v3647_v11 }
 0x310   : > { %v8506_v19 = vadd.f32 %v6504_v27, %v2075_v38  ;;  %v6459_v25 = vpop.f32.mrf.mxu1  ;;  %6746 = vmatmul.mubr.bf16.gmra.mxu1 %v3664_v48 }
 0x311   : > { %v8508_v40 = vpop.f32.mrf.mxu0  ;;  %v2078_v59 = vadd.f32 %v6459_v25, %v8406_v29  ;;  %6749 = vmatprep.mubr.bf16.mxu1 %v3665_v39  ;;  %v3666_v29 = vpack.c.bf16 %v3646_v33, %v3645_v5  ;;  %v3649_v25 = vld [vmem:[#allocation2 + $0x16a] sm:$0xff] }
 0x312   : > { %v1997_v47 = vpop.f32.mrf.mxu1 }
 0x313   : > { %v6507_v28 = vpop.f32.mrf.mxu0  ;;  %v2076_v9 = vadd.f32 %v1997_v47, %v8409_v46 }
 0x314   : > { %v8511_v18 = vadd.f32 %v6507_v28, %v2078_v59  ;;  %v6460_v23 = vpop.f32.mrf.mxu1  ;;  %v3650_v59 = vld [vmem:[#allocation2 + $0x172] sm:$0xff] }
 0x315   : > { %v2303_v41 = vpop.f32.mrf.mxu0  ;;  %v2079_v2 = vadd.f32 %v6460_v23, %v8413_v7  ;;  %v3668_v11 = vpack.c.bf16 %v3650_v59, %v3649_v25 }
 0x316   : > { %v8515_v13 = vadd.f32 %v2303_v41, %v2076_v9  ;;  %v8517_v54 = vpop.f32.mrf.mxu1 }
 0x317   : > { %v6508_v60 = vpop.f32.mrf.mxu0 }
 0x318   : > { %v8519_v38 = vadd.f32 %v6508_v60, %v2079_v2  ;;  %v6463_v30 = vpop.f32.mrf.mxu1  ;;  %6750 = vmatmul.mubr.bf16.gmra.mxu1 %v3666_v29  ;;  %v3653_v29 = vld [vmem:[#allocation2 + $0x19a] sm:$0xff]  ;;  %v3654_v60 = vld [vmem:[#allocation2 + $0x1a2] sm:$0xff] }
 0x319   : > { %v8521_v48 = vpop.f32.mrf.mxu0  ;;  %v2082_v46 = vadd.f32 %v6463_v30, %v8418_v56  ;;  %6753 = vmatprep.mubr.bf16.mxu1 %v3667_v6 }
 0x31a   : > { %v2013_v27 = vpop.f32.mrf.mxu1 }
 0x31b   : > { %v6511_v39 = vpop.f32.mrf.mxu0  ;;  %v2080_v7 = vadd.f32 %v2013_v27, %v8421_v44 }
 0x31c   : > { %v8525_v47 = vadd.f32 %v6511_v39, %v2082_v46  ;;  %v6464_v28 = vpop.f32.mrf.mxu1  ;;  %v3670_v39 = vpack.c.bf16 %v3654_v60, %v3653_v29  ;;  %v1775_v29 = vadd.f32 %v8452_v8, %v8448_v52 }
 0x31d   : > { %v2319_v5 = vpop.f32.mrf.mxu0  ;;  %v2083_v33 = vadd.f32 %v6464_v28, %v8425_v0 }
 0x31e   : > { %v8528_v9 = vadd.f32 %v2319_v5, %v2080_v7  ;;  %v8530_v23 = vpop.f32.mrf.mxu1  ;;  %v1759_v7 = vadd.f32 %v8442_v55, %v8438_v49 }
 0x31f   : > { %v6512_v61 = vpop.f32.mrf.mxu0 }
 0x320   : > { %v8532_v56 = vadd.f32 %v6512_v61, %v2083_v33  ;;  %v6467_v41 = vpop.f32.mrf.mxu1  ;;  %6754 = vmatmul.mubr.bf16.gmra.mxu1 %v3668_v11 }
 0x321   : > { %v8534_v2 = vpop.f32.mrf.mxu0  ;;  %v2086_v44 = vadd.f32 %v6467_v41, %v8431_v16  ;;  %6757 = vmatprep.mubr.bf16.mxu1 %v8358_v1 }
 0x322   : > { %v2029_v6 = vpop.f32.mrf.mxu1 }
 0x323   : > { %v6515_v0 = vpop.f32.mrf.mxu0  ;;  %v2084_v30 = vadd.f32 %v2029_v6, %v8436_v22 }
 0x324   : > { %v8539_v46 = vadd.f32 %v6515_v0, %v2086_v44  ;;  %v6468_v27 = vpop.f32.mrf.mxu1 }
 0x325   : > { %v2335_v25 = vpop.f32.mrf.mxu0  ;;  %v2087_v59 = vadd.f32 %v6468_v27, %v8440_v32 }
 0x326   : > { %v8544_v28 = vadd.f32 %v2335_v25, %v2084_v30  ;;  %v2032_v16 = vpop.f32.mrf.mxu1 }
 0x327   : > { %v6516_v1 = vpop.f32.mrf.mxu0  ;;  %v8546_v5 = vadd.f32 %v2032_v16, %v1759_v7 }
 0x328   : > { %v8548_v33 = vadd.f32 %v6516_v1, %v2087_v59  ;;  %v6471_v11 = vpop.f32.mrf.mxu1  ;;  %6758 = vmatmul.mubr.bf16.gmra.mxu1 %v3670_v39  ;;  %v2367_v1 = vadd.f32 %v8466_v24, %v8462_v36 }
 0x329   : > { %v8550_v22 = vpop.f32.mrf.mxu0  ;;  %v2090_v61 = vadd.f32 %v6471_v11, %v8444_v34 }
 0x32a   : > { %v2045_v41 = vpop.f32.mrf.mxu1 }
 0x32b   : > { %v6519_v44 = vpop.f32.mrf.mxu0  ;;  %v2088_v49 = vadd.f32 %v2045_v41, %v8446_v14 }
 0x32c   : > { %v8554_v55 = vadd.f32 %v6519_v44, %v2090_v61  ;;  %v6472_v32 = vpop.f32.mrf.mxu1 }
 0x32d   : > { %v2351_v60 = vpop.f32.mrf.mxu0  ;;  %v2091_v6 = vadd.f32 %v6472_v32, %v8450_v53 }
 0x32e   : > { %v8559_v0 = vadd.f32 %v2351_v60, %v2088_v49  ;;  %v2048_v30 = vpop.f32.mrf.mxu1 }
 0x32f   : > { %v6520_v27 = vpop.f32.mrf.mxu0  ;;  %v8561_v39 = vadd.f32 %v2048_v30, %v1775_v29 }
 0x330   : > { %v8563_v34 = vadd.f32 %v6520_v27, %v2091_v6  ;;  %v6539_v7 = vpop.f32.mrf.mxu1  ;;  %v2371_v27 = vadd.f32 %v8480_v26, %v8476_v20 }
 0x331   : > { %v8565_v25 = vpop.f32.mrf.mxu0  ;;  %v2674_v14 = vadd.f32 %v6539_v7, %v8456_v62 }
 0x332   : > { %v2545_v59 = vpop.f32.mrf.mxu1 }
 0x333   : > { %v6587_v16 = vpop.f32.mrf.mxu0  ;;  %v2672_v52 = vadd.f32 %v2545_v59, %v8459_v37 }
 0x334   : > { %v8569_v8 = vadd.f32 %v6587_v16, %v2674_v14  ;;  %v6540_v53 = vpop.f32.mrf.mxu1 }
 0x335   : > { %v2851_v11 = vpop.f32.mrf.mxu0  ;;  %v2675_v61 = vadd.f32 %v6540_v53, %v8464_v45 }
 0x336   : > { %v8574_v41 = vadd.f32 %v2851_v11, %v2672_v52  ;;  %v2548_v44 = vpop.f32.mrf.mxu1 }
 0x337   : > { %v6588_v49 = vpop.f32.mrf.mxu0  ;;  %v8576_v32 = vadd.f32 %v2548_v44, %v2367_v1 }
 0x338   : > { %v8578_v62 = vadd.f32 %v6588_v49, %v2675_v61  ;;  %v6543_v29 = vpop.f32.mrf.mxu1 }
 0x339   : > { %v8580_v60 = vpop.f32.mrf.mxu0  ;;  %v2678_v37 = vadd.f32 %v6543_v29, %v8470_v10 }
 0x33a   : > { %v2561_v6 = vpop.f32.mrf.mxu1 }
 0x33b   : > { %v6591_v30 = vpop.f32.mrf.mxu0  ;;  %v8584_v36 = vadd.f32 %v2561_v6, %v8473_v35 }
 0x33c   : > { %v8586_v24 = vadd.f32 %v6591_v30, %v2678_v37  ;;  %v6544_v45 = vpop.f32.mrf.mxu1 }
 0x33d   : > { %v8590_v7 = vpop.f32.mrf.mxu0  ;;  %v2679_v14 = vadd.f32 %v6544_v45, %v8478_v3  ;;  %v2375_v3 = vadd.f32 %v8494_v50, %v8490_v31 }
 0x33e   : > { %v2564_v59 = vpop.f32.mrf.mxu1 }
 0x33f   : > { %v6592_v16 = vpop.f32.mrf.mxu0  ;;  %v8593_v52 = vadd.f32 %v2564_v59, %v2371_v27 }
 0x340   : > { %v8595_v10 = vadd.f32 %v6592_v16, %v2679_v14  ;;  %v6547_v53 = vpop.f32.mrf.mxu1 }
 0x341   : > { %v8597_v1 = vpop.f32.mrf.mxu0  ;;  %v2682_v35 = vadd.f32 %v6547_v53, %v8484_v4 }
 0x342   : > { %v2577_v11 = vpop.f32.mrf.mxu1 }
 0x343   : > { %v6595_v61 = vpop.f32.mrf.mxu0  ;;  %v8601_v44 = vadd.f32 %v2577_v11, %v8487_v63 }
 0x344   : > { %v8603_v20 = vadd.f32 %v6595_v61, %v2682_v35  ;;  %v6548_v26 = vpop.f32.mrf.mxu1 }
 0x345   : > { %v8607_v49 = vpop.f32.mrf.mxu0  ;;  %v2683_v29 = vadd.f32 %v6548_v26, %v8492_v51  ;;  %v2379_v51 = vadd.f32 %v8508_v40, %v8504_v15 }
 0x346   : > { %v2580_v37 = vpop.f32.mrf.mxu1 }
 0x347   : > { %v6596_v6 = vpop.f32.mrf.mxu0  ;;  %v8610_v30 = vadd.f32 %v2580_v37, %v2375_v3 }
 0x348   : > { %v8612_v4 = vadd.f32 %v6596_v6, %v2683_v29  ;;  %v6551_v45 = vpop.f32.mrf.mxu1 }
 0x349   : > { %v8614_v27 = vpop.f32.mrf.mxu0  ;;  %v2686_v63 = vadd.f32 %v6551_v45, %v8498_v42 }
 0x34a   : > { %v2593_v14 = vpop.f32.mrf.mxu1 }
 0x34b   : > { %v6599_v59 = vpop.f32.mrf.mxu0  ;;  %v8618_v16 = vadd.f32 %v2593_v14, %v8501_v21  ;;  %v1727_v21 = vadd.f32 %v8415_v43, %v8411_v57 }
 0x34c   : > { %v8620_v31 = vadd.f32 %v6599_v59, %v2686_v63  ;;  %v6552_v50 = vpop.f32.mrf.mxu1 }
 0x34d   : > { %v8624_v53 = vpop.f32.mrf.mxu0  ;;  %v2687_v35 = vadd.f32 %v6552_v50, %v8506_v19  ;;  %v2077_v15 = vadd.f32 %v8517_v54, %v1727_v21 }
 0x34e   : > { %v2596_v11 = vpop.f32.mrf.mxu1 }
 0x34f   : > { %v6600_v61 = vpop.f32.mrf.mxu0  ;;  %v8627_v26 = vadd.f32 %v2596_v11, %v2379_v51  ;;  %v2383_v14 = vadd.f32 %v8521_v48, %v2077_v15 }
 0x350   : > { %v8629_v42 = vadd.f32 %v6600_v61, %v2687_v35  ;;  %v6555_v3 = vpop.f32.mrf.mxu1 }
 0x351   : > { %v8633_v29 = vpop.f32.mrf.mxu0  ;;  %v2690_v37 = vadd.f32 %v6555_v3, %v8511_v18 }
 0x352   : > { %v2609_v6 = vpop.f32.mrf.mxu1 }
 0x353   : > { %v6603_v40 = vpop.f32.mrf.mxu0  ;;  %v8638_v19 = vadd.f32 %v2609_v6, %v8515_v13  ;;  %v1743_v13 = vadd.f32 %v8427_v58, %v8423_v17 }
 0x354   : > { %v8640_v45 = vadd.f32 %v6603_v40, %v2690_v37  ;;  %v6556_v63 = vpop.f32.mrf.mxu1 }
 0x355   : > { %v8643_v59 = vpop.f32.mrf.mxu0  ;;  %v2691_v57 = vadd.f32 %v6556_v63, %v8519_v38  ;;  %v2081_v48 = vadd.f32 %v8530_v23, %v1743_v13 }
 0x356   : > { %v2612_v43 = vpop.f32.mrf.mxu1 }
 0x357   : > { %v6604_v50 = vpop.f32.mrf.mxu0  ;;  %v8646_v51 = vadd.f32 %v2612_v43, %v2383_v14  ;;  %v2387_v6 = vadd.f32 %v8534_v2, %v2081_v48 }
 0x358   : > { %v8648_v18 = vadd.f32 %v6604_v50, %v2691_v57  ;;  %v6559_v54 = vpop.f32.mrf.mxu1 }
 0x359   : > { %v8652_v35 = vpop.f32.mrf.mxu0  ;;  %v2694_v11 = vadd.f32 %v6559_v54, %v8525_v47 }
 0x35a   : > { %v2625_v61 = vpop.f32.mrf.mxu1 }
 0x35b   : > { %v6607_v3 = vpop.f32.mrf.mxu0  ;;  %v8657_v38 = vadd.f32 %v2625_v61, %v8528_v9 }
 0x35c   : > { %v8659_v21 = vadd.f32 %v6607_v3, %v2694_v11  ;;  %v6560_v37 = vpop.f32.mrf.mxu1 }
 0x35d   : > { %10084 = vst [vmem:[#allocation25_spill] sm:$0xff] %v8657_v38  ;;  %v8662_v15 = vpop.f32.mrf.mxu0  ;;  %v2695_v17 = vadd.f32 %v6560_v37, %v8532_v56  ;;  %v2391_v56 = vadd.f32 %v8550_v22, %v8546_v5 }
 0x35e   : > { %10085 = vst [vmem:[#allocation26_spill] sm:$0xff] %v8662_v15  ;;  %v2628_v58 = vpop.f32.mrf.mxu1 }
 0x35f   : > { %v6608_v40 = vpop.f32.mrf.mxu0  ;;  %v8665_v63 = vadd.f32 %v2628_v58, %v2387_v6 }
 0x360   : > { %v8667_v47 = vadd.f32 %v6608_v40, %v2695_v17  ;;  %v6563_v23 = vpop.f32.mrf.mxu1 }
 0x361   : > { %10086 = vst [vmem:[#allocation27_spill] sm:$0xff] %v8665_v63  ;;  %v8669_v14 = vpop.f32.mrf.mxu0  ;;  %v2698_v9 = vadd.f32 %v6563_v23, %v8539_v46 }
 0x362   : > { %10087 = vst [vmem:[#allocation28_spill] sm:$0xff] %v8669_v14  ;;  %v2641_v57 = vpop.f32.mrf.mxu1 }
 0x363   : > { %v6611_v43 = vpop.f32.mrf.mxu0  ;;  %v8673_v50 = vadd.f32 %v2641_v57, %v8544_v28  ;;  %v7142_v57 = vld [vmem:[#allocation9 + $0x38] sm:$0xff]  }
 0x364   : > { %v8675_v2 = vadd.f32 %v6611_v43, %v2698_v9  ;;  %v6564_v54 = vpop.f32.mrf.mxu1  ;;  %6761 = vmatprep.subr.bf16.mxu0 %v7142_v57 }
 0x365   : > { %10088 = vst [vmem:[#allocation29_spill] sm:$0xff] %v8673_v50  ;;  %v8679_v13 = vpop.f32.mrf.mxu0  ;;  %v2699_v11 = vadd.f32 %v6564_v54, %v8548_v33  ;;  %v2395_v33 = vadd.f32 %v8565_v25, %v8561_v39  ;;  %6762 = vmatpush3.bf16.msra.mxu0 %v7142_v57 }
 0x366   : > { %10089 = vst [vmem:[#allocation30_spill] sm:$0xff] %v8679_v13  ;;  %v2644_v61 = vpop.f32.mrf.mxu1 }
 0x367   : > { %v6612_v48 = vpop.f32.mrf.mxu0  ;;  %v8682_v3 = vadd.f32 %v2644_v61, %v2391_v56 }
 0x368   : > { %v8684_v46 = vadd.f32 %v6612_v48, %v2699_v11  ;;  %v6567_v37 = vpop.f32.mrf.mxu1 }
 0x369   : > { %10090 = vst [vmem:[#allocation31_spill] sm:$0xff] %v8682_v3  ;;  %v8686_v6 = vpop.f32.mrf.mxu0  ;;  %v2702_v28 = vadd.f32 %v6567_v37, %v8554_v55 }
 0x36a   : > { %10091 = vst [vmem:[#allocation32_spill] sm:$0xff] %v8686_v6  ;;  %v2657_v17 = vpop.f32.mrf.mxu1 }
 0x36b   : > { %v6615_v58 = vpop.f32.mrf.mxu0  ;;  %v8690_v40 = vadd.f32 %v2657_v17, %v8559_v0 }
 0x36c   : > { %v8692_v5 = vadd.f32 %v6615_v58, %v2702_v28  ;;  %v6568_v22 = vpop.f32.mrf.mxu1 }
 0x36d   : > { %10092 = vst [vmem:[#allocation33_spill] sm:$0xff] %v8690_v40  ;;  %v8696_v23 = vpop.f32.mrf.mxu0  ;;  %v2703_v9 = vadd.f32 %v6568_v22, %v8563_v34 }
 0x36e   : > { %10093 = vst [vmem:[#allocation34_spill] sm:$0xff] %v8696_v23  ;;  %v2660_v43 = vpop.f32.mrf.mxu1 }
 0x36f   : > { %v6616_v54 = vpop.f32.mrf.mxu0  ;;  %v8699_v56 = vadd.f32 %v2660_v43, %v2395_v33 }
 0x370   : > { %v8701_v55 = vadd.f32 %v6616_v54, %v2703_v9  ;;  %v6635_v0 = vpop.f32.mrf.mxu1 }
 0x371   : > { %10094 = vst [vmem:[#allocation35_spill] sm:$0xff] %v8699_v56  ;;  %v8703_v11 = vpop.f32.mrf.mxu0  ;;  %v8706_v61 = vadd.f32 %v6635_v0, %v8569_v8 }
 0x372   : > { %10095 = vst [vmem:[#allocation36_spill] sm:$0xff] %v8703_v11  ;;  %v3158_v39 = vpop.f32.mrf.mxu1 }
 0x373   : > { %v8708_v25 = vpop.f32.mrf.mxu0  ;;  %v8711_v34 = vadd.f32 %v3158_v39, %v8574_v41 }
 0x374   : > { %v6636_v48 = vpop.f32.mrf.mxu1 }
 0x375   : > { %v8713_v37 = vpop.f32.mrf.mxu0  ;;  %v8716_v28 = vadd.f32 %v6636_v48, %v8578_v62 }
 0x376   : > { %v8718_v17 = vpop.f32.mrf.mxu1 }
 0x377   : > { %v8720_v58 = vpop.f32.mrf.mxu0 }
 0x378   : > { %v6639_v22 = vpop.f32.mrf.mxu1 }
 0x379   : > { %v8723_v8 = vadd.f32 %v6639_v22, %v8586_v24  ;;  %v8725_v33 = vpop.f32.mrf.mxu0 }
 0x37a   : > { %v8727_v9 = vpop.f32.mrf.mxu1 }
 0x37b   : > { %v8732_v43 = vpop.f32.mrf.mxu0 }
 0x37c   : > { %v6640_v41 = vpop.f32.mrf.mxu1 }
 0x37d   : > { %v8730_v57 = vadd.f32 %v6640_v41, %v8595_v10  ;;  %v8739_v39 = vpop.f32.mrf.mxu0 }
 0x37e   : > { %v8734_v62 = vpop.f32.mrf.mxu1 }
 0x37f   : > { %v8746_v12 = vpop.f32.mrf.mxu0 }
 0x380   : > { %v6643_v54 = vpop.f32.mrf.mxu1 }
 0x381   : > { %v8737_v0 = vadd.f32 %v6643_v54, %v8603_v20  ;;  %v8753_v56 = vpop.f32.mrf.mxu0 }
 0x382   : > { %v8741_v24 = vpop.f32.mrf.mxu1 }
 0x383   : > { %v8760_v40 = vpop.f32.mrf.mxu0 }
 0x384   : > { %v6644_v48 = vpop.f32.mrf.mxu1 }
 0x385   : > { %v8744_v22 = vadd.f32 %v6644_v48, %v8612_v4  ;;  %v8767_v3 = vpop.f32.mrf.mxu0 }
 0x386   : > { %v8748_v10 = vpop.f32.mrf.mxu1 }
 0x387   : > { %v8774_v50 = vpop.f32.mrf.mxu0 }
 0x388   : > { %v6647_v41 = vpop.f32.mrf.mxu1 }
 0x389   : > { %v8751_v11 = vadd.f32 %v6647_v41, %v8620_v31  ;;  %v8781_v63 = vpop.f32.mrf.mxu0 }
 0x38a   : > { %v8755_v20 = vpop.f32.mrf.mxu1 }
 0x38b   : > { %v8788_v15 = vpop.f32.mrf.mxu0 }
 0x38c   : > { %v6648_v54 = vpop.f32.mrf.mxu1 }
 0x38d   : > { %v8758_v23 = vadd.f32 %v6648_v54, %v8629_v42  ;;  %v8795_v38 = vpop.f32.mrf.mxu0 }
 0x38e   : > { %v8762_v4 = vpop.f32.mrf.mxu1 }
 0x390   : > { %v6651_v48 = vpop.f32.mrf.mxu1 }
 0x391   : > { %v8765_v6 = vadd.f32 %v6651_v48, %v8640_v45 }
 0x392   : > { %v8769_v31 = vpop.f32.mrf.mxu1 }
 0x393   : > { %10096 = vst [vmem:[#allocation37_spill] sm:$0xff] %v8765_v6 }
 0x394   : > { %v6652_v41 = vpop.f32.mrf.mxu1 }
 0x395   : > { %v8772_v13 = vadd.f32 %v6652_v41, %v8648_v18 }
 0x396   : > { %v8776_v42 = vpop.f32.mrf.mxu1 }
 0x397   : > { %10097 = vst [vmem:[#allocation38_spill] sm:$0xff] %v8772_v13  ;;  %10098 = vst [vmem:[#allocation39_spill] sm:$0xff] %v8776_v42  ;;  %v7144_v42 = vld [vmem:[#allocation9 + $0x28] sm:$0xff]  }
 0x398   : > { %v6655_v54 = vpop.f32.mrf.mxu1 }
 0x399   : > { %v8779_v14 = vadd.f32 %v6655_v54, %v8659_v21 }
 0x39a   : > { %v8783_v45 = vpop.f32.mrf.mxu1 }
 0x39b   : > { %10099 = vst [vmem:[#allocation40_spill] sm:$0xff] %v8779_v14  ;;  %10100 = vst [vmem:[#allocation41_spill] sm:$0xff] %v8783_v45  ;;  %v8802_v45 = vpop.f32.mrf.mxu0 }
 0x39c   : > { %v6656_v48 = vpop.f32.mrf.mxu1 }
 0x39d   : > { %v8786_v6 = vadd.f32 %v6656_v48, %v8667_v47 }
 0x39e   : > { %v8790_v18 = vpop.f32.mrf.mxu1 }
 0x39f   : > { %10101 = vst [vmem:[#allocation42_spill] sm:$0xff] %v8786_v6  ;;  %10102 = vst [vmem:[#allocation43_spill] sm:$0xff] %v8790_v18  ;;  %v8809_v18 = vpop.f32.mrf.mxu0 }
 0x3a0   : > { %v6659_v41 = vpop.f32.mrf.mxu1 }
 0x3a1   : > { %v8793_v13 = vadd.f32 %v6659_v41, %v8675_v2 }
 0x3a2   : > { %v8797_v21 = vpop.f32.mrf.mxu1 }
 0x3a3   : > { %10103 = vst [vmem:[#allocation44_spill] sm:$0xff] %v8793_v13  ;;  %10104 = vst [vmem:[#allocation45_spill] sm:$0xff] %v8797_v21  ;;  %v7143_v21 = vld [vmem:[#allocation9 + $0x30] sm:$0xff]  }
 0x3a4   : > { %v6660_v54 = vpop.f32.mrf.mxu1  ;;  %6763 = vmatprep.subr.bf16.mxu0 %v7143_v21 }
 0x3a5   : > { %v8800_v14 = vadd.f32 %v6660_v54, %v8684_v46  ;;  %v8816_v46 = vpop.f32.mrf.mxu0  ;;  %6764 = vmatpush3.bf16.msra.mxu0 %v7143_v21  ;;  %v3593_v21 = vadd.f32 %v8708_v25, %v8706_v61  ;;  %v2983_v61 = vadd.f32 %v8597_v1, %v8593_v52 }
 0x3a6   : > { %v8804_v47 = vpop.f32.mrf.mxu1  ;;  %10110 = vst [vmem:[#allocation51_spill] sm:$0xff] %v8816_v46  ;;  %6765 = vmatprep.subr.bf16.mxu0 %v7144_v42 }
 0x3a7   : > { %10105 = vst [vmem:[#allocation46_spill] sm:$0xff] %v8800_v14  ;;  %10106 = vst [vmem:[#allocation47_spill] sm:$0xff] %v8804_v47  ;;  %v7146_v47 = vld [vmem:[#allocation9 + $0x18] sm:$0xff]  }
 0x3a8   : > { %v6663_v48 = vpop.f32.mrf.mxu1 }
 0x3a9   : > { %v8807_v6 = vadd.f32 %v6663_v48, %v8692_v5  ;;  %v2979_v5 = vadd.f32 %v8580_v60, %v8576_v32  ;;  %v7145_v48 = vld [vmem:[#allocation9 + $0x20] sm:$0xff]   ;;  %6766 = vmatpush3.bf16.msra.mxu0 %v7144_v42 }
 0x3aa   : > { %v8811_v2 = vpop.f32.mrf.mxu1  ;;  %6767 = vmatprep.subr.bf16.mxu0 %v7145_v48 }
 0x3ab   : > { %10107 = vst [vmem:[#allocation48_spill] sm:$0xff] %v8807_v6  ;;  %10108 = vst [vmem:[#allocation49_spill] sm:$0xff] %v8811_v2  ;;  %v8822_v6 = vpop.f32.mrf.mxu0 }
 0x3ac   : > { %v6664_v41 = vpop.f32.mrf.mxu1  ;;  %10112 = vst [vmem:[#allocation53_spill] sm:$0xff] %v8822_v6 }
 0x3ad   : > { %v8814_v13 = vadd.f32 %v6664_v41, %v8701_v55  ;;  %v3591_v55 = vadd.f32 %v8713_v37, %v8711_v34  ;;  %v3286_v41 = vadd.f32 %v8718_v17, %v2979_v5  ;;  %v8835_v6 = vpop.f32.mrf.mxu0  ;;  %v3594_v37 = vadd.f32 %v8720_v58, %v8716_v28  ;;  %6768 = vmatpush3.bf16.msra.mxu0 %v7145_v48  ;;  %v7147_v28 = vld [vmem:[#allocation9 + $0x10] sm:$0xff]  }
 0x3ae   : > { %v8818_v54 = vpop.f32.mrf.mxu1  ;;  %6769 = vmatprep.subr.bf16.mxu0 %v7146_v47  ;;  %v3290_v58 = vadd.f32 %v8734_v62, %v2983_v61  ;;  %v3597_v5 = vadd.f32 %v8732_v43, %v8723_v8 }
 0x3af   : > { %10109 = vst [vmem:[#allocation50_spill] sm:$0xff] %v8814_v13  ;;  %10111 = vst [vmem:[#allocation52_spill] sm:$0xff] %v8818_v54  ;;  %v2982_v13 = vadd.f32 %v8590_v7, %v8584_v36  ;;  %v3592_v32 = vadd.f32 %v8725_v33, %v3286_v41  ;;  %v8855_v52 = vpop.f32.mrf.mxu0 }
 0x3b0   : > { %v6731_v14 = vpop.f32.mrf.mxu1  ;;  %v3596_v62 = vadd.f32 %v8753_v56, %v3290_v58 }
 0x3b1   : > { %v3289_v46 = vadd.f32 %v8727_v9, %v2982_v13  ;;  %v8839_v36 = vadd.f32 %v6731_v14, %v3593_v21  ;;  %6770 = vmatpush3.bf16.msra.mxu0 %v7146_v47 }
 0x3b2   : > { %v3770_v2 = vpop.f32.mrf.mxu1  ;;  %6771 = vmatprep.subr.bf16.mxu0 %v7147_v28 }
 0x3b3   : > { %v8832_v60 = vadd.f32 %v3770_v2, %v3591_v55  ;;  %v3595_v25 = vadd.f32 %v8739_v39, %v3289_v46  ;;  %v3970_v39 = vmul.f32 %v8839_v36, %v8839_v36 }
 0x3b4   : > { %v6732_v54 = vpop.f32.mrf.mxu1 }
 0x3b5   : > { %v3968_v13 = vmul.f32 %v8832_v60, %v8832_v60  ;;  %v8848_v33 = vadd.f32 %v6732_v54, %v3594_v37  ;;  %v2986_v54 = vadd.f32 %v8607_v49, %v8601_v44  ;;  %v8873_v49 = vpop.f32.mrf.mxu0  ;;  %6772 = vmatpush3.bf16.msra.mxu0 %v7147_v28 }
 0x3b6   : > { %v3773_v34 = vpop.f32.mrf.mxu1 }
 0x3b7   : > { %v8841_v7 = vadd.f32 %v3773_v34, %v3592_v32  ;;  %v3971_v55 = vmul.f32 %v8848_v33, %v8848_v33  ;;  %v7148_v32 = vld [vmem:[#allocation9 + $0x8] sm:$0xff]   ;;  %v3598_v34 = vadd.f32 %v8746_v12, %v8730_v57  ;;  %v3293_v44 = vadd.f32 %v8741_v24, %v2986_v54 }
 0x3b8   : > { %v6735_v17 = vpop.f32.mrf.mxu1  ;;  %6773 = vmatprep.subr.bf16.mxu0 %v7148_v32 }
 0x3b9   : > { %v3931_v9 = vadd.f32 %v8841_v7, %v8832_v60  ;;  %v3969_v14 = vmul.f32 %v8841_v7, %v8841_v7  ;;  %v8875_v8 = vadd.f32 %v6735_v17, %v3597_v5  ;;  %v3599_v12 = vadd.f32 %v8767_v3, %v3293_v44  ;;  %6774 = vmatpush3.bf16.msra.mxu0 %v7148_v32 }
 0x3ba   : > { %v3786_v1 = vpop.f32.mrf.mxu1 }
 0x3bb   : > { %v3932_v42 = vadd.f32 %v3931_v9, %v8839_v36  ;;  %v4000_v2 = vadd.f32 %v3969_v14, %v3968_v13  ;;  %v8860_v46 = vadd.f32 %v3786_v1, %v3595_v25  ;;  %v2987_v25 = vadd.f32 %v8614_v27, %v8610_v30  ;;  %v7149_v14 = vld [vmem:[#allocation9] sm:$0xff]   ;;  %v8891_v1 = vpop.f32.mrf.mxu0 }
 0x3bc   : > { %v6736_v48 = vpop.f32.mrf.mxu1  ;;  %v3974_v30 = vmul.f32 %v8875_v8, %v8875_v8  ;;  %6775 = vmatprep.subr.bf16.mxu0 %v7149_v14 }
 0x3bd   : > { %v4001_v41 = vadd.f32 %v4000_v2, %v3970_v39  ;;  %v3933_v21 = vadd.f32 %v3932_v42, %v8848_v33  ;;  %v3972_v47 = vmul.f32 %v8860_v46, %v8860_v46  ;;  %v8885_v13 = vadd.f32 %v6736_v48, %v3598_v34  ;;  %6776 = vmatpush3.bf16.msra.mxu0 %v7149_v14 }
 0x3be   : > { %v3789_v43 = vpop.f32.mrf.mxu1  ;;  %v3294_v58 = vadd.f32 %v8748_v10, %v2987_v25  ;;  %v2990_v42 = vadd.f32 %v8624_v53, %v8618_v16  ;;  %v3601_v2 = vadd.f32 %v8760_v40, %v8737_v0  ;;  %v8909_v16 = vpop.f32.mrf.mxu0  ;;  %v2991_v34 = vadd.f32 %v8633_v29, %v8627_v26 }
 0x3bf   : > { %v3934_v56 = vadd.f32 %v3933_v21, %v8860_v46  ;;  %v4002_v37 = vadd.f32 %v4001_v41, %v3971_v55  ;;  %v8880_v61 = vadd.f32 %v3789_v43, %v3596_v62  ;;  %v3975_v5 = vmul.f32 %v8885_v13, %v8885_v13 }
 0x3c0   : > { %v6739_v57 = vpop.f32.mrf.mxu1  ;;  %v3600_v10 = vadd.f32 %v8781_v63, %v3294_v58  ;;  %v3602_v55 = vadd.f32 %v8774_v50, %v8744_v22  ;;  %v3297_v41 = vadd.f32 %v8755_v20, %v2990_v42  ;;  %v2995_v42 = vadd.f32 %v8652_v35, %v8646_v51 }
 0x3c1   : > { %v4003_v24 = vadd.f32 %v4002_v37, %v3972_v47  ;;  %v3935_v17 = vadd.f32 %v3934_v56, %v8880_v61  ;;  %v3973_v9 = vmul.f32 %v8880_v61, %v8880_v61  ;;  %v8911_v53 = vadd.f32 %v6739_v57, %v3601_v2  ;;  %v8927_v37 = vpop.f32.mrf.mxu0  ;;  %v10113_v2 = vld [vmem:[#allocation53_spill] sm:$0xff] }
 0x3c2   : > { %v3802_v39 = vpop.f32.mrf.mxu1  ;;  %v3603_v50 = vadd.f32 %v8795_v38, %v3297_v41  ;;  %v3298_v47 = vadd.f32 %v8762_v4, %v2991_v34  ;;  %v2994_v57 = vadd.f32 %v8643_v59, %v8638_v19 }
 0x3c3   : > { %v3936_v27 = vadd.f32 %v3935_v17, %v8875_v8  ;;  %v4004_v3 = vadd.f32 %v4003_v24, %v3973_v9  ;;  %v8896_v28 = vadd.f32 %v3802_v39, %v3599_v12  ;;  %v3978_v26 = vmul.f32 %v8911_v53, %v8911_v53 }
 0x3c4   : > { %v6740_v54 = vpop.f32.mrf.mxu1  ;;  %v3605_v24 = vadd.f32 %v8788_v15, %v8751_v11  ;;  %v3604_v4 = vadd.f32 %v8809_v18, %v3298_v47  ;;  %v3606_v39 = vadd.f32 %v8802_v45, %v8758_v23 }
 0x3c5   : > { %v4005_v48 = vadd.f32 %v4004_v3, %v3974_v30  ;;  %v3937_v62 = vadd.f32 %v3936_v27, %v8885_v13  ;;  %v3976_v63 = vmul.f32 %v8896_v28, %v8896_v28  ;;  %v8921_v44 = vadd.f32 %v6740_v54, %v3602_v55  ;;  %v8945_v27 = vpop.f32.mrf.mxu0 }
 0x3c6   : > { %v3805_v40 = vpop.f32.mrf.mxu1  ;;  %v3301_v30 = vadd.f32 %v8769_v31, %v2994_v57  ;;  %v10120_v57 = vld [vmem:[#allocation41_spill] sm:$0xff] }
 0x3c7   : > { %v3938_v0 = vadd.f32 %v3937_v62, %v8896_v28  ;;  %v4006_v21 = vadd.f32 %v4005_v48, %v3975_v5  ;;  %v8916_v32 = vadd.f32 %v3805_v40, %v3600_v10  ;;  %v3979_v9 = vmul.f32 %v8921_v44, %v8921_v44  ;;  %v10114_v48 = vld [vmem:[#allocation39_spill] sm:$0xff]  ;;  %v3560_v55 = vpop.f32.mrf.mxu0 }
 0x3c8   : > { %v6743_v22 = vpop.f32.mrf.mxu1  ;;  %v3607_v23 = vadd.f32 %v10113_v2, %v3301_v30  ;;  %v3302_v62 = vadd.f32 %v10114_v48, %v2995_v42  ;;  %v10121_v30 = vld [vmem:[#allocation27_spill] sm:$0xff] }
 0x3c9   : > { %v4007_v20 = vadd.f32 %v4006_v21, %v3976_v63  ;;  %v3939_v43 = vadd.f32 %v3938_v0, %v8916_v32  ;;  %v3977_v56 = vmul.f32 %v8916_v32, %v8916_v32  ;;  %v8947_v19 = vadd.f32 %v6743_v22, %v3605_v24  ;;  %v10115_v63 = vld [vmem:[#allocation25_spill] sm:$0xff]  ;;  %v10116_v21 = vld [vmem:[#allocation26_spill] sm:$0xff]  ;;  %v10118_v22 = vld [vmem:[#allocation51_spill] sm:$0xff] }
 0x3ca   : > { %v3818_v25 = vpop.f32.mrf.mxu1  ;;  %v2998_v34 = vadd.f32 %v10116_v21, %v10115_v63  ;;  %v10126_v63 = vld [vmem:[#allocation40_spill] sm:$0xff] }
 0x3cb   : > { %v3940_v29 = vadd.f32 %v3939_v43, %v8911_v53  ;;  %v4008_v38 = vadd.f32 %v4007_v20, %v3977_v56  ;;  %v8932_v12 = vadd.f32 %v3818_v25, %v3603_v50  ;;  %v3982_v40 = vmul.f32 %v8947_v19, %v8947_v19  ;;  %v10117_v50 = vld [vmem:[#allocation37_spill] sm:$0xff] }
 0x3cc   : > { %v6744_v17 = vpop.f32.mrf.mxu1  ;;  %v3609_v20 = vadd.f32 %v10118_v22, %v10117_v50  ;;  %v3608_v56 = vadd.f32 %v8855_v52, %v3302_v62  ;;  %v3305_v24 = vadd.f32 %v10120_v57, %v2998_v34  ;;  %v3613_v21 = vadd.f32 %v8873_v49, %v10126_v63 }
 0x3cd   : > { %v4009_v14 = vadd.f32 %v4008_v38, %v3978_v26  ;;  %v3941_v58 = vadd.f32 %v3940_v29, %v8921_v44  ;;  %v3980_v11 = vmul.f32 %v8932_v12, %v8932_v12  ;;  %v8957_v54 = vadd.f32 %v6744_v17, %v3606_v39  ;;  %v10119_v29 = vld [vmem:[#allocation38_spill] sm:$0xff]  ;;  %v6708_v17 = vpop.f32.mrf.mxu0 }
 0x3ce   : > { %v3821_v59 = vpop.f32.mrf.mxu1  ;;  %v3610_v38 = vadd.f32 %v8835_v6, %v10119_v29 }
 0x3cf   : > { %v3942_v15 = vadd.f32 %v3941_v58, %v8932_v12  ;;  %v4010_v18 = vadd.f32 %v4009_v14, %v3979_v9  ;;  %v8952_v3 = vadd.f32 %v3821_v59, %v3604_v4  ;;  %v3983_v47 = vmul.f32 %v8957_v54, %v8957_v54  ;;  %v10122_v59 = vld [vmem:[#allocation28_spill] sm:$0xff] }
 0x3d0   : > { %v6747_v45 = vpop.f32.mrf.mxu1 }
 0x3d1   : > { %v4011_v31 = vadd.f32 %v4010_v18, %v3980_v11  ;;  %v3943_v10 = vadd.f32 %v3942_v15, %v8952_v3  ;;  %v3981_v5 = vmul.f32 %v8952_v3, %v8952_v3  ;;  %v8979_v4 = vadd.f32 %v6747_v45, %v3609_v20  ;;  %v10123_v45 = vld [vmem:[#allocation43_spill] sm:$0xff] }
 0x3d2   : > { %v3834_v41 = vpop.f32.mrf.mxu1  ;;  %v2999_v15 = vadd.f32 %v10122_v59, %v10121_v30  ;;  %v3611_v11 = vadd.f32 %v8891_v1, %v3305_v24 }
 0x3d3   : > { %v3944_v51 = vadd.f32 %v3943_v10, %v8947_v19  ;;  %v4012_v35 = vadd.f32 %v4011_v31, %v3981_v5  ;;  %v8966_v0 = vadd.f32 %v3834_v41, %v3607_v23  ;;  %v3563_v10 = vpop.f32.mrf.mxu0  ;;  %v3986_v48 = vmul.f32 %v8979_v4, %v8979_v4 }
 0x3d4   : > { %v6748_v43 = vpop.f32.mrf.mxu1  ;;  %v3306_v31 = vadd.f32 %v10123_v45, %v2999_v15 }
 0x3d5   : > { %v4013_v25 = vadd.f32 %v4012_v35, %v3982_v40  ;;  %v3945_v26 = vadd.f32 %v3944_v51, %v8957_v54  ;;  %v3984_v52 = vmul.f32 %v8966_v0, %v8966_v0  ;;  %v8989_v42 = vadd.f32 %v6748_v43, %v3610_v38  ;;  %v10124_v40 = vld [vmem:[#allocation29_spill] sm:$0xff]  ;;  %v10125_v51 = vld [vmem:[#allocation30_spill] sm:$0xff]  ;;  %v6711_v29 = vpop.f32.mrf.mxu0 }
 0x3d6   : > { %v3837_v9 = vpop.f32.mrf.mxu1  ;;  %v3002_v35 = vadd.f32 %v10125_v51, %v10124_v40  ;;  %v3612_v50 = vadd.f32 %v8927_v37, %v3306_v31  ;;  %v10134_v51 = vld [vmem:[#allocation44_spill] sm:$0xff] }
 0x3d7   : > { %v3946_v14 = vadd.f32 %v3945_v26, %v8966_v0  ;;  %v4014_v58 = vadd.f32 %v4013_v25, %v3983_v47  ;;  %v8984_v39 = vadd.f32 %v3837_v9, %v3608_v56  ;;  %v3987_v22 = vmul.f32 %v8989_v42, %v8989_v42  ;;  %v10127_v56 = vld [vmem:[#allocation42_spill] sm:$0xff]  ;;  %v10128_v25 = vld [vmem:[#allocation45_spill] sm:$0xff] }
 0x3d8   : > { %v6751_v6 = vpop.f32.mrf.mxu1  ;;  %v3614_v47 = vadd.f32 %v8909_v16, %v10127_v56  ;;  %v3309_v26 = vadd.f32 %v10128_v25, %v3002_v35  ;;  %v3617_v35 = vadd.f32 %v8945_v27, %v10134_v51  ;;  %v10136_v56 = vld [vmem:[#allocation49_spill] sm:$0xff] }
 0x3d9   : > { %v4015_v18 = vadd.f32 %v4014_v58, %v3984_v52  ;;  %v3947_v2 = vadd.f32 %v3946_v14, %v8984_v39  ;;  %v3985_v23 = vmul.f32 %v8984_v39, %v8984_v39  ;;  %v9011_v38 = vadd.f32 %v6751_v6, %v3613_v21  ;;  %v10129_v14 = vld [vmem:[#allocation31_spill] sm:$0xff]  ;;  %v10130_v52 = vld [vmem:[#allocation32_spill] sm:$0xff] }
 0x3da   : > { %v3850_v5 = vpop.f32.mrf.mxu1  ;;  %v3003_v58 = vadd.f32 %v10130_v52, %v10129_v14  ;;  %v3615_v30 = vadd.f32 %v3560_v55, %v3309_v26  ;;  %v10138_v14 = vld [vmem:[#allocation36_spill] sm:$0xff] }
 0x3db   : > { %v3948_v62 = vadd.f32 %v3947_v2, %v8979_v4  ;;  %v4016_v41 = vadd.f32 %v4015_v18, %v3985_v23  ;;  %v8998_v1 = vadd.f32 %v3850_v5, %v3611_v11  ;;  %v10131_v18 = vld [vmem:[#allocation47_spill] sm:$0xff]  ;;  %v3576_v23 = vpop.f32.mrf.mxu0  ;;  %v3990_v31 = vmul.f32 %v9011_v38, %v9011_v38 }
 0x3dc   : > { %v6752_v34 = vpop.f32.mrf.mxu1  ;;  %v3310_v2 = vadd.f32 %v10131_v18, %v3003_v58 }
 0x3dd   : > { %v4017_v20 = vadd.f32 %v4016_v41, %v3986_v48  ;;  %v3949_v43 = vadd.f32 %v3948_v62, %v8989_v42  ;;  %v3988_v37 = vmul.f32 %v8998_v1, %v8998_v1  ;;  %v9020_v15 = vadd.f32 %v6752_v34, %v3614_v47  ;;  %v10132_v62 = vld [vmem:[#allocation33_spill] sm:$0xff]  ;;  %v10133_v41 = vld [vmem:[#allocation34_spill] sm:$0xff]  ;;  %v6712_v25 = vpop.f32.mrf.mxu0 }
 0x3de   : > { %v3853_v57 = vpop.f32.mrf.mxu1  ;;  %v3006_v40 = vadd.f32 %v10133_v41, %v10132_v62  ;;  %v3616_v21 = vadd.f32 %v3563_v10, %v3310_v2  ;;  %v10140_v62 = vld [vmem:[#allocation48_spill] sm:$0xff] }
 0x3df   : > { %v3950_v49 = vadd.f32 %v3949_v43, %v8998_v1  ;;  %v4018_v24 = vadd.f32 %v4017_v20, %v3987_v22  ;;  %v9016_v9 = vadd.f32 %v3853_v57, %v3612_v50  ;;  %v3991_v34 = vmul.f32 %v9020_v15, %v9020_v15  ;;  %v10135_v20 = vld [vmem:[#allocation46_spill] sm:$0xff]  ;;  %v3579_v2 = vpop.f32.mrf.mxu0 }
 0x3e0   : > { %v6755_v59 = vpop.f32.mrf.mxu1  ;;  %v3618_v43 = vadd.f32 %v6708_v17, %v10135_v20  ;;  %v3313_v47 = vadd.f32 %v10136_v56, %v3006_v40  ;;  %v3621_v41 = vadd.f32 %v6711_v29, %v10140_v62 }
 0x3e1   : > { %v4019_v16 = vadd.f32 %v4018_v24, %v3988_v37  ;;  %v3951_v11 = vadd.f32 %v3950_v49, %v9016_v9  ;;  %v3989_v6 = vmul.f32 %v9016_v9, %v9016_v9  ;;  %v9040_v26 = vadd.f32 %v6755_v59, %v3617_v35  ;;  %v10137_v24 = vld [vmem:[#allocation35_spill] sm:$0xff] }
 0x3e2   : > { %v3866_v45 = vpop.f32.mrf.mxu1  ;;  %v3007_v52 = vadd.f32 %v10138_v14, %v10137_v24  ;;  %v3619_v58 = vadd.f32 %v3576_v23, %v3313_v47 }
 0x3e3   : > { %v3952_v5 = vadd.f32 %v3951_v11, %v9011_v38  ;;  %v4020_v48 = vadd.f32 %v4019_v16, %v3989_v6  ;;  %v9029_v55 = vadd.f32 %v3866_v45, %v3615_v30  ;;  %v10139_v6 = vld [vmem:[#allocation52_spill] sm:$0xff] }
 0x3e4   : > { %v6756_v63 = vpop.f32.mrf.mxu1  ;;  %v3314_v18 = vadd.f32 %v10139_v6, %v3007_v52 }
 0x3e5   : > { %v4021_v50 = vadd.f32 %v4020_v48, %v3990_v31  ;;  %v3953_v22 = vadd.f32 %v3952_v5, %v9020_v15  ;;  %v3992_v27 = vmul.f32 %v9029_v55, %v9029_v55  ;;  %v9049_v16 = vadd.f32 %v6756_v63, %v3618_v43 }
 0x3e6   : > { %v3869_v57 = vpop.f32.mrf.mxu1  ;;  %v3994_v31 = vmul.f32 %v9040_v26, %v9040_v26  ;;  %v3620_v51 = vadd.f32 %v3579_v2, %v3314_v18 }
 0x3e7   : > { %v3954_v49 = vadd.f32 %v3953_v22, %v9029_v55  ;;  %v4022_v10 = vadd.f32 %v4021_v50, %v3991_v34  ;;  %v9045_v37 = vadd.f32 %v3869_v57, %v3616_v21  ;;  %v3995_v35 = vmul.f32 %v9049_v16, %v9049_v16  ;;  %v10141_v34 = vld [vmem:[#allocation50_spill] sm:$0xff] }
 0x3e8   : > { %v6759_v30 = vpop.f32.mrf.mxu1  ;;  %v3622_v50 = vadd.f32 %v6712_v25, %v10141_v34 }
 0x3e9   : > { %v4023_v17 = vadd.f32 %v4022_v10, %v3992_v27  ;;  %v3955_v59 = vadd.f32 %v3954_v49, %v9045_v37  ;;  %v3993_v11 = vmul.f32 %v9045_v37, %v9045_v37  ;;  %v9065_v22 = vadd.f32 %v6759_v30, %v3621_v41 }
 0x3ea   : > { %v3882_v45 = vpop.f32.mrf.mxu1 }
 0x3eb   : > { %v3956_v5 = vadd.f32 %v3955_v59, %v9040_v26  ;;  %v4024_v48 = vadd.f32 %v4023_v17, %v3993_v11  ;;  %v9058_v23 = vadd.f32 %v3882_v45, %v3619_v58  ;;  %v3998_v24 = vmul.f32 %v9065_v22, %v9065_v22 }
 0x3ec   : > { %v6760_v40 = vpop.f32.mrf.mxu1 }
 0x3ed   : > { %v4025_v63 = vadd.f32 %v4024_v48, %v3994_v31  ;;  %v3957_v21 = vadd.f32 %v3956_v5, %v9049_v16  ;;  %v3996_v56 = vmul.f32 %v9058_v23, %v9058_v23  ;;  %v9070_v49 = vadd.f32 %v6760_v40, %v3622_v50  ;;  %v3929_v50 = vld [vmem:[%s9996_s7] sm:$0x1] }
 0x3ee   : > { %v3885_v20 = vpop.f32.mrf.mxu1 }
 0x3ef   : > { %v3958_v43 = vadd.f32 %v3957_v21, %v9058_v23  ;;  %v4026_v47 = vadd.f32 %v4025_v63, %v3995_v35  ;;  %v3926_v29 = vadd.f32 %v3885_v20, %v3620_v51  ;;  %v3999_v52 = vmul.f32 %v9070_v49, %v9070_v49 }
 0x3f1   : > { %v4027_v57 = vadd.f32 %v4026_v47, %v3996_v56  ;;  %v3959_v27 = vadd.f32 %v3958_v43, %v3926_v29  ;;  %v3997_v10 = vmul.f32 %v3926_v29, %v3926_v29  ;;  %v3930_v56 = vld [vmem:[%s9997_s8] sm:$0x1] }
 0x3f3   : > { %v3960_v25 = vadd.f32 %v3959_v27, %v9065_v22  ;;  %v4028_v14 = vadd.f32 %v4027_v57, %v3997_v10  ;;  %v10142_v57 = vld [vmem:[#allocation24_spill] sm:$0xff] }
 0x3f5   : > { %v3961_v58 = vadd.f32 %v3960_v25, %v9070_v49  ;;  %v4029_v30 = vadd.f32 %v4028_v14, %v3998_v24 }
 0x3f7   : > { %v3962_v17 = vrot.slane %v3961_v58, 4  ;;  %v4030_v59 = vadd.f32 %v4029_v30, %v3999_v52 }
 0x3f9   : > { %v3963_v11 = vadd.f32 %v3962_v17, %v3961_v58  ;;  %v4031_v6 = vrot.slane %v4030_v59, 4 }
 0x3fb   : > { %v3964_v18 = vrot.slane %v3963_v11, 2  ;;  %v4032_v2 = vadd.f32 %v4031_v6, %v4030_v59 }
 0x3fd   : > { %v3965_v45 = vadd.f32 %v3964_v18, %v3963_v11  ;;  %v4033_v31 = vrot.slane %v4032_v2, 2 }
 0x3ff   : > { %v3966_v5 = vrot.slane %v3965_v45, 1  ;;  %v4034_v48 = vadd.f32 %v4033_v31, %v4032_v2 }
 0x401   : > { %v3967_v62 = vadd.f32 %v3966_v5, %v3965_v45  ;;  %v4035_v41 = vrot.slane %v4034_v48, 1 }
 0x403   : > { %v4036_v40 = vadd.f32 %v4035_v41, %v4034_v48  ;;  %v4037_v51 = vmul.f32 0.00390625, %v3967_v62 }
 0x405   : > { %v4038_v35 = vmul.f32 0.00390625, %v4036_v40  ;;  %v4039_v63 = vmul.f32 %v4037_v51, %v4037_v51 }
 0x407   : > { %v4040_v21 = vsub.f32 %v4038_v35, %v4039_v63 }
 0x409   : > { %v4041_v34 = vadd.f32 1e-06, %v4040_v21 }
 0x40b   : > { %7172 = vrsqrt.f32 %v4041_v34 }
 0x418   : > { %v7173_v20 = vpop.eup %7172 }
 0x419   : > { %v4043_v43 = vmul.f32 %v7173_v20, %v3929_v50 }
 0x41b   : > { %v4044_v47 = vmul.f32 %v4043_v43, %v4037_v51  ;;  %v4049_v27 = vrot.slane %v4043_v43, %v10142_v57 }
 0x41d   : > { %v4045_v10 = vsub.f32 %v3930_v56, %v4044_v47  ;;  %v9085_v24 = vmul.f32 %v4049_v27, %v3926_v29  ;;  %v9088_v25 = vmul.f32 %v4049_v27, %v8832_v60  ;;  %v9091_v14 = vmul.f32 %v4049_v27, %v8841_v7 }
 0x41e   : > { %v4052_v52 = vmul.f32 %v4049_v27, %v8839_v36  ;;  %v4053_v58 = vmul.f32 %v4049_v27, %v8848_v33  ;;  %v9096_v30 = vmul.f32 %v4049_v27, %v8860_v46  ;;  %v9099_v17 = vmul.f32 %v4049_v27, %v8880_v61 }
 0x41f   : > { %v9102_v59 = vrot.slane %v4045_v10, %v10142_v57  ;;  %v4056_v29 = vmul.f32 %v4049_v27, %v8875_v8  ;;  %v4057_v60 = vmul.f32 %v4049_v27, %v8885_v13  ;;  %v4058_v7 = vmul.f32 %v4049_v27, %v8896_v28 }
 0x420   : > { %v4059_v11 = vmul.f32 %v4049_v27, %v8916_v32  ;;  %v4060_v36 = vmul.f32 %v4049_v27, %v8911_v53  ;;  %v4061_v33 = vmul.f32 %v4049_v27, %v8921_v44  ;;  %v9111_v46 = vmul.f32 %v4049_v27, %v8932_v12 }
 0x421   : > { %v9114_v61 = vmul.f32 %v4049_v27, %v8952_v3  ;;  %v4064_v6 = vmul.f32 %v4049_v27, %v8947_v19  ;;  %v4065_v8 = vmul.f32 %v4049_v27, %v8957_v54  ;;  %v9119_v13 = vmul.f32 %v4049_v27, %v8966_v0 }
 0x422   : > { %v9122_v28 = vmul.f32 %v4049_v27, %v8984_v39  ;;  %v4068_v53 = vmul.f32 %v4049_v27, %v8979_v4  ;;  %v4069_v32 = vmul.f32 %v4049_v27, %v8989_v42  ;;  %v9127_v44 = vmul.f32 %v4049_v27, %v8998_v1 }
 0x423   : > { %v9130_v12 = vmul.f32 %v4049_v27, %v9016_v9  ;;  %v4072_v19 = vmul.f32 %v4049_v27, %v9011_v38  ;;  %v4073_v3 = vmul.f32 %v4049_v27, %v9020_v15  ;;  %v9135_v54 = vmul.f32 %v4049_v27, %v9029_v55 }
 0x424   : > { %v9138_v0 = vmul.f32 %v4049_v27, %v9045_v37  ;;  %v4076_v4 = vmul.f32 %v4049_v27, %v9040_v26  ;;  %v4077_v39 = vmul.f32 %v4049_v27, %v9049_v16  ;;  %v9143_v42 = vmul.f32 %v4049_v27, %v9058_v23 }
 0x425   : > { %v4080_v1 = vmul.f32 %v4049_v27, %v9065_v22  ;;  %v4081_v9 = vmul.f32 %v4049_v27, %v9070_v49  ;;  %v4090_v38 = vadd.f32 %v9102_v59, %v4052_v52  ;;  %v4091_v15 = vadd.f32 %v9102_v59, %v4053_v58 }
 0x426   : > { %v4094_v55 = vadd.f32 %v9102_v59, %v4056_v29  ;;  %v4095_v37 = vadd.f32 %v9102_v59, %v4057_v60  ;;  %v4098_v18 = vadd.f32 %v9102_v59, %v4060_v36  ;;  %v4099_v26 = vadd.f32 %v9102_v59, %v4061_v33 }
 0x427   : > { %v4102_v16 = vadd.f32 %v9102_v59, %v4064_v6  ;;  %v4103_v23 = vadd.f32 %v9102_v59, %v4065_v8  ;;  %v4106_v22 = vadd.f32 %v9102_v59, %v4068_v53  ;;  %v4107_v49 = vadd.f32 %v9102_v59, %v4069_v32 }
 0x428   : > { %v4110_v2 = vadd.f32 %v9102_v59, %v4072_v19  ;;  %v4111_v45 = vadd.f32 %v9102_v59, %v4073_v3  ;;  %v4114_v31 = vadd.f32 %v9102_v59, %v4076_v4  ;;  %v4115_v5 = vadd.f32 %v9102_v59, %v4077_v39 }
 0x429   : > { %v9162_v48 = vadd.f32 %v9102_v59, %v4080_v1  ;;  %v9165_v62 = vadd.f32 %v9102_v59, %v4081_v9  ;;  %v4122_v41 = vmax.f32 %v4090_v38, 0.0  ;;  %v4123_v40 = vmax.f32 %v4091_v15, 0.0 }
 0x42a   : > { %v4126_v51 = vmax.f32 %v4094_v55, 0.0  ;;  %v4127_v35 = vmax.f32 %v4095_v37, 0.0  ;;  %v4130_v63 = vmax.f32 %v4098_v18, 0.0  ;;  %v4131_v21 = vmax.f32 %v4099_v26, 0.0 }
 0x42b   : > { %v4134_v34 = vmax.f32 %v4102_v16, 0.0  ;;  %v4135_v50 = vmax.f32 %v4103_v23, 0.0  ;;  %v4138_v20 = vmax.f32 %v4106_v22, 0.0  ;;  %v4139_v43 = vmax.f32 %v4107_v49, 0.0 }
 0x42c   : > { %v4142_v56 = vmax.f32 %v4110_v2, 0.0  ;;  %v4143_v47 = vmax.f32 %v4111_v45, 0.0  ;;  %v4146_v27 = vmax.f32 %v4114_v31, 0.0  ;;  %v4147_v10 = vmax.f32 %v4115_v5, 0.0 }
 0x42d   : > { %v4150_v52 = vmax.f32 %v9162_v48, 0.0  ;;  %v4151_v58 = vmax.f32 %v9165_v62, 0.0  ;;  %v4153_v29 = vpack.c.bf16 %v4123_v40, %v4122_v41  ;;  %v4088_v60 = vadd.f32 %v9102_v59, %v9088_v25 }
 0x42e   : > { %v4089_v36 = vadd.f32 %v9102_v59, %v9091_v14  ;;  %v4092_v33 = vadd.f32 %v9102_v59, %v9096_v30  ;;  %v4093_v6 = vadd.f32 %v9102_v59, %v9099_v17  ;;  %v4155_v8 = vpack.c.bf16 %v4127_v35, %v4126_v51 }
 0x42f   : > { %v4120_v53 = vmax.f32 %v4088_v60, 0.0  ;;  %v4096_v32 = vadd.f32 %v9102_v59, %v4058_v7  ;;  %v4097_v19 = vadd.f32 %v9102_v59, %v4059_v11  ;;  %v4157_v3 = vpack.c.bf16 %v4131_v21, %v4130_v63  ;;  %v9213_v21 = vld [vmem:[#allocation11 + $0x10] sm:$0xff]   ;;  %v9261_v60 = vld [vmem:[#allocation14 + $0x20] sm:$0xff] }
 0x430   : > { %v4121_v4 = vmax.f32 %v4089_v36, 0.0  ;;  %v4124_v39 = vmax.f32 %v4092_v33, 0.0  ;;  %v4125_v1 = vmax.f32 %v4093_v6, 0.0  ;;  %v4100_v25 = vadd.f32 %v9102_v59, %v9111_v46  ;;  %v7154_v36 = vld [vmem:[%s7731_s13] sm:$0xff]   ;;  %v7155_v33 = vld [vmem:[%s7731_s13 + $0x8] sm:$0xff]  }
 0x431   : > { %v4128_v14 = vmax.f32 %v4096_v32, 0.0  ;;  %v4129_v9 = vmax.f32 %v4097_v19, 0.0  ;;  %v4101_v30 = vadd.f32 %v9102_v59, %v9114_v61  ;;  %v4159_v38 = vpack.c.bf16 %v4135_v50, %v4134_v34  ;;  %v9215_v34 = vld [vmem:[#allocation14 + $0x68] sm:$0xff]  ;;  %v9221_v50 = vld [vmem:[#allocation14 + $0x60] sm:$0xff]  ;;  %v9268_v6 = vld [vmem:[#allocation14 + $0x18] sm:$0xff] }
 0x432   : > { %v4152_v17 = vpack.c.bf16 %v4121_v4, %v4120_v53  ;;  %v4154_v15 = vpack.c.bf16 %v4125_v1, %v4124_v39  ;;  %v4132_v55 = vmax.f32 %v4100_v25, 0.0  ;;  %v4104_v7 = vadd.f32 %v9102_v59, %v9119_v13  ;;  %v7156_v53 = vld [vmem:[%s7731_s13 + $0x10] sm:$0xff]   ;;  %v9283_v19 = vld [vmem:[#allocation14] sm:$0xff]  ;;  %v7161_v25 = vld [vmem:[%s7731_s13 + $0x38] sm:$0xff]  }
 0x433   : > { %v4156_v11 = vpack.c.bf16 %v4129_v9, %v4128_v14  ;;  %v4133_v37 = vmax.f32 %v4101_v30, 0.0  ;;  %v4105_v18 = vadd.f32 %v9102_v59, %v9122_v28  ;;  %v4161_v26 = vpack.c.bf16 %v4139_v43, %v4138_v20  ;;  %v9225_v20 = vld [vmem:[#allocation14 + $0x58] sm:$0xff]  ;;  %v9229_v43 = vld [vmem:[#allocation14 + $0x50] sm:$0xff]  ;;  %v9278_v32 = vld [vmem:[#allocation14 + $0x8] sm:$0xff] }
 0x434   : > { %6777 = vmatprep.mubr.bf16.mxu0 %v4152_v17  ;;  %v4136_v46 = vmax.f32 %v4104_v7, 0.0  ;;  %v4108_v16 = vadd.f32 %v9102_v59, %v9127_v44  ;;  %v4109_v61 = vadd.f32 %v9102_v59, %v9130_v12  ;;  %v4163_v23 = vpack.c.bf16 %v4143_v47, %v4142_v56  ;;  %v9233_v56 = vld [vmem:[#allocation11 + $0x8] sm:$0xff]   ;;  %v7158_v4 = vld [vmem:[%s7731_s13 + $0x20] sm:$0xff]   ;;  %v7160_v1 = vld [vmem:[%s7731_s13 + $0x30] sm:$0xff]  }
 0x435   : > { %6778 = vmatmul.mubr.bf16.vlgmr.msra.gmra.mxu0 %v4153_v29  ;;  %v4158_v22 = vpack.c.bf16 %v4133_v37, %v4132_v55  ;;  %v4137_v49 = vmax.f32 %v4105_v18, 0.0  ;;  %v4112_v13 = vadd.f32 %v9102_v59, %v9135_v54  ;;  %v4113_v2 = vadd.f32 %v9102_v59, %v9138_v0  ;;  %v9206_v0 = vld [vmem:[#allocation2] sm:$0xff]  ;;  %v7159_v39 = vld [vmem:[%s7731_s13 + $0x28] sm:$0xff]   ;;  %v7162_v14 = vld [vmem:[%s7731_s13 + $0x40] sm:$0xff]  }
 0x436   : > { %6781 = vmatprep.mubr.bf16.mxu0 %v4154_v15  ;;  %v4140_v28 = vmax.f32 %v4108_v16, 0.0  ;;  %v4141_v45 = vmax.f32 %v4109_v61, 0.0  ;;  %v4165_v31 = vpack.c.bf16 %v4147_v10, %v4146_v27  ;;  %v4116_v44 = vadd.f32 %v9102_v59, %v9143_v42  ;;  %v9209_v42 = vld [vmem:[#allocation14 + $0x70] sm:$0xff]  ;;  %v9235_v47 = vld [vmem:[#allocation14 + $0x48] sm:$0xff]  ;;  %v9241_v27 = vld [vmem:[#allocation14 + $0x40] sm:$0xff]  ;;  %6841 = vmatprep.mubr.msk.f32.mxu1 %vm7455_vm1, %v9206_v0 }
 0x437   : > { %v4160_v5 = vpack.c.bf16 %v4137_v49, %v4136_v46  ;;  %v4144_v48 = vmax.f32 %v4112_v13, 0.0  ;;  %v4145_v12 = vmax.f32 %v4113_v2, 0.0  ;;  %v4117_v62 = vadd.f32 %v9102_v59, %v9085_v24  ;;  %v9199_v24 = vld [vmem:[#allocation11 + $0x18] sm:$0xff]   ;;  %v9255_v29 = vld [vmem:[#allocation14 + $0x28] sm:$0xff]  ;;  %v7166_v17 = vld [vmem:[%s7731_s13 + $0x60] sm:$0xff]  }
 0x438   : > { %v4162_v41 = vpack.c.bf16 %v4141_v45, %v4140_v28  ;;  %v4148_v40 = vmax.f32 %v4116_v44, 0.0  ;;  %v4167_v51 = vpack.c.bf16 %v4151_v58, %v4150_v52  ;;  %6879 = vmatprep.subr.bf16.mxu0 %v9199_v24  ;;  %v9203_v59 = vld [vmem:[#allocation14 + $0x78] sm:$0xff]  ;;  %v9249_v52 = vld [vmem:[#allocation14 + $0x30] sm:$0xff]  ;;  %v7163_v9 = vld [vmem:[%s7731_s13 + $0x48] sm:$0xff]  }
 0x439   : > { %v4164_v54 = vpack.c.bf16 %v4145_v12, %v4144_v48  ;;  %v4149_v35 = vmax.f32 %v4117_v62, 0.0  ;;  %6880 = vmatpush3.bf16.msra.mxu0 %v9199_v24  ;;  %6810 = vmatpush3.msra.mxu1 %v9203_v59  ;;  %v9245_v10 = vld [vmem:[#allocation14 + $0x38] sm:$0xff]  ;;  %v7164_v30 = vld [vmem:[%s7731_s13 + $0x50] sm:$0xff]   ;;  %v7167_v15 = vld [vmem:[%s7731_s13 + $0x68] sm:$0xff]  }
 0x43a   : > { %6811 = vmatprep.subr.mxu1 %v9206_v0  ;;  %6881 = vmatprep.subr.bf16.mxu0 %v9213_v21  ;;  %v9253_v58 = vld [vmem:[#allocation11] sm:$0xff]  }
 0x43b   : > { %v4166_v63 = vpack.c.bf16 %v4149_v35, %v4148_v40  ;;  %6812 = vmatpush3.msra.mxu1 %v9209_v42 }
 0x43c   : > { %6813 = vmatprep.subr.mxu1 %v9206_v0 }
 0x43d   : > { %6782 = vmatmul.mubr.bf16.gmra.mxu0 %v4155_v8  ;;  %6814 = vmatpush3.msra.mxu1 %v9215_v34  ;;  %v9270_v8 = vld [vmem:[#allocation14 + $0x10] sm:$0xff] }
 0x43e   : > { %6785 = vmatprep.mubr.bf16.mxu0 %v4156_v11  ;;  %6815 = vmatprep.subr.mxu1 %v9206_v0 }
 0x43f   : > { %6882 = vmatpush3.bf16.msra.mxu0 %v9213_v21  ;;  %6816 = vmatpush3.msra.mxu1 %v9221_v50 }
 0x440   : > { %6817 = vmatprep.subr.mxu1 %v9206_v0  ;;  %6883 = vmatprep.subr.bf16.mxu0 %v9233_v56 }
 0x441   : > { %6818 = vmatpush3.msra.mxu1 %v9225_v20 }
 0x442   : > { %6819 = vmatprep.subr.mxu1 %v9206_v0 }
 0x443   : > { %6820 = vmatpush3.msra.mxu1 %v9229_v43  ;;  %6884 = vmatpush3.bf16.msra.mxu0 %v9233_v56 }
 0x444   : > { %6821 = vmatprep.subr.mxu1 %v9206_v0  ;;  %6885 = vmatprep.subr.bf16.mxu0 %v9253_v58 }
 0x445   : > { %6786 = vmatmul.mubr.bf16.gmra.mxu0 %v4157_v3  ;;  %6822 = vmatpush3.msra.mxu1 %v9235_v47  ;;  %v7157_v3 = vld [vmem:[%s7731_s13 + $0x18] sm:$0xff]  }
 0x446   : > { %6789 = vmatprep.mubr.bf16.mxu0 %v4158_v22  ;;  %6823 = vmatprep.subr.mxu1 %v9206_v0 }
 0x447   : > { %6824 = vmatpush3.msra.mxu1 %v9241_v27  ;;  %6886 = vmatpush3.bf16.msra.mxu0 %v9253_v58 }
 0x448   : > { %6825 = vmatprep.subr.mxu1 %v9206_v0 }
 0x449   : > { %6826 = vmatpush3.msra.mxu1 %v9245_v10 }
 0x44a   : > { %6827 = vmatprep.subr.mxu1 %v9206_v0 }
 0x44b   : > { %6828 = vmatpush3.msra.mxu1 %v9249_v52 }
 0x44c   : > { %6829 = vmatprep.subr.mxu1 %v9206_v0 }
 0x44d   : > { %6790 = vmatmul.mubr.bf16.gmra.mxu0 %v4159_v38  ;;  %6830 = vmatpush3.msra.mxu1 %v9255_v29  ;;  %v7165_v38 = vld [vmem:[%s7731_s13 + $0x58] sm:$0xff]  }
 0x44e   : > { %6793 = vmatprep.mubr.bf16.mxu0 %v4160_v5  ;;  %6831 = vmatprep.subr.mxu1 %v9206_v0 }
 0x44f   : > { %6832 = vmatpush3.msra.mxu1 %v9261_v60 }
 0x450   : > { %6833 = vmatprep.subr.mxu1 %v9206_v0 }
 0x451   : > { %6834 = vmatpush3.msra.mxu1 %v9268_v6 }
 0x452   : > { %6835 = vmatprep.subr.mxu1 %v9206_v0 }
 0x453   : > { %6836 = vmatpush3.msra.mxu1 %v9270_v8 }
 0x454   : > { %6837 = vmatprep.subr.mxu1 %v9206_v0 }
 0x455   : > { %6794 = vmatmul.mubr.bf16.gmra.mxu0 %v4161_v26  ;;  %6838 = vmatpush3.msra.mxu1 %v9278_v32 }
 0x456   : > { %6797 = vmatprep.mubr.bf16.mxu0 %v4162_v41  ;;  %6839 = vmatprep.subr.mxu1 %v9206_v0 }
 0x457   : > { %6840 = vmatpush3.msra.mxu1 %v9283_v19 }
 0x458   : > { %6844 = vmatprep.subr.mxu1 %v9206_v0 }
 0x45d   : > { %6798 = vmatmul.mubr.bf16.gmra.mxu0 %v4163_v23 }
 0x45e   : > { %6801 = vmatprep.mubr.bf16.mxu0 %v4164_v54 }
 0x465   : > { %6802 = vmatmul.mubr.bf16.gmra.mxu0 %v4165_v31 }
 0x466   : > { %6805 = vmatprep.mubr.bf16.mxu0 %v4166_v63 }
 0x46d   : > { %6806 = vmatmul.mubr.bf16.gmra.mxu0 %v4167_v51 }
 0x46e   : > { %6887 = vmatprep.mubr.msk.bf16.mxu0 %vm734_vm0, %v7154_v36 }
 0x475   : > { %6888 = vmatmul.mubr.msk.bf16.vlgmr.msra.gmra.mxu0 %vm734_vm0, %v7155_v33 }
 0x476   : > { %6891 = vmatprep.mubr.msk.bf16.mxu0 %vm734_vm0, %v7156_v53 }
 0x47d   : > { %6892 = vmatmul.mubr.msk.bf16.gmra.mxu0 %vm734_vm0, %v7157_v3 }
 0x47e   : > { %6895 = vmatprep.mubr.msk.bf16.mxu0 %vm734_vm0, %v7158_v4 }
 0x485   : > { %6896 = vmatmul.mubr.msk.bf16.gmra.mxu0 %vm734_vm0, %v7159_v39 }
 0x486   : > { %6899 = vmatprep.mubr.msk.bf16.mxu0 %vm734_vm0, %v7160_v1 }
 0x48d   : > { %6900 = vmatmul.mubr.msk.bf16.gmra.mxu0 %vm734_vm0, %v7161_v25 }
 0x48e   : > { %6903 = vmatprep.mubr.msk.bf16.mxu0 %vm734_vm0, %v7162_v14 }
 0x495   : > { %6904 = vmatmul.mubr.msk.bf16.gmra.mxu0 %vm734_vm0, %v7163_v9 }
 0x496   : > { %6907 = vmatprep.mubr.msk.bf16.mxu0 %vm734_vm0, %v7164_v30 }
 0x49d   : > { %6908 = vmatmul.mubr.msk.bf16.gmra.mxu0 %vm734_vm0, %v7165_v38 }
 0x49e   : > { %6911 = vmatprep.mubr.msk.bf16.mxu0 %vm734_vm0, %v7166_v17 }
 0x4a5   : > { %6912 = vmatmul.mubr.msk.bf16.gmra.mxu0 %vm734_vm0, %v7167_v15 }
 0x4f5   : > { %v9310_v55 = vpop.f32.mrf.mxu0 }
 0x4f6   : > { %v4434_v61 = vmul.f32 %v9310_v55, %v9310_v55 }
 0x4f7   : > { %v9313_v7 = vpop.f32.mrf.mxu0 }
 0x4f8   : > { %v4432_v18 = vmul.f32 %v9313_v7, %v9313_v7 }
 0x4f9   : > { %v9315_v11 = vpop.f32.mrf.mxu0 }
 0x4fa   : > { %v4435_v13 = vmul.f32 %v9315_v11, %v9315_v11 }
 0x4fb   : > { %v9317_v37 = vpop.f32.mrf.mxu0 }
 0x4fc   : > { %v4395_v26 = vadd.f32 %v9317_v37, %v9313_v7  ;;  %v4433_v46 = vmul.f32 %v9317_v37, %v9317_v37 }
 0x4fd   : > { %v9325_v16 = vpop.f32.mrf.mxu0 }
 0x4fe   : > { %v4396_v23 = vadd.f32 %v9310_v55, %v4395_v26  ;;  %v4464_v22 = vadd.f32 %v4433_v46, %v4432_v18  ;;  %v4438_v51 = vmul.f32 %v9325_v16, %v9325_v16 }
 0x4ff   : > { %v9330_v49 = vpop.f32.mrf.mxu0 }
 0x500   : > { %v4465_v2 = vadd.f32 %v4464_v22, %v4434_v61  ;;  %v4397_v28 = vadd.f32 %v9315_v11, %v4396_v23  ;;  %v4436_v44 = vmul.f32 %v9330_v49, %v9330_v49 }
 0x501   : > { %v9335_v45 = vpop.f32.mrf.mxu0 }
 0x502   : > { %v4398_v31 = vadd.f32 %v4397_v28, %v9330_v49  ;;  %v4466_v5 = vadd.f32 %v4465_v2, %v4435_v13  ;;  %v4439_v36 = vmul.f32 %v9335_v45, %v9335_v45 }
 0x503   : > { %v9340_v48 = vpop.f32.mrf.mxu0 }
 0x504   : > { %v4467_v12 = vadd.f32 %v4466_v5, %v4436_v44  ;;  %v4399_v62 = vadd.f32 %v4398_v31, %v9340_v48  ;;  %v4437_v41 = vmul.f32 %v9340_v48, %v9340_v48 }
 0x505   : > { %v9345_v40 = vpop.f32.mrf.mxu0 }
 0x506   : > { %v4400_v54 = vadd.f32 %v9325_v16, %v4399_v62  ;;  %v4468_v35 = vadd.f32 %v4467_v12, %v4437_v41  ;;  %v4442_v17 = vmul.f32 %v9345_v40, %v9345_v40 }
 0x507   : > { %v9350_v63 = vpop.f32.mrf.mxu0 }
 0x508   : > { %v4469_v33 = vadd.f32 %v4468_v35, %v4438_v51  ;;  %v4401_v53 = vadd.f32 %v9335_v45, %v4400_v54  ;;  %v4440_v39 = vmul.f32 %v9350_v63, %v9350_v63 }
 0x509   : > { %v9355_v3 = vpop.f32.mrf.mxu0 }
 0x50a   : > { %v4402_v4 = vadd.f32 %v4401_v53, %v9350_v63  ;;  %v4470_v1 = vadd.f32 %v4469_v33, %v4439_v36  ;;  %v4443_v46 = vmul.f32 %v9355_v3, %v9355_v3 }
 0x50b   : > { %v9360_v25 = vpop.f32.mrf.mxu0 }
 0x50c   : > { %v4471_v14 = vadd.f32 %v4470_v1, %v4440_v39  ;;  %v4403_v9 = vadd.f32 %v4402_v4, %v9360_v25  ;;  %v4441_v30 = vmul.f32 %v9360_v25, %v9360_v25 }
 0x50d   : > { %v9365_v38 = vpop.f32.mrf.mxu0 }
 0x50e   : > { %v4404_v15 = vadd.f32 %v9345_v40, %v4403_v9  ;;  %v4472_v18 = vadd.f32 %v4471_v14, %v4441_v30  ;;  %v4446_v41 = vmul.f32 %v9365_v38, %v9365_v38 }
 0x50f   : > { %v9370_v26 = vpop.f32.mrf.mxu0 }
 0x510   : > { %v4473_v61 = vadd.f32 %v4472_v18, %v4442_v17  ;;  %v4405_v23 = vadd.f32 %v9355_v3, %v4404_v15  ;;  %v4444_v2 = vmul.f32 %v9370_v26, %v9370_v26 }
 0x511   : > { %v9375_v22 = vpop.f32.mrf.mxu0 }
 0x512   : > { %v4406_v13 = vadd.f32 %v4405_v23, %v9370_v26  ;;  %v4474_v28 = vadd.f32 %v4473_v61, %v4443_v46  ;;  %v4447_v36 = vmul.f32 %v9375_v22, %v9375_v22 }
 0x513   : > { %v9380_v31 = vpop.f32.mrf.mxu0 }
 0x514   : > { %v4475_v44 = vadd.f32 %v4474_v28, %v4444_v2  ;;  %v4407_v5 = vadd.f32 %v4406_v13, %v9380_v31  ;;  %v4445_v12 = vmul.f32 %v9380_v31, %v9380_v31 }
 0x515   : > { %v9385_v62 = vpop.f32.mrf.mxu0 }
 0x516   : > { %v4408_v51 = vadd.f32 %v9365_v38, %v4407_v5  ;;  %v4476_v54 = vadd.f32 %v4475_v44, %v4445_v12  ;;  %v4450_v46 = vmul.f32 %v9385_v62, %v9385_v62 }
 0x517   : > { %v9390_v35 = vpop.f32.mrf.mxu0 }
 0x518   : > { %v4477_v33 = vadd.f32 %v4476_v54, %v4446_v41  ;;  %v4409_v53 = vadd.f32 %v9375_v22, %v4408_v51  ;;  %v4448_v1 = vmul.f32 %v9390_v35, %v9390_v35 }
 0x519   : > { %v9395_v4 = vpop.f32.mrf.mxu0 }
 0x51a   : > { %v4410_v39 = vadd.f32 %v4409_v53, %v9390_v35  ;;  %v4478_v14 = vadd.f32 %v4477_v33, %v4447_v36  ;;  %v4451_v2 = vmul.f32 %v9395_v4, %v9395_v4 }
 0x51b   : > { %v9400_v9 = vpop.f32.mrf.mxu0 }
 0x51c   : > { %v4479_v30 = vadd.f32 %v4478_v14, %v4448_v1  ;;  %v4411_v17 = vadd.f32 %v4410_v39, %v9400_v9  ;;  %v4449_v15 = vmul.f32 %v9400_v9, %v9400_v9 }
 0x51d   : > { %v9405_v18 = vpop.f32.mrf.mxu0 }
 0x51e   : > { %10143 = vst [vmem:[#allocation53_spill] sm:$0xff] %v9405_v18  ;;  %v4412_v61 = vadd.f32 %v9385_v62, %v4411_v17  ;;  %v4480_v23 = vadd.f32 %v4479_v30, %v4449_v15  ;;  %v4454_v1 = vmul.f32 %v9405_v18, %v9405_v18 }
 0x51f   : > { %v9410_v13 = vpop.f32.mrf.mxu0 }
 0x520   : > { %v4481_v28 = vadd.f32 %v4480_v23, %v4450_v46  ;;  %v4413_v44 = vadd.f32 %v9395_v4, %v4412_v61  ;;  %v4452_v41 = vmul.f32 %v9410_v13, %v9410_v13 }
 0x521   : > { %v9415_v5 = vpop.f32.mrf.mxu0 }
 0x522   : > { %10144 = vst [vmem:[#allocation39_spill] sm:$0xff] %v9415_v5  ;;  %v4414_v12 = vadd.f32 %v4413_v44, %v9410_v13  ;;  %v4482_v51 = vadd.f32 %v4481_v28, %v4451_v2  ;;  %v4455_v23 = vmul.f32 %v9415_v5, %v9415_v5 }
 0x523   : > { %v9420_v54 = vpop.f32.mrf.mxu0 }
 0x524   : > { %10145 = vst [vmem:[#allocation25_spill] sm:$0xff] %v9420_v54  ;;  %v4483_v36 = vadd.f32 %v4482_v51, %v4452_v41  ;;  %v4415_v33 = vadd.f32 %v4414_v12, %v9420_v54  ;;  %v4453_v53 = vmul.f32 %v9420_v54, %v9420_v54 }
 0x525   : > { %v9425_v39 = vpop.f32.mrf.mxu0 }
 0x526   : > { %10146 = vst [vmem:[#allocation26_spill] sm:$0xff] %v9425_v39  ;;  %v4416_v14 = vadd.f32 %v9405_v18, %v4415_v33  ;;  %v4484_v30 = vadd.f32 %v4483_v36, %v4453_v53 }
 0x527   : > { %v9430_v17 = vpop.f32.mrf.mxu0 }
 0x528   : > { %10147 = vst [vmem:[#allocation37_spill] sm:$0xff] %v9430_v17  ;;  %v4485_v15 = vadd.f32 %v4484_v30, %v4454_v1  ;;  %v4417_v46 = vadd.f32 %v9415_v5, %v4416_v14  ;;  %v4456_v51 = vmul.f32 %v9430_v17, %v9430_v17 }
 0x529   : > { %v9433_v61 = vpop.f32.mrf.mxu0 }
 0x52a   : > { %v4418_v2 = vadd.f32 %v4417_v46, %v9430_v17  ;;  %v4486_v44 = vadd.f32 %v4485_v15, %v4455_v23 }
 0x52b   : > { %v9438_v28 = vpop.f32.mrf.mxu0 }
 0x52c   : > { %10148 = vst [vmem:[#allocation51_spill] sm:$0xff] %v9438_v28  ;;  %v4419_v12 = vadd.f32 %v4418_v2, %v9438_v28  ;;  %v4487_v53 = vadd.f32 %v4486_v44, %v4456_v51  ;;  %v4457_v1 = vmul.f32 %v9438_v28, %v9438_v28 }
 0x52d   : > { %v9441_v41 = vpop.f32.mrf.mxu0 }
 0x52e   : > { %v4420_v36 = vadd.f32 %v9425_v39, %v4419_v12  ;;  %v4488_v23 = vadd.f32 %v4487_v53, %v4457_v1  ;;  %v4458_v12 = vmul.f32 %v9425_v39, %v9425_v39 }
 0x52f   : > { %v9446_v33 = vpop.f32.mrf.mxu0 }
 0x530   : > { %v4421_v14 = vadd.f32 %v9433_v61, %v4420_v36  ;;  %v4489_v44 = vadd.f32 %v4488_v23, %v4458_v12  ;;  %v4459_v36 = vmul.f32 %v9433_v61, %v9433_v61 }
 0x531   : > { %v9451_v30 = vpop.f32.mrf.mxu0 }
 0x532   : > { %v4422_v15 = vadd.f32 %v4421_v14, %v9446_v33  ;;  %v4490_v5 = vadd.f32 %v4489_v44, %v4459_v36  ;;  %v4460_v14 = vmul.f32 %v9446_v33, %v9446_v33 }
 0x533   : > { %v9454_v46 = vpop.f32.mrf.mxu0 }
 0x534   : > { %v4423_v2 = vadd.f32 %v4422_v15, %v9454_v46  ;;  %v4491_v1 = vadd.f32 %v4490_v5, %v4460_v14  ;;  %v4461_v39 = vmul.f32 %v9454_v46, %v9454_v46 }
 0x536   : > { %v4424_v17 = vadd.f32 %v9441_v41, %v4423_v2  ;;  %v4492_v23 = vadd.f32 %v4491_v1, %v4461_v39 }
 0x538   : > { %v4425_v51 = vadd.f32 %v9451_v30, %v4424_v17  ;;  %v4462_v17 = vmul.f32 %v9441_v41, %v9441_v41 }
 0x53a   : > { %v4426_v28 = vrot.slane %v4425_v51, 4 }
 0x53c   : > { %v4427_v18 = vadd.f32 %v4426_v28, %v4425_v51  ;;  %v4493_v28 = vadd.f32 %v4492_v23, %v4462_v17 }
 0x53e   : > { %v4428_v53 = vrot.slane %v4427_v18, 2 }
 0x540   : > { %v4429_v15 = vadd.f32 %v4428_v53, %v4427_v18  ;;  %v4463_v18 = vmul.f32 %v9451_v30, %v9451_v30 }
 0x542   : > { %v4430_v54 = vrot.slane %v4429_v15, 1  ;;  %v4494_v5 = vadd.f32 %v4493_v28, %v4463_v18 }
 0x544   : > { %v4431_v2 = vadd.f32 %v4430_v54, %v4429_v15 }
 0x546   : > { %6842 = vmatmul.mubr.f32.vlgmr.msra.gmra.mxu1 %v4431_v2 }
 0x547   : > { %6845 = vmatpush3.msra.mxu1 %v9203_v59  ;;  %6876 = vmatprep.mubr.msk.f32.mxu1 %vm7455_vm1, %v9206_v0  ;;  %v4495_v59 = vrot.slane %v4494_v5, 4 }
 0x548   : > { %6846 = vmatprep.subr.mxu1 %v9206_v0 }
 0x549   : > { %6847 = vmatpush3.msra.mxu1 %v9209_v42  ;;  %v4496_v42 = vadd.f32 %v4495_v59, %v4494_v5 }
 0x54a   : > { %6848 = vmatprep.subr.mxu1 %v9206_v0 }
 0x54b   : > { %6849 = vmatpush3.msra.mxu1 %v9215_v34  ;;  %v4497_v34 = vrot.slane %v4496_v42, 2 }
 0x54c   : > { %6850 = vmatprep.subr.mxu1 %v9206_v0 }
 0x54d   : > { %6851 = vmatpush3.msra.mxu1 %v9221_v50  ;;  %v4498_v50 = vadd.f32 %v4497_v34, %v4496_v42 }
 0x54e   : > { %6852 = vmatprep.subr.mxu1 %v9206_v0 }
 0x54f   : > { %6853 = vmatpush3.msra.mxu1 %v9225_v20  ;;  %v4499_v20 = vrot.slane %v4498_v50, 1 }
 0x550   : > { %6854 = vmatprep.subr.mxu1 %v9206_v0 }
 0x551   : > { %6855 = vmatpush3.msra.mxu1 %v9229_v43  ;;  %v7168_v43 = vld [vmem:[%s7731_s13 + $0x70] sm:$0xff]  }
 0x552   : > { %6856 = vmatprep.subr.mxu1 %v9206_v0 }
 0x553   : > { %6857 = vmatpush3.msra.mxu1 %v9235_v47  ;;  %v4500_v47 = vadd.f32 %v4499_v20, %v4498_v50 }
 0x554   : > { %6858 = vmatprep.subr.mxu1 %v9206_v0 }
 0x555   : > { %6859 = vmatpush3.msra.mxu1 %v9241_v27  ;;  %v9516_v27 = vpop.f32.mrf.mxu0 }
 0x556   : > { %6860 = vmatprep.subr.mxu1 %v9206_v0 }
 0x557   : > { %6861 = vmatpush3.msra.mxu1 %v9245_v10 }
 0x558   : > { %6862 = vmatprep.subr.mxu1 %v9206_v0 }
 0x559   : > { %6863 = vmatpush3.msra.mxu1 %v9249_v52 }
 0x55a   : > { %6864 = vmatprep.subr.mxu1 %v9206_v0 }
 0x55b   : > { %6865 = vmatpush3.msra.mxu1 %v9255_v29 }
 0x55c   : > { %6866 = vmatprep.subr.mxu1 %v9206_v0 }
 0x55d   : > { %6867 = vmatpush3.msra.mxu1 %v9261_v60  ;;  %v5118_v60 = vmul.f32 %v9516_v27, %v9516_v27 }
 0x55e   : > { %6868 = vmatprep.subr.mxu1 %v9206_v0 }
 0x55f   : > { %6869 = vmatpush3.msra.mxu1 %v9268_v6 }
 0x560   : > { %6870 = vmatprep.subr.mxu1 %v9206_v0 }
 0x561   : > { %6871 = vmatpush3.msra.mxu1 %v9270_v8 }
 0x562   : > { %6872 = vmatprep.subr.mxu1 %v9206_v0 }
 0x563   : > { %6873 = vmatpush3.msra.mxu1 %v9278_v32 }
 0x564   : > { %6874 = vmatprep.subr.mxu1 %v9206_v0  ;;  %v7169_v0 = vld [vmem:[%s7731_s13 + $0x78] sm:$0xff]   ;;  %s9868_s13 = scalar_lea.vmem [#allocation15], %s5649_s27  ;;  %s5879_s27 = sshll.u32 %s7555_s19, 11 }
 0x565   : > { %6875 = vmatpush3.msra.mxu1 %v9283_v19  ;;  %s5506_s2 = sshll.u32 %s9868_s13, 4  ;;  %s9934_s20 = scalar_lea.hbm %s10211_s6, %s5879_s27  ;;  %s9936_s2 = int_to_ptr.vmem [resolvable:$true] %s5506_s2 }
 0x566   : > { %6877 = vmatmul.mubr.f32.vlgmr.msra.gmra.mxu1 %v4500_v47  ;;  %6927 = vmatprep.subr.bf16.mxu1 %v9199_v24  ;;  %s7364_s14 = scalar_lea.vmem %s9936_s2, 2048  ;;  %p7371_p13 = scmp.lt.s32.totalorder %s9936_s2, %s7369_s28 }
 0x567   : > { %6931 = vmatpush3.bf16.msra.mxu1 %v9199_v24  ;;  %6915 = vmatprep.mubr.msk.bf16.mxu1 %vm734_vm0, %v7168_v43  ;;  %v9518_v24 = vpop.f32.mrf.mxu0  ;;  %p7365_p9 = scmp.ne.s32.totalorder %s9936_s2, %s7364_s14  ;;  %p7372_p5 = scmp.lt.s32.totalorder %s7370_s25, %s7364_s14 }
 0x568   : > { %6928 = vmatprep.subr.bf16.mxu1 %v9213_v21 }
 0x569   : > { %v9520_v10 = vpop.f32.mrf.mxu0  ;;  %p7366_p10 = pnand %p7365_p9, %p10212_p8  ;;  %p7373_p1 = por %p7372_p5, %p7371_p13 }
 0x56a   : > { %v5119_v19 = vmul.f32 %v9520_v10, %v9520_v10 }
 0x56b   : > { %6932 = vmatpush3.bf16.msra.mxu1 %v9213_v21  ;;  %v9522_v52 = vpop.f32.mrf.mxu0  ;;  %v5116_v21 = vmul.f32 %v9518_v24, %v9518_v24  ;;  %p7367_p11 = pneg %p7366_p10 }
 0x56c   : > { %6929 = vmatprep.subr.bf16.mxu1 %v9233_v56  ;;  %v5117_v29 = vmul.f32 %v9522_v52, %v9522_v52 }
 0x56d   : > { %p7374_p3 = pnand %p7373_p1, %p7367_p11 }
 0x56e   : > { %v5148_v8 = vadd.f32 %v5117_v29, %v5116_v21 }
 0x56f   : > { %6933 = vmatpush3.bf16.msra.mxu1 %v9233_v56  ;;  %v5079_v56 = vadd.f32 %v9522_v52, %v9518_v24 }
 0x570   : > { %6930 = vmatprep.subr.bf16.mxu1 %v9253_v58  ;;  %v5149_v54 = vadd.f32 %v5148_v8, %v5118_v60 }
 0x571   : > { %v5080_v6 = vadd.f32 %v9516_v27, %v5079_v56 }
 0x572   : > { %v5150_v36 = vadd.f32 %v5149_v54, %v5119_v19 }
 0x573   : > { %6934 = vmatpush3.bf16.msra.mxu1 %v9253_v58  ;;  %v9530_v58 = vpop.f32.mrf.mxu0  ;;  %v5081_v39 = vadd.f32 %v9520_v10, %v5080_v6 }
 0x574   : > { %v5122_v23 = vmul.f32 %v9530_v58, %v9530_v58 }
 0x575   : > { %v9535_v32 = vpop.f32.mrf.mxu0 }
 0x576   : > { %6916 = vmatmul.mubr.msk.bf16.vlgmr.msra.gmra.mxu1 %vm734_vm0, %v7169_v0  ;;  %v5082_v44 = vadd.f32 %v5081_v39, %v9535_v32  ;;  %v5120_v51 = vmul.f32 %v9535_v32, %v9535_v32 }
 0x577   : > { %v9540_v12 = vpop.f32.mrf.mxu0 }
 0x578   : > { %v5151_v53 = vadd.f32 %v5150_v36, %v5120_v51  ;;  %v5123_v5 = vmul.f32 %v9540_v12, %v9540_v12 }
 0x579   : > { %v9545_v14 = vpop.f32.mrf.mxu0 }
 0x57a   : > { %v5083_v1 = vadd.f32 %v5082_v44, %v9545_v14  ;;  %v5121_v15 = vmul.f32 %v9545_v14, %v9545_v14 }
 0x57b   : > { %v9550_v2 = vpop.f32.mrf.mxu0 }
 0x57c   : > { %v5084_v17 = vadd.f32 %v9530_v58, %v5083_v1  ;;  %v5152_v28 = vadd.f32 %v5151_v53, %v5121_v15  ;;  %v5126_v60 = vmul.f32 %v9550_v2, %v9550_v2 }
 0x57d   : > { %v9555_v18 = vpop.f32.mrf.mxu0 }
 0x57e   : > { %v5153_v59 = vadd.f32 %v5152_v28, %v5122_v23  ;;  %v5085_v42 = vadd.f32 %v9540_v12, %v5084_v17  ;;  %v5124_v20 = vmul.f32 %v9555_v18, %v9555_v18 }
 0x57f   : > { %v9560_v34 = vpop.f32.mrf.mxu0 }
 0x580   : > { %v5086_v50 = vadd.f32 %v5085_v42, %v9555_v18  ;;  %v5154_v43 = vadd.f32 %v5153_v59, %v5123_v5  ;;  %v5127_v39 = vmul.f32 %v9560_v34, %v9560_v34 }
 0x581   : > { %v9565_v47 = vpop.f32.mrf.mxu0 }
 0x582   : > { %v5155_v0 = vadd.f32 %v5154_v43, %v5124_v20  ;;  %v5087_v21 = vadd.f32 %v5086_v50, %v9565_v47  ;;  %v5125_v56 = vmul.f32 %v9565_v47, %v9565_v47 }
 0x583   : > { %v9570_v29 = vpop.f32.mrf.mxu0 }
 0x584   : > { %10149 = vst [vmem:[#allocation38_spill] sm:$0xff] %v9570_v29  ;;  %v5088_v6 = vadd.f32 %v9550_v2, %v5087_v21  ;;  %v5156_v8 = vadd.f32 %v5155_v0, %v5125_v56  ;;  %v5130_v50 = vmul.f32 %v9570_v29, %v9570_v29 }
 0x585   : > { %v9575_v19 = vpop.f32.mrf.mxu0 }
 0x586   : > { %10150 = vst [vmem:[#allocation41_spill] sm:$0xff] %v9575_v19  ;;  %v5157_v44 = vadd.f32 %v5156_v8, %v5126_v60  ;;  %v5089_v51 = vadd.f32 %v9560_v34, %v5088_v6  ;;  %v5128_v15 = vmul.f32 %v9575_v19, %v9575_v19 }
 0x587   : > { %v9580_v53 = vpop.f32.mrf.mxu0 }
 0x588   : > { %10151 = vst [vmem:[#allocation27_spill] sm:$0xff] %v9580_v53  ;;  %v5090_v1 = vadd.f32 %v5089_v51, %v9575_v19  ;;  %v5158_v23 = vadd.f32 %v5157_v44, %v5127_v39  ;;  %v5131_v21 = vmul.f32 %v9580_v53, %v9580_v53 }
 0x589   : > { %v9585_v17 = vpop.f32.mrf.mxu0 }
 0x58a   : > { %10152 = vst [vmem:[#allocation28_spill] sm:$0xff] %v9585_v17  ;;  %v5159_v28 = vadd.f32 %v5158_v23, %v5128_v15  ;;  %v5091_v5 = vadd.f32 %v5090_v1, %v9585_v17  ;;  %v5129_v59 = vmul.f32 %v9585_v17, %v9585_v17 }
 0x58b   : > { %v9590_v42 = vpop.f32.mrf.mxu0 }
 0x58c   : > { %10153 = vst [vmem:[#allocation43_spill] sm:$0xff] %v9590_v42  ;;  %v5092_v20 = vadd.f32 %v9570_v29, %v5091_v5  ;;  %v5160_v43 = vadd.f32 %v5159_v28, %v5129_v59  ;;  %v5134_v28 = vmul.f32 %v9590_v42, %v9590_v42 }
 0x58d   : > { %v9595_v0 = vpop.f32.mrf.mxu0 }
 0x58e   : > { %10154 = vst [vmem:[#allocation29_spill] sm:$0xff] %v9595_v0  ;;  %v5161_v56 = vadd.f32 %v5160_v43, %v5130_v50  ;;  %v5093_v60 = vadd.f32 %v9580_v53, %v5092_v20  ;;  %v5132_v39 = vmul.f32 %v9595_v0, %v9595_v0 }
 0x58f   : > { %v9600_v6 = vpop.f32.mrf.mxu0 }
 0x590   : > { %10155 = vst [vmem:[#allocation30_spill] sm:$0xff] %v9600_v6  ;;  %v5094_v8 = vadd.f32 %v5093_v60, %v9595_v0  ;;  %v5162_v44 = vadd.f32 %v5161_v56, %v5131_v21  ;;  %v5135_v43 = vmul.f32 %v9600_v6, %v9600_v6 }
 0x591   : > { %v9605_v51 = vpop.f32.mrf.mxu0 }
 0x592   : > { %10156 = vst [vmem:[#allocation40_spill] sm:$0xff] %v9605_v51  ;;  %v5095_v1 = vadd.f32 %v5094_v8, %v9605_v51  ;;  %v5133_v15 = vmul.f32 %v9605_v51, %v9605_v51 }
 0x593   : > { %v9610_v23 = vpop.f32.mrf.mxu0 }
 0x594   : > { %10157 = vst [vmem:[#allocation42_spill] sm:$0xff] %v9610_v23  ;;  %v5096_v5 = vadd.f32 %v9590_v42, %v5095_v1 }
 0x595   : > { %v9615_v50 = vpop.f32.mrf.mxu0 }
 0x596   : > { %10158 = vst [vmem:[#allocation45_spill] sm:$0xff] %v9615_v50  ;;  %v5097_v56 = vadd.f32 %v9600_v6, %v5096_v5  ;;  %v5138_v5 = vmul.f32 %v9610_v23, %v9610_v23 }
 0x597   : > { %v9620_v60 = vpop.f32.mrf.mxu0 }
 0x598   : > { %10159 = vst [vmem:[#allocation31_spill] sm:$0xff] %v9620_v60 }
 0x599   : > { %v9625_v1 = vpop.f32.mrf.mxu0 }
 0x59a   : > { %10160 = vst [vmem:[#allocation32_spill] sm:$0xff] %v9625_v1  ;;  %v5137_v42 = vmul.f32 %v9625_v1, %v9625_v1 }
 0x606   : > { %v4567_v54 = vpop.f32.mrf.mxu1 }
 0x608   : > { %v6843_v36 = vpop.f32.mrf.mxu1 }
 0x609   : > { %v5163_v36 = vadd.f32 %v5162_v44, %v5132_v39  ;;  %v5098_v39 = vadd.f32 %v5097_v56, %v9615_v50  ;;  %v5136_v44 = vmul.f32 %v9615_v50, %v9615_v50 }
 0x60b   : > { %v5164_v59 = vadd.f32 %v5163_v36, %v5133_v15  ;;  %v5099_v15 = vadd.f32 %v5098_v39, %v9625_v1 }
 0x60d   : > { %v5165_v21 = vadd.f32 %v5164_v59, %v5134_v28  ;;  %v9630_v28 = vpop.f32.mrf.mxu0  ;;  %v5100_v59 = vadd.f32 %v9610_v23, %v5099_v15 }
 0x60e   : > { %10161 = vst [vmem:[#allocation47_spill] sm:$0xff] %v9630_v28 }
 0x60f   : > { %v5166_v51 = vadd.f32 %v5165_v21, %v5135_v43  ;;  %v5139_v43 = vmul.f32 %v9620_v60, %v9620_v60 }
 0x611   : > { %v5167_v36 = vadd.f32 %v5166_v51, %v5136_v44  ;;  %v5101_v51 = vadd.f32 %v9620_v60, %v5100_v59 }
 0x613   : > { %v5168_v56 = vadd.f32 %v5167_v36, %v5137_v42  ;;  %v4641_v42 = vmul.f32 0.0009765625, %v4567_v54 }
 0x615   : > { %v5169_v21 = vadd.f32 %v5168_v56, %v5138_v5  ;;  %v4643_v60 = vmul.f32 %v4641_v42, %v4641_v42 }
 0x617   : > { %v5170_v50 = vadd.f32 %v5169_v21, %v5139_v43 }
 0x626   : > { %v4637_v20 = vpop.f32.mrf.mxu1 }
 0x627   : > { %v4642_v56 = vmul.f32 0.0009765625, %v4637_v20 }
 0x628   : > { %v6878_v8 = vpop.f32.mrf.mxu1 }
 0x629   : > { %v9635_v8 = vpop.f32.mrf.mxu0  ;;  %v4644_v0 = vsub.f32 %v4642_v56, %v4643_v60 }
 0x62a   : > { %10162 = vst [vmem:[#allocation33_spill] sm:$0xff] %v9635_v8  ;;  %v5102_v44 = vadd.f32 %v5101_v51, %v9635_v8  ;;  %v5140_v1 = vmul.f32 %v9635_v8, %v9635_v8  ;;  %v5142_v51 = vmul.f32 %v9630_v28, %v9630_v28 }
 0x62b   : > { %v9640_v39 = vpop.f32.mrf.mxu0 }
 0x62c   : > { %10163 = vst [vmem:[#allocation34_spill] sm:$0xff] %v9640_v39  ;;  %v5171_v36 = vadd.f32 %v5170_v50, %v5140_v1  ;;  %v5143_v54 = vmul.f32 %v9640_v39, %v9640_v39 }
 0x62d   : > { %v9645_v6 = vpop.f32.mrf.mxu0 }
 0x62e   : > { %10164 = vst [vmem:[#allocation44_spill] sm:$0xff] %v9645_v6  ;;  %v5103_v23 = vadd.f32 %v5102_v44, %v9645_v6  ;;  %v5141_v5 = vmul.f32 %v9645_v6, %v9645_v6  ;;  %v4645_v6 = vadd.f32 1e-06, %v4644_v0 }
 0x630   : > { %v5104_v43 = vadd.f32 %v9630_v28, %v5103_v23  ;;  %v5172_v21 = vadd.f32 %v5171_v36, %v5141_v5  ;;  %7174 = vrsqrt.f32 %v4645_v6 }
 0x632   : > { %v5173_v50 = vadd.f32 %v5172_v21, %v5142_v51  ;;  %v5105_v1 = vadd.f32 %v9640_v39, %v5104_v43 }
 0x634   : > { %v5174_v29 = vadd.f32 %v5173_v50, %v5143_v54 }
 0x636   : > { %v9647_v15 = vpop.f32.mrf.mxu1 }
 0x637   : > { %10165 = vst [vmem:[#allocation46_spill] sm:$0xff] %v9647_v15  ;;  %v5146_v5 = vmul.f32 %v9647_v15, %v9647_v15 }
 0x638   : > { %v9652_v59 = vpop.f32.mrf.mxu1 }
 0x639   : > { %v5106_v20 = vadd.f32 %v5105_v1, %v9652_v59  ;;  %v5144_v53 = vmul.f32 %v9652_v59, %v9652_v59 }
 0x63a   : > { %v9657_v8 = vpop.f32.mrf.mxu1 }
 0x63b   : > { %v5175_v36 = vadd.f32 %v5174_v29, %v5144_v53  ;;  %v5147_v0 = vmul.f32 %v9657_v8, %v9657_v8 }
 0x63c   : > { %v9662_v44 = vpop.f32.mrf.mxu1 }
 0x63d   : > { %v5107_v23 = vadd.f32 %v5106_v20, %v9662_v44  ;;  %v5145_v60 = vmul.f32 %v9662_v44, %v9662_v44  ;;  %v7175_v53 = vpop.eup %7174 }
 0x63f   : > { %v5108_v56 = vadd.f32 %v9647_v15, %v5107_v23  ;;  %v5176_v51 = vadd.f32 %v5175_v36, %v5145_v60  ;;  %v4393_v23 = vld [vmem:[%s9998_s9] sm:$0x1] }
 0x640   : > { %v4647_v15 = vmul.f32 %v7175_v53, %v4393_v23 }
 0x641   : > { %v5109_v43 = vadd.f32 %v9657_v8, %v5108_v56  ;;  %v5177_v21 = vadd.f32 %v5176_v51, %v5146_v5 }
 0x642   : > { %v4648_v51 = vmul.f32 %v4647_v15, %v4641_v42 }
 0x643   : > { %v5110_v54 = vrot.slane %v5109_v43, 4  ;;  %v5178_v50 = vadd.f32 %v5177_v21, %v5147_v0 }
 0x645   : > { %v5111_v1 = vadd.f32 %v5110_v54, %v5109_v43  ;;  %v5179_v20 = vrot.slane %v5178_v50, 4  ;;  %v4653_v54 = vrot.slane %v4647_v15, %v10142_v57 }
 0x647   : > { %v5112_v39 = vrot.slane %v5111_v1, 2  ;;  %v5180_v28 = vadd.f32 %v5179_v20, %v5178_v50  ;;  %v4657_v42 = vmul.f32 %v9315_v11, %v4653_v54  ;;  %v4660_v15 = vmul.f32 %v9325_v16, %v4653_v54 }
 0x648   : > { %v4661_v53 = vmul.f32 %v9335_v45, %v4653_v54  ;;  %v4662_v23 = vmul.f32 %v4653_v54, %v9350_v63  ;;  %v4666_v11 = vmul.f32 %v4653_v54, %v9370_v26  ;;  %v4670_v16 = vmul.f32 %v4653_v54, %v9390_v35 }
 0x649   : > { %v5113_v6 = vadd.f32 %v5112_v39, %v5111_v1  ;;  %v5181_v29 = vrot.slane %v5180_v28, 2  ;;  %v4394_v39 = vld [vmem:[%s9999_s10] sm:$0x1]  ;;  %v4654_v1 = vmul.f32 %v4653_v54, %v9313_v7  ;;  %v4663_v7 = vmul.f32 %v4653_v54, %v9360_v25 }
 0x64a   : > { %v4649_v50 = vsub.f32 %v4394_v39, %v4648_v51  ;;  %v4671_v45 = vmul.f32 %v4653_v54, %v9400_v9  ;;  %v4672_v63 = vmul.f32 %v9385_v62, %v4653_v54  ;;  %v4673_v25 = vmul.f32 %v9395_v4, %v4653_v54  ;;  %v10168_v51 = vld [vmem:[#allocation39_spill] sm:$0xff]  ;;  %v10171_v39 = vld [vmem:[#allocation26_spill] sm:$0xff] }
 0x64b   : > { %v5114_v60 = vrot.slane %v5113_v6, 1  ;;  %v5182_v36 = vadd.f32 %v5181_v29, %v5180_v28  ;;  %v4659_v29 = vmul.f32 %v4653_v54, %v9340_v48  ;;  %v4669_v48 = vmul.f32 %v9375_v22, %v4653_v54 }
 0x64c   : > { %v9692_v20 = vrot.slane %v4649_v50, %v10142_v57  ;;  %v4680_v35 = vmul.f32 %v10171_v39, %v4653_v54  ;;  %v4681_v9 = vmul.f32 %v9433_v61, %v4653_v54  ;;  %v4682_v62 = vmul.f32 %v4653_v54, %v9446_v33 }
 0x64d   : > { %v5115_v17 = vadd.f32 %v5114_v60, %v5113_v6  ;;  %v5183_v19 = vrot.slane %v5182_v36, 1  ;;  %v4658_v6 = vmul.f32 %v4653_v54, %v9330_v49  ;;  %v4667_v60 = vmul.f32 %v4653_v54, %v9380_v31 }
 0x64e   : > { %v4668_v49 = vmul.f32 %v9365_v38, %v4653_v54  ;;  %v4677_v31 = vmul.f32 %v10168_v51, %v4653_v54  ;;  %v4683_v4 = vmul.f32 %v4653_v54, %v9454_v46  ;;  %v9723_v50 = vadd.f32 %v9692_v20, %v4654_v1 }
 0x64f   : > { %v5184_v56 = vadd.f32 %v5183_v19, %v5182_v36  ;;  %v9679_v5 = vmul.f32 0.00390625, %v5115_v17  ;;  %v4655_v19 = vmul.f32 %v4653_v54, %v9317_v37  ;;  %v4656_v17 = vmul.f32 %v9310_v55, %v4653_v54  ;;  %v10166_v36 = vld [vmem:[#allocation25_spill] sm:$0xff] }
 0x650   : > { %v4664_v37 = vmul.f32 %v9345_v40, %v4653_v54  ;;  %v4665_v55 = vmul.f32 %v9355_v3, %v4653_v54  ;;  %v4674_v40 = vmul.f32 %v4653_v54, %v9410_v13  ;;  %v4675_v3 = vmul.f32 %v4653_v54, %v10166_v36 }
 0x651   : > { %v5186_v0 = vmul.f32 0.00390625, %v5184_v56  ;;  %v5187_v43 = vmul.f32 %v9679_v5, %v9679_v5  ;;  %v10167_v56 = vld [vmem:[#allocation53_spill] sm:$0xff]  ;;  %v4684_v13 = vmul.f32 %v9441_v41, %v4653_v54  ;;  %v9729_v36 = vadd.f32 %v9692_v20, %v4656_v17 }
 0x652   : > { %v4676_v26 = vmul.f32 %v10167_v56, %v4653_v54  ;;  %v9732_v56 = vadd.f32 %v9692_v20, %v4657_v42  ;;  %v9735_v61 = vadd.f32 %v9692_v20, %v4658_v6  ;;  %v9738_v33 = vadd.f32 %v9692_v20, %v4659_v29 }
 0x653   : > { %v5188_v21 = vsub.f32 %v5186_v0, %v5187_v43  ;;  %v10169_v0 = vld [vmem:[#allocation37_spill] sm:$0xff]  ;;  %v10170_v43 = vld [vmem:[#allocation51_spill] sm:$0xff]  ;;  %v9741_v41 = vadd.f32 %v9692_v20, %v4660_v15  ;;  %v9747_v46 = vadd.f32 %v9692_v20, %v4662_v23  ;;  %v9753_v1 = vadd.f32 %v9692_v20, %v4664_v37 }
 0x654   : > { %v4678_v38 = vmul.f32 %v4653_v54, %v10169_v0  ;;  %v4679_v22 = vmul.f32 %v4653_v54, %v10170_v43  ;;  %v9759_v17 = vadd.f32 %v9692_v20, %v4665_v55  ;;  %v9762_v42 = vadd.f32 %v9692_v20, %v4666_v11 }
 0x655   : > { %v5189_v28 = vadd.f32 1e-05, %v5188_v21  ;;  %v4685_v21 = vmul.f32 %v9451_v30, %v4653_v54  ;;  %v9744_v30 = vadd.f32 %v9692_v20, %v4661_v53  ;;  %v9750_v54 = vadd.f32 %v9692_v20, %v4663_v7 }
 0x656   : > { %v9765_v6 = vadd.f32 %v9692_v20, %v4667_v60  ;;  %v9768_v29 = vadd.f32 %v9692_v20, %v4668_v49  ;;  %v9771_v53 = vadd.f32 %v9692_v20, %v4669_v48  ;;  %v9774_v23 = vadd.f32 %v9692_v20, %v4670_v16 }
 0x657   : > { %7176 = vrsqrt.f32 %v5189_v28  ;;  %v9726_v28 = vadd.f32 %v9692_v20, %v4655_v19  ;;  %v5077_v19 = vld [vmem:[%s10000_s11] sm:$0x1]  ;;  %v9777_v7 = vadd.f32 %v9692_v20, %v4671_v45  ;;  %v9780_v37 = vadd.f32 %v9692_v20, %v4672_v63 }
 0x658   : > { %v9783_v55 = vadd.f32 %v9692_v20, %v4673_v25  ;;  %v9786_v11 = vadd.f32 %v9692_v20, %v4674_v40  ;;  %v9789_v60 = vadd.f32 %v9692_v20, %v4675_v3  ;;  %v9792_v48 = vadd.f32 %v9692_v20, %v4676_v26  ;;  %v5078_v25 = vld [vmem:[%s10001_s12] sm:$0x1] }
 0x659   : > { %v9795_v16 = vadd.f32 %v9692_v20, %v4677_v31  ;;  %v9798_v45 = vadd.f32 %v9692_v20, %v4678_v38  ;;  %v9801_v63 = vadd.f32 %v9692_v20, %v4679_v22  ;;  %v9807_v40 = vadd.f32 %v9692_v20, %v4680_v35 }
 0x65a   : > { %10172 = vst [vmem:[#allocation49_spill] sm:$0xff] %v9783_v55  ;;  %10173 = vst [vmem:[#allocation35_spill] sm:$0xff] %v9786_v11  ;;  %v9810_v3 = vadd.f32 %v9692_v20, %v4681_v9  ;;  %v4720_v31 = vadd.f32 %v9692_v20, %v4682_v62  ;;  %v4721_v0 = vadd.f32 %v9692_v20, %v4683_v4 }
 0x65b   : > { %10174 = vst [vmem:[#allocation36_spill] sm:$0xff] %v9789_v60  ;;  %10175 = vst [vmem:[#allocation52_spill] sm:$0xff] %v9792_v48  ;;  %v9817_v38 = vadd.f32 %v9692_v20, %v4684_v13  ;;  %v9820_v43 = vadd.f32 %v9692_v20, %v4685_v21  ;;  %v10194_v48 = vld [vmem:[#allocation31_spill] sm:$0xff] }
 0x65c   : > { %10176 = vst [vmem:[#allocation48_spill] sm:$0xff] %v9795_v16  ;;  %10177 = vst [vmem:[#allocation50_spill] sm:$0xff] %v9798_v45  ;;  %v10192_v45 = vld [vmem:[#allocation32_spill] sm:$0xff]  ;;  %v10193_v16 = vld [vmem:[#allocation42_spill] sm:$0xff] }
 0x65d   : > { %10178 = vst [vmem:[#allocation24_spill] sm:$0xff] %v9801_v63  ;;  %10179 = vst [vmem:[#allocation25_spill] sm:$0xff] %v9807_v40  ;;  %v10190_v40 = vld [vmem:[#allocation30_spill] sm:$0xff]  ;;  %v10191_v63 = vld [vmem:[#allocation45_spill] sm:$0xff] }
 0x65e   : > { %10180 = vst [vmem:[#allocation53_spill] sm:$0xff] %v9810_v3  ;;  %10181 = vst [vmem:[#allocation39_spill] sm:$0xff] %v9817_v38  ;;  %v10189_v3 = vld [vmem:[#allocation43_spill] sm:$0xff] }
 0x65f   : > { %10182 = vst [vmem:[#allocation37_spill] sm:$0xff] %v9820_v43  ;;  %v10188_v43 = vld [vmem:[#allocation40_spill] sm:$0xff] }
 0x664   : > { %v7177_v15 = vpop.eup %7176 }
 0x665   : > { %v5191_v49 = vmul.f32 %v7177_v15, %v5077_v19 }
 0x667   : > { %v5192_v26 = vmul.f32 %v5191_v49, %v9679_v5  ;;  %v5197_v51 = vrot.slane %v5191_v49, %v10142_v57  ;;  %v10184_v49 = vld [vmem:[#allocation28_spill] sm:$0xff] }
 0x669   : > { %v5193_v22 = vsub.f32 %v5078_v25, %v5192_v26  ;;  %v5226_v39 = vmul.f32 %v5197_v51, %v9652_v59  ;;  %v5227_v35 = vmul.f32 %v5197_v51, %v9662_v44  ;;  %v5198_v9 = vmul.f32 %v5197_v51, %v9518_v24  ;;  %v10185_v25 = vld [vmem:[#allocation38_spill] sm:$0xff]  ;;  %v10186_v26 = vld [vmem:[#allocation27_spill] sm:$0xff] }
 0x66a   : > { %v5199_v5 = vmul.f32 %v5197_v51, %v9522_v52  ;;  %v5200_v19 = vmul.f32 %v9516_v27, %v5197_v51  ;;  %v5201_v62 = vmul.f32 %v9520_v10, %v5197_v51  ;;  %v5202_v4 = vmul.f32 %v5197_v51, %v9535_v32 }
 0x66b   : > { %v9830_v13 = vrot.slane %v5193_v22, %v10142_v57  ;;  %v5203_v20 = vmul.f32 %v5197_v51, %v9545_v14  ;;  %v5204_v21 = vmul.f32 %v9530_v58, %v5197_v51  ;;  %v5205_v59 = vmul.f32 %v9540_v12, %v5197_v51  ;;  %v10183_v57 = vld [vmem:[#allocation41_spill] sm:$0xff] }
 0x66c   : > { %v5206_v44 = vmul.f32 %v5197_v51, %v9555_v18  ;;  %v5207_v24 = vmul.f32 %v5197_v51, %v9565_v47  ;;  %v5208_v52 = vmul.f32 %v9550_v2, %v5197_v51  ;;  %v5209_v27 = vmul.f32 %v9560_v34, %v5197_v51  ;;  %v10187_v22 = vld [vmem:[#allocation29_spill] sm:$0xff] }
 0x66d   : > { %v5264_v10 = vadd.f32 %v9830_v13, %v5226_v39  ;;  %v5265_v32 = vadd.f32 %v9830_v13, %v5227_v35  ;;  %v5210_v15 = vmul.f32 %v5197_v51, %v10183_v57  ;;  %v5211_v14 = vmul.f32 %v5197_v51, %v10184_v49 }
 0x66e   : > { %v5212_v58 = vmul.f32 %v10185_v25, %v5197_v51  ;;  %v5213_v12 = vmul.f32 %v10186_v26, %v5197_v51  ;;  %v5214_v18 = vmul.f32 %v5197_v51, %v10187_v22  ;;  %v5215_v47 = vmul.f32 %v5197_v51, %v10188_v43  ;;  %v10195_v22 = vld [vmem:[#allocation33_spill] sm:$0xff]  ;;  %v10196_v43 = vld [vmem:[#allocation44_spill] sm:$0xff] }
 0x66f   : > { %v5296_v38 = vadd.f32 %v5264_v10, %v4720_v31  ;;  %v5297_v2 = vadd.f32 %v5265_v32, %v4721_v0  ;;  %v5216_v34 = vmul.f32 %v10189_v3, %v5197_v51  ;;  %v5217_v39 = vmul.f32 %v10190_v40, %v5197_v51  ;;  %v10197_v0 = vld [vmem:[#allocation47_spill] sm:$0xff]  ;;  %v10198_v3 = vld [vmem:[#allocation34_spill] sm:$0xff] }
 0x670   : > { %v5218_v35 = vmul.f32 %v5197_v51, %v10191_v63  ;;  %v5219_v57 = vmul.f32 %v5197_v51, %v10192_v45  ;;  %v5220_v49 = vmul.f32 %v10193_v16, %v5197_v51  ;;  %v5221_v25 = vmul.f32 %v10194_v48, %v5197_v51  ;;  %v10199_v40 = vld [vmem:[#allocation46_spill] sm:$0xff] }
 0x671   : > { %v5328_v60 = vmax.f32 %v5296_v38, 0.0  ;;  %v5329_v26 = vmax.f32 %v5297_v2, 0.0  ;;  %v5222_v11 = vmul.f32 %v5197_v51, %v10195_v22  ;;  %v5223_v31 = vmul.f32 %v5197_v51, %v10196_v43 }
 0x672   : > { %v5224_v10 = vmul.f32 %v10197_v0, %v5197_v51  ;;  %v5225_v32 = vmul.f32 %v10198_v3, %v5197_v51  ;;  %v5228_v55 = vmul.f32 %v10199_v40, %v5197_v51  ;;  %v5229_v63 = vmul.f32 %v9657_v8, %v5197_v51  ;;  %v10200_v3 = vld [vmem:[#allocation49_spill] sm:$0xff]  ;;  %v10202_v40 = vld [vmem:[#allocation36_spill] sm:$0xff] }
 0x673   : > { %v5953_v45 = vpack.c.bf16 %v5329_v26, %v5328_v60  ;;  %v5236_v16 = vadd.f32 %v9830_v13, %v5198_v9  ;;  %v5237_v48 = vadd.f32 %v9830_v13, %v5199_v5  ;;  %v5238_v38 = vadd.f32 %v9830_v13, %v5200_v19 }
 0x674   : > { %v5239_v2 = vadd.f32 %v9830_v13, %v5201_v62  ;;  %v5240_v22 = vadd.f32 %v9830_v13, %v5202_v4  ;;  %v5241_v43 = vadd.f32 %v9830_v13, %v5203_v20  ;;  %v5242_v0 = vadd.f32 %v9830_v13, %v5204_v21 }
 0x675   : > { %5973 = vst [vmem:[%s9868_s13 + $0x70] sm:$0xff] %v5953_v45   ;;  %v5243_v8 = vadd.f32 %v9830_v13, %v5205_v59  ;;  %v5244_v60 = vadd.f32 %v9830_v13, %v5206_v44  ;;  %v5245_v51 = vadd.f32 %v9830_v13, %v5207_v24  ;;  %v5246_v9 = vadd.f32 %v9830_v13, %v5208_v52  ;;  %v10204_v45 = vld [vmem:[#allocation48_spill] sm:$0xff] }
 0x676   : > { %v5247_v5 = vadd.f32 %v9830_v13, %v5209_v27  ;;  %v5248_v19 = vadd.f32 %v9830_v13, %v5210_v15  ;;  %v5249_v62 = vadd.f32 %v9830_v13, %v5211_v14  ;;  %v5250_v4 = vadd.f32 %v9830_v13, %v5212_v58 }
 0x677   : > { %v5251_v20 = vadd.f32 %v9830_v13, %v5213_v12  ;;  %v5252_v21 = vadd.f32 %v9830_v13, %v5214_v18  ;;  %v5253_v59 = vadd.f32 %v9830_v13, %v5215_v47  ;;  %v5254_v44 = vadd.f32 %v9830_v13, %v5216_v34 }
 0x678   : > { %v5255_v24 = vadd.f32 %v9830_v13, %v5217_v39  ;;  %v5256_v52 = vadd.f32 %v9830_v13, %v5218_v35  ;;  %v5257_v27 = vadd.f32 %v9830_v13, %v5219_v57  ;;  %v5258_v15 = vadd.f32 %v9830_v13, %v5220_v49 }
 0x679   : > { %v5259_v14 = vadd.f32 %v9830_v13, %v5221_v25  ;;  %v5260_v58 = vadd.f32 %v9830_v13, %v5222_v11  ;;  %v5261_v12 = vadd.f32 %v9830_v13, %v5223_v31  ;;  %v5262_v18 = vadd.f32 %v9830_v13, %v5224_v10 }
 0x67a   : > { %v5263_v47 = vadd.f32 %v9830_v13, %v5225_v32  ;;  %v5266_v34 = vadd.f32 %v9830_v13, %v5228_v55  ;;  %v5267_v39 = vadd.f32 %v9830_v13, %v5229_v63  ;;  %v5268_v35 = vadd.f32 %v5236_v16, %v9723_v50  ;;  %v10201_v32 = vld [vmem:[#allocation35_spill] sm:$0xff]  ;;  %v10203_v63 = vld [vmem:[#allocation52_spill] sm:$0xff]  ;;  %v10205_v16 = vld [vmem:[#allocation50_spill] sm:$0xff] }
 0x67b   : > { %v5269_v57 = vadd.f32 %v5237_v48, %v9726_v28  ;;  %v5270_v49 = vadd.f32 %v5238_v38, %v9729_v36  ;;  %v5271_v25 = vadd.f32 %v5239_v2, %v9732_v56  ;;  %v5272_v11 = vadd.f32 %v5240_v22, %v9735_v61  ;;  %v10206_v48 = vld [vmem:[#allocation24_spill] sm:$0xff]  ;;  %v10207_v38 = vld [vmem:[#allocation25_spill] sm:$0xff]  ;;  %v10209_v22 = vld [vmem:[#allocation39_spill] sm:$0xff] }
 0x67c   : > { %v5273_v26 = vadd.f32 %v5241_v43, %v9738_v33  ;;  %v5274_v31 = vadd.f32 %v5242_v0, %v9741_v41  ;;  %v5275_v10 = vadd.f32 %v5243_v8, %v9744_v30  ;;  %v5276_v55 = vadd.f32 %v5244_v60, %v9747_v46  ;;  %v10208_v2 = vld [vmem:[#allocation53_spill] sm:$0xff] }
 0x67d   : > { %v5277_v13 = vadd.f32 %v5245_v51, %v9750_v54  ;;  %v5278_v50 = vadd.f32 %v5246_v9, %v9753_v1  ;;  %v5279_v28 = vadd.f32 %v5247_v5, %v9759_v17  ;;  %v5280_v36 = vadd.f32 %v5248_v19, %v9762_v42  ;;  %v10210_v43 = vld [vmem:[#allocation37_spill] sm:$0xff] }
 0x67e   : > { %v5281_v56 = vadd.f32 %v5249_v62, %v9765_v6  ;;  %v5282_v61 = vadd.f32 %v5250_v4, %v9768_v29  ;;  %v5283_v33 = vadd.f32 %v5251_v20, %v9771_v53  ;;  %v5284_v41 = vadd.f32 %v5252_v21, %v9774_v23 }
 0x67f   : > { %v5285_v30 = vadd.f32 %v5253_v59, %v9777_v7  ;;  %v5286_v46 = vadd.f32 %v5254_v44, %v9780_v37  ;;  %v5287_v54 = vadd.f32 %v5255_v24, %v10200_v3  ;;  %v5288_v1 = vadd.f32 %v5256_v52, %v10201_v32 }
 0x680   : > { %v5289_v17 = vadd.f32 %v5257_v27, %v10202_v40  ;;  %v5290_v42 = vadd.f32 %v5258_v15, %v10203_v63  ;;  %v5291_v6 = vadd.f32 %v5259_v14, %v10204_v45  ;;  %v5292_v29 = vadd.f32 %v5260_v58, %v10205_v16 }
 0x681   : > { %v5293_v53 = vadd.f32 %v5261_v12, %v10206_v48  ;;  %v5294_v23 = vadd.f32 %v5262_v18, %v10207_v38  ;;  %v5295_v7 = vadd.f32 %v5263_v47, %v10208_v2  ;;  %v5298_v37 = vadd.f32 %v5266_v34, %v10209_v22 }
 0x682   : > { %v5299_v0 = vadd.f32 %v5267_v39, %v10210_v43  ;;  %v5300_v8 = vmax.f32 %v5268_v35, 0.0  ;;  %v5301_v60 = vmax.f32 %v5269_v57, 0.0  ;;  %v5302_v51 = vmax.f32 %v5270_v49, 0.0 }
 0x683   : > { %v5303_v9 = vmax.f32 %v5271_v25, 0.0  ;;  %v5304_v5 = vmax.f32 %v5272_v11, 0.0  ;;  %v5305_v19 = vmax.f32 %v5273_v26, 0.0  ;;  %v5306_v62 = vmax.f32 %v5274_v31, 0.0 }
 0x684   : > { %v5307_v4 = vmax.f32 %v5275_v10, 0.0  ;;  %v5308_v20 = vmax.f32 %v5276_v55, 0.0  ;;  %v5309_v21 = vmax.f32 %v5277_v13, 0.0  ;;  %v5310_v59 = vmax.f32 %v5278_v50, 0.0 }
 0x685   : > { %v5311_v44 = vmax.f32 %v5279_v28, 0.0  ;;  %v5312_v24 = vmax.f32 %v5280_v36, 0.0  ;;  %v5313_v52 = vmax.f32 %v5281_v56, 0.0  ;;  %v5314_v27 = vmax.f32 %v5282_v61, 0.0 }
 0x686   : > { %v5315_v15 = vmax.f32 %v5283_v33, 0.0  ;;  %v5316_v14 = vmax.f32 %v5284_v41, 0.0  ;;  %v5317_v58 = vmax.f32 %v5285_v30, 0.0  ;;  %v5318_v12 = vmax.f32 %v5286_v46, 0.0 }
 0x687   : > { %v5319_v18 = vmax.f32 %v5287_v54, 0.0  ;;  %v5320_v47 = vmax.f32 %v5288_v1, 0.0  ;;  %v5321_v34 = vmax.f32 %v5289_v17, 0.0  ;;  %v5322_v39 = vmax.f32 %v5290_v42, 0.0 }
 0x688   : > { %v5323_v35 = vmax.f32 %v5291_v6, 0.0  ;;  %v5324_v57 = vmax.f32 %v5292_v29, 0.0  ;;  %v5325_v49 = vmax.f32 %v5293_v53, 0.0  ;;  %v5326_v25 = vmax.f32 %v5294_v23, 0.0 }
 0x689   : > { %v5327_v11 = vmax.f32 %v5295_v7, 0.0  ;;  %v5330_v26 = vmax.f32 %v5298_v37, 0.0  ;;  %v5331_v31 = vmax.f32 %v5299_v0, 0.0  ;;  %v5883_v10 = vpack.c.bf16 %v5301_v60, %v5300_v8 }
 0x68a   : > { %v5888_v55 = vpack.c.bf16 %v5303_v9, %v5302_v51  ;;  %v5893_v13 = vpack.c.bf16 %v5305_v19, %v5304_v5  ;;  %v5898_v50 = vpack.c.bf16 %v5307_v4, %v5306_v62  ;;  %v5903_v28 = vpack.c.bf16 %v5309_v21, %v5308_v20 }
 0x68b   : > { %5884 = vst [vmem:[%s9868_s13] sm:$0xff] %v5883_v10   ;;  %v5908_v36 = vpack.c.bf16 %v5311_v44, %v5310_v59  ;;  %v5913_v56 = vpack.c.bf16 %v5313_v52, %v5312_v24  ;;  %v5918_v61 = vpack.c.bf16 %v5315_v15, %v5314_v27  ;;  %v5923_v33 = vpack.c.bf16 %v5317_v58, %v5316_v14 }
 0x68c   : > { %5960 = vst [vmem:[%s9868_s13 + $0x8] sm:$0xff] %v5888_v55   ;;  %5961 = vst [vmem:[%s9868_s13 + $0x10] sm:$0xff] %v5893_v13   ;;  %v5928_v41 = vpack.c.bf16 %v5319_v18, %v5318_v12  ;;  %v5933_v30 = vpack.c.bf16 %v5321_v34, %v5320_v47  ;;  %v5938_v46 = vpack.c.bf16 %v5323_v35, %v5322_v39 }
 0x68d   : > { %5962 = vst [vmem:[%s9868_s13 + $0x18] sm:$0xff] %v5898_v50   ;;  %5963 = vst [vmem:[%s9868_s13 + $0x20] sm:$0xff] %v5903_v28   ;;  %v5943_v3 = vpack.c.bf16 %v5325_v49, %v5324_v57  ;;  %v5948_v54 = vpack.c.bf16 %v5327_v11, %v5326_v25  ;;  %v5958_v32 = vpack.c.bf16 %v5331_v31, %v5330_v26 }
 0x68e   : > { %5964 = vst [vmem:[%s9868_s13 + $0x28] sm:$0xff] %v5908_v36   ;;  %5965 = vst [vmem:[%s9868_s13 + $0x30] sm:$0xff] %v5913_v56  }
 0x68f   : > { %5966 = vst [vmem:[%s9868_s13 + $0x38] sm:$0xff] %v5918_v61   ;;  %5967 = vst [vmem:[%s9868_s13 + $0x40] sm:$0xff] %v5923_v33  }
 0x690   : > { %5968 = vst [vmem:[%s9868_s13 + $0x48] sm:$0xff] %v5928_v41   ;;  %5969 = vst [vmem:[%s9868_s13 + $0x50] sm:$0xff] %v5933_v30  }
 0x691   : > { %5970 = vst [vmem:[%s9868_s13 + $0x58] sm:$0xff] %v5938_v46   ;;  %5971 = vst [vmem:[%s9868_s13 + $0x60] sm:$0xff] %v5943_v3  }
 0x692   : > { %5972 = vst [vmem:[%s9868_s13 + $0x68] sm:$0xff] %v5948_v54   ;;  %5974 = vst [vmem:[%s9868_s13 + $0x78] sm:$0xff] %v5958_v32  }
 0x693   : > { %7377 = shalt.err (!%p7374_p3)
}
 0x694   : > { %s7378_s1 = scalar_lea.hbm %s9934_s20, 2048  ;;  %s7382_s3 = scalar_lea.hbm %s10211_s6, 4096 }
 0x695   : > { %p7379_p4 = scmp.ne.s32.totalorder %s9934_s20, %s7378_s1  ;;  %p7383_p0 = scmp.lt.s32.totalorder %s9934_s20, %s10211_s6 }
 0x696   : > { %p7384_p7 = scmp.lt.s32.totalorder %s7382_s3, %s7378_s1 }
 0x697   : > { %p7380_p6 = pnand %p7379_p4, %p10212_p8 }
 0x698   : > { %p7385_p2 = por %p7384_p7, %p7383_p0 }
 0x699   : > { %p7381_p12 = pneg %p7380_p6 }
 0x69b   : > { %p7386_p9 = pnand %p7385_p2, %p7381_p12 }
 0x69d   : > { %7389 = shalt.err (!%p7386_p9)
}
 0x69e   : > { %s7457_s27 = smov 64   ;;  %s7458_s19 = smov 4  }
 0x69f   : > { %6961 = dma.vmem_to_hbm [thread:$0]  (%p10212_p8), %s9936_s2, 2048, %s9934_s20, %s5493_s18, %s7457_s27, %s7457_s27, %s7458_s19  }
 0x6a0 PF: > { %s5521_s4 = sand.u32 1, %s7428_s29   ;;  %p10213_p10 = scmp.ne.s32.totalorder %s10069_s17, 0 }
 0x6a1   : > { %p10214_p11 = scmp.ge.s32.totalorder %s7440_s16, 2  ;;  %s5522_s14 = scalar_lea.sflag [#allocation5], %s5521_s4 }
 0x6a3   : > { %p6987_p13 = pnand %p10214_p11, %p10213_p10 }
 0x6a5   : > { %p6988_p5 = pneg %p6987_p13 }
 0x6a7   : > { %7423 = dma.done.wait (%p6988_p5), %s5522_s14, 2048  }
 0x6a8   : > { %7425 = vsyncadd (%p6988_p5), %s5522_s14, 4294965248  ;;  %s10215_s16 = sld [smem:[#allocation22_spill]]  ;;  %s10218_s29 = smov %s7432_s30 }
 0x6a9   : > { %s10216_s21 = sld [smem:[#allocation21_spill]] }
 0x6aa   : > { %s10217_s15 = sld [smem:[#allocation23_spill]] }
 0x6ae   : > { %p30_p1 = scmp.ge.s32.totalorder %s10215_s16, 4  }
 0x6af   : > { %s10219_s30 = smov %s10216_s21 }
 0x6b0   :  { %32 = sbr.rel (!%p30_p1) target bundleno = 16 (0x10), region = 156 }
 0x6b5   :  { %5527 = vsyncpa [#allocation4], 1 }
 0x6b6   :  { %5529 = vsyncpa [#allocation4 + $0x1], 1 }
 0x6b7   :  { %5530 = vsyncpa [#allocation7], 1 }
 0x6b8   :  { %5531 = vsyncpa [#allocation10], 1 }
 0x6b9   :  { %5532 = vsyncpa [#allocation13], 1 }
 0x6ba   :  { %5533 = vsyncpa [#allocation5], 1 }
 0x6bb   :  { %5535 = vsyncpa [#allocation5 + $0x1], 1 }

</bundles_post_ra>
